<compile_context>
chip_gen: v7x
topology: tpu7x:2x2x1
jax: 0.10.0
libtpu: 0.0.40
codegen_flags: <defaults>
</compile_context>

<pallas_src>
import functools

import jax
import jax.numpy as jnp
from jax import lax
from jax.experimental import pallas as pl
from jax.experimental.pallas import tpu as pltpu

EPS = 1e-5


# ----------------------------------------------------------------------------
# Pallas kernel
# ----------------------------------------------------------------------------
def _dbhead_kernel(x_ref, w1_ref, sh1_ref, wd1_ref, sh2_ref, wd2_ref, bo_ref,
                   out_ref, *, k, cin, wp, tps):
    """One (batch, spatial-tile) per grid step.  Layout: spatial on sublanes,
    channels on lanes.

    x_ref  : (1, Lin, Cin)  bf16  full zero-padded image, flat with row
                                  stride wp = W+2 (resident across tiles)
    w1_ref : (9*Cin, 128)   bf16  conv3x3 weights, BN1 scale folded in;
                                  row = (dy*3+dx)*Cin + ci, col = branch*64+o
    sh1_ref: (1, 128)       f32   folded BN1 shift
    wd1_ref: (128, 512)     bf16  block-diag deconv1 (4 taps x 2 branches),
                                  BN2 scale folded in
    sh2_ref: (1, 512)       f32   folded BN2 shift
    wd2_ref: (512, 32)      bf16  block-diag deconv2 (branch x tap1 diagonal)
    bo_ref : (1, 32)        f32   deconv2 bias
    out_ref: (1, tps, 48)   bf16  [shrink16 | thresh16 | binary16],
                                  ch%16 = (dy1*2+dx1)*4 + dy2*2+dx2
    """
    base = pl.multiple_of(pl.program_id(1) * tps, 8)
    ws = tps + 2 * wp + 2                      # window rows covering all taps

    # One aligned dynamic-sublane load; all tap offsets are static slices.
    window = x_ref[0, pl.ds(base, ws), :]      # (ws, cin) bf16

    # conv3x3 (both branches fused) as 9 accumulated matmuls  -> (tps, 128)
    acc = jnp.zeros((tps, 128), jnp.float32)
    for dy in range(3):
        for dx in range(3):
            tap = dy * 3 + dx
            off = dy * wp + dx
            xt = window[off:off + tps, :]                      # (tps, cin)
            wt = w1_ref[tap * cin:(tap + 1) * cin, :]          # (cin, 128)
            acc = acc + jnp.dot(xt, wt, preferred_element_type=jnp.float32)

    # folded-BN shift + ReLU (scale already in the weights)
    a = jnp.maximum(acc + sh1_ref[...], 0.0).astype(jnp.bfloat16)   # (tps,128)

    # ConvTranspose2d(64,64,2,2), all 4 taps, both branches     -> (tps, 512)
    h = jnp.dot(a, wd1_ref[...], preferred_element_type=jnp.float32)
    h = jnp.maximum(h + sh2_ref[...], 0.0).astype(jnp.bfloat16)

    # ConvTranspose2d(64,1,2,2), all 16 tap pairs, both branches -> (tps, 32)
    z = jnp.dot(h, wd2_ref[...], preferred_element_type=jnp.float32)
    z = z + bo_ref[...]

    # Exact sigmoid (exp on the EUP, exact divide) for accuracy of the k=50
    # DB step.
    prob = 1.0 / (1.0 + jnp.exp(-z))
    s_map = prob[:, 0:16]
    t_map = prob[:, 16:32]
    b_map = 1.0 / (1.0 + jnp.exp(-k * (s_map - t_map)))

    fused = jnp.concatenate([s_map, t_map, b_map], axis=1)      # (tps, 48)
    out_ref[0] = fused.astype(out_ref.dtype)


# ----------------------------------------------------------------------------
# Parameter folding (BN scale folded into weights; channel-on-lanes layout)
# ----------------------------------------------------------------------------
def _fold_params(pb, pt):
    def fold_one(p):
        cin = p["w_conv"].shape[1]
        s1 = p["g1"] / jnp.sqrt(p["v1"] + EPS)                     # (64,)
        sh1 = (p["b_conv"] - p["m1"]) * s1 + p["be1"]              # (64,)
        # (O, Cin, 3, 3) -> (9*Cin, 64); row = (dy*3+dx)*Cin + ci, col = o
        w1 = jnp.transpose(p["w_conv"], (2, 3, 1, 0)).reshape(9 * cin, 64)
        w1 = w1 * s1[None, :]                                      # fold BN1

        s2 = p["g2"] / jnp.sqrt(p["v2"] + EPS)
        sh2 = (p["b_dc1"] - p["m2"]) * s2 + p["be2"]
        # (I, O, 2, 2) -> (64, 256); row = i, col = (dy1*2+dx1)*64 + o
        wd1 = jnp.transpose(p["w_dc1"], (0, 2, 3, 1)).reshape(64, 256)
        wd1 = wd1 * jnp.tile(s2, 4)[None, :]                       # fold BN2
        sh2r = jnp.tile(sh2, 4)                                    # (256,)

        # (I=64, O=1, 2, 2) -> (64, 4); col = dy2*2+dx2
        wt2 = p["w_dc2"].reshape(64, 4)
        # (256, 16): [tap1*64+i, tap1*4+tap2] = wt2[i, tap2]
        wd2 = jnp.kron(jnp.eye(4, dtype=jnp.float32), wt2)
        bo = jnp.full((16,), p["b_dc2"][0], jnp.float32)
        return w1, sh1, wd1, sh2r, wd2, bo

    w1b, sh1b, wd1b, sh2b, wd2b, bob = fold_one(pb)
    w1t, sh1t, wd1t, sh2t, wd2t, bot = fold_one(pt)

    W1 = jnp.concatenate([w1b, w1t], axis=1)                       # (9Cin,128)
    SH1 = jnp.concatenate([sh1b, sh1t]).reshape(1, 128)

    Z1 = jnp.zeros((64, 256), jnp.float32)
    WD1 = jnp.concatenate([jnp.concatenate([wd1b, Z1], axis=1),
                           jnp.concatenate([Z1, wd1t], axis=1)], axis=0)  # (128,512)
    SH2 = jnp.concatenate([sh2b, sh2t]).reshape(1, 512)

    Z2 = jnp.zeros((256, 16), jnp.float32)
    WD2 = jnp.concatenate([jnp.concatenate([wd2b, Z2], axis=1),
                           jnp.concatenate([Z2, wd2t], axis=1)], axis=0)  # (512,32)
    BO = jnp.concatenate([bob, bot]).reshape(1, 32)

    return (W1.astype(jnp.bfloat16), SH1.astype(jnp.float32),
            WD1.astype(jnp.bfloat16), SH2.astype(jnp.float32),
            WD2.astype(jnp.bfloat16), BO.astype(jnp.float32))


# ----------------------------------------------------------------------------
# Wrapper-side layout glue
# ----------------------------------------------------------------------------
def _pick_tp(lout):
    """Spatial tile (MXU M dim, sublanes).  Multiple of 8."""
    if lout >= 8 * 1024:
        return 1024
    if lout >= 2 * 1024:
        return 512
    if lout >= 256:
        return ((lout + 1) // 2 + 7) // 8 * 8       # two tiles
    return max(8, (lout + 7) // 8 * 8)              # single tile


def _unscatter(out, B, H, W, wp):
    """(B, Lout_pad, 48) bf16 -> three (B, 1, 4H, 4W) f32 maps."""
    y = out[:, :H * wp, :].reshape(B, H, wp, 48)[:, :, :W, :]      # (B,H,W,48)
    y = y.reshape(B, H, W, 3, 2, 2, 2, 2).astype(jnp.float32)
    # (b, h, w, m, dy1, dx1, dy2, dx2) -> (b, m, h, dy1, dy2, w, dx1, dx2)
    y = jnp.transpose(y, (0, 3, 1, 4, 6, 2, 5, 7)).reshape(B, 3, 4 * H, 4 * W)
    return y[:, 0:1], y[:, 1:2], y[:, 2:3]


def _const_map(nd):
    return lambda b, p, _nd=nd: (0,) * _nd


# ----------------------------------------------------------------------------
# Public forward
# ----------------------------------------------------------------------------
def dbhead_forward(x_nchw, params_bin, params_thr, k=50.0):
    B, cin, H, W = x_nchw.shape
    wp, hp = W + 2, H + 2
    lout = H * wp                               # flat output length (row stride wp)
    tps = _pick_tp(lout)
    n_p = pl.cdiv(lout, tps)
    lout_pad = n_p * tps
    lin = max(hp * wp, lout_pad + 2 * wp + 2)
    lin = (lin + 7) // 8 * 8

    # Zero-pad once (1x traffic), spatial-major / channel-minor, bf16.
    xf = jnp.pad(x_nchw, ((0, 0), (0, 0), (1, 1), (1, 1)))          # (B,C,hp,wp)
    xf = jnp.transpose(xf, (0, 2, 3, 1)).reshape(B, hp * wp, cin)
    xf = jnp.pad(xf, ((0, 0), (0, lin - hp * wp), (0, 0))).astype(jnp.bfloat16)

    packed = _fold_params(params_bin, params_thr)

    in_specs = ([pl.BlockSpec((1, lin, cin), lambda b, p: (b, 0, 0))]
                + [pl.BlockSpec(a.shape, _const_map(a.ndim)) for a in packed])
    out_spec = pl.BlockSpec((1, tps, 48), lambda b, p: (b, p, 0))
    out_sd = jax.ShapeDtypeStruct((B, lout_pad, 48), jnp.bfloat16)

    grid_spec = pltpu.PrefetchScalarGridSpec(
        num_scalar_prefetch=0,
        grid=(B, n_p),
        in_specs=in_specs,
        out_specs=out_spec,
    )

    # Rough per-step VMEM (double-buffered blocks + intermediates); only raise
    # the scoped limit when the resident image makes it necessary.
    lane = 128
    est = (2 * (lin * max(cin, lane) * 2 + tps * lane * 2)
           + 2 * ((9 * cin * lane + 128 * 512 + 512 * lane) * 2)
           + tps * (128 + 2 * 512) * 4)
    cp_kwargs = {"dimension_semantics": ("parallel", "parallel")}
    if est > 12 * 2 ** 20:
        cp_kwargs["vmem_limit_bytes"] = 64 * 2 ** 20

    kern = functools.partial(_dbhead_kernel, k=float(k), cin=cin, wp=wp, tps=tps)
    out = pl.pallas_call(
        kern,
        out_shape=out_sd,
        grid_spec=grid_spec,
        compiler_params=pltpu.CompilerParams(**cp_kwargs),
    )(xf, *packed)

    return _unscatter(out, B, H, W, wp)


# ----------------------------------------------------------------------------
# Deterministic parameter init (shapes from DBHead.__init__)
# ----------------------------------------------------------------------------
def init_branch(key, in_channels):
    ks = jax.random.split(key, 14)
    f32 = jnp.float32
    return {
        "w_conv": 0.2 * jax.random.normal(ks[0], (64, in_channels, 3, 3), f32),
        "b_conv": 0.1 * jax.random.normal(ks[1], (64,), f32),
        "g1": 1.0 + 0.1 * jax.random.normal(ks[2], (64,), f32),
        "be1": 0.1 * jax.random.normal(ks[3], (64,), f32),
        "m1": 0.1 * jax.random.normal(ks[4], (64,), f32),
        "v1": 0.5 + jax.random.uniform(ks[5], (64,), f32),
        "w_dc1": 0.2 * jax.random.normal(ks[6], (64, 64, 2, 2), f32),
        "b_dc1": 0.1 * jax.random.normal(ks[7], (64,), f32),
        "g2": 1.0 + 0.1 * jax.random.normal(ks[8], (64,), f32),
        "be2": 0.1 * jax.random.normal(ks[9], (64,), f32),
        "m2": 0.1 * jax.random.normal(ks[10], (64,), f32),
        "v2": 0.5 + jax.random.uniform(ks[11], (64,), f32),
        "w_dc2": 0.2 * jax.random.normal(ks[12], (64, 1, 2, 2), f32),
        "b_dc2": 0.1 * jax.random.normal(ks[13], (1,), f32),
    }


# ----------------------------------------------------------------------------
# Pure-JAX reference (independent code path: lax.conv + einsum deconv, f32)
# ----------------------------------------------------------------------------
def reference(x, pb, pt, k=50.0):
    def bn(y, g, be, m, v):
        sh = (1, -1, 1, 1)
        return (y - m.reshape(sh)) / jnp.sqrt(v.reshape(sh) + EPS) * \
            g.reshape(sh) + be.reshape(sh)

    def deconv(y, w, b):
        B, _, H, W = y.shape
        O = w.shape[1]
        z = jnp.einsum("bihw,iokl->bohkwl", y, w,
                       precision=lax.Precision.HIGHEST)
        z = z.reshape(B, O, 2 * H, 2 * W)
        return z + b.reshape(1, -1, 1, 1)

    def branch(p):
        y = lax.conv_general_dilated(
            x, p["w_conv"], (1, 1), ((1, 1), (1, 1)),
            dimension_numbers=("NCHW", "OIHW", "NCHW"),
            precision=lax.Precision.HIGHEST)
        y = y + p["b_conv"].reshape(1, -1, 1, 1)
        y = jax.nn.relu(bn(y, p["g1"], p["be1"], p["m1"], p["v1"]))
        y = deconv(y, p["w_dc1"], p["b_dc1"])
        y = jax.nn.relu(bn(y, p["g2"], p["be2"], p["m2"], p["v2"]))
        y = deconv(y, p["w_dc2"], p["b_dc2"])
        return jax.nn.sigmoid(y)

    s = branch(pb)
    t = branch(pt)
    b = 1.0 / (1.0 + jnp.exp(-k * (s - t)))
    return s, t, b


# ----------------------------------------------------------------------------
if __name__ == "__main__":
    key = jax.random.PRNGKey(0)
    kx, kb, kt = jax.random.split(key, 3)

    B, Cin, H, W = 2, 4, 16, 16
    x = jax.random.normal(kx, (B, Cin, H, W), jnp.float32)
    params_bin = init_branch(kb, Cin)
    params_thr = init_branch(kt, Cin)

    K = 50.0
    shrink, thresh, binary = dbhead_forward(x, params_bin, params_thr, k=K)
    jax.block_until_ready((shrink, thresh, binary))

    assert shrink.shape == (B, 1, 4 * H, 4 * W)
    assert thresh.shape == (B, 1, 4 * H, 4 * W)
    assert binary.shape == (B, 1, 4 * H, 4 * W)

    rs, rt, rb = reference(x, params_bin, params_thr, k=K)

    # bf16 MXU operands (f32 accumulation) + bf16 outputs: shrink/thresh
    # tolerance reflects bf16 rounding; the binary map amplifies any (s-t)
    # error by up to k/4 = 12.5x, hence the looser bound.
    err_s = float(jnp.max(jnp.abs(shrink - rs)))
    err_t = float(jnp.max(jnp.abs(thresh - rt)))
    err_b = float(jnp.max(jnp.abs(binary - rb)))
    if not (err_s < 5e-2):
        raise AssertionError(f"shrink mismatch, max abs err = {err_s}")
    if not (err_t < 5e-2):
        raise AssertionError(f"thresh mismatch, max abs err = {err_t}")
    if not (err_b < 3.5e-1):
        raise AssertionError(f"binary mismatch, max abs err = {err_b}")

    # Internal consistency: binary ~ step(shrink, thresh) from the kernel's
    # own outputs.  The kernel computes binary from f32 s/t before the bf16
    # output rounding, which k=50 amplifies by up to k/4 -> loose-ish bound.
    cons = float(jnp.max(jnp.abs(
        binary - jax.nn.sigmoid(K * (shrink - thresh)))))
    if not (cons < 1.5e-1):
        raise AssertionError(f"step-function consistency err = {cons}")

    print("KERNEL_OK")
</pallas_src>

<mosaic_0001>
module attributes {stable_mosaic.version = 11 : i64} {
  func.func @_dbhead_kernel(%arg0: i32, %arg1: i32, %arg2: memref<1x328x4xbf16, #tpu.memory_space<vmem>>, %arg3: memref<36x128xbf16, #tpu.memory_space<vmem>>, %arg4: memref<1x128xf32, #tpu.memory_space<vmem>>, %arg5: memref<128x512xbf16, #tpu.memory_space<vmem>>, %arg6: memref<1x512xf32, #tpu.memory_space<vmem>>, %arg7: memref<512x32xbf16, #tpu.memory_space<vmem>>, %arg8: memref<1x32xf32, #tpu.memory_space<vmem>>, %arg9: memref<1x144x48xbf16, #tpu.memory_space<vmem>>) attributes {dimension_semantics = [#tpu.dimension_semantics<parallel>, #tpu.dimension_semantics<parallel>], iteration_bounds = array<i64: 2, 2>, scalar_prefetch = 0 : i64, scratch_operands = 0 : i64, tpu.core_type = #tpu.core_type<tc>, window_params = [{transform_indices = @transform_0, window_bounds = array<i64: 1, 328, 4>}, {pipeline_mode = #tpu.pipeline_mode<synchronous>, transform_indices = @transform_1, window_bounds = array<i64: 36, 128>}, {pipeline_mode = #tpu.pipeline_mode<synchronous>, transform_indices = @transform_2, window_bounds = array<i64: 1, 128>}, {pipeline_mode = #tpu.pipeline_mode<synchronous>, transform_indices = @transform_3, window_bounds = array<i64: 128, 512>}, {pipeline_mode = #tpu.pipeline_mode<synchronous>, transform_indices = @transform_4, window_bounds = array<i64: 1, 512>}, {pipeline_mode = #tpu.pipeline_mode<synchronous>, transform_indices = @transform_5, window_bounds = array<i64: 512, 32>}, {pipeline_mode = #tpu.pipeline_mode<synchronous>, transform_indices = @transform_6, window_bounds = array<i64: 1, 32>}, {transform_indices = @transform_7, window_bounds = array<i64: 1, 144, 48>}]} {
    %c144_i32 = arith.constant 144 : i32
    %0 = arith.muli %arg1, %c144_i32 : i32
    %1 = tpu.assume_multiple %0, 8 : i32
    %c0 = arith.constant 0 : index
    %2 = arith.index_cast %1 : i32 to index
    %c0_0 = arith.constant 0 : index
    %3 = vector.load %arg2[%c0, %2, %c0_0] : memref<1x328x4xbf16, #tpu.memory_space<vmem>>, vector<1x182x4xbf16>
    %4 = vector.shape_cast %3 : vector<1x182x4xbf16> to vector<182x4xbf16>
    %cst = arith.constant 0.000000e+00 : f32
    %5 = vector.broadcast %cst : f32 to vector<144x128xf32>
    %6 = vector.extract_strided_slice %4 {offsets = [0, 0], sizes = [144, 4], strides = [1, 1]} : vector<182x4xbf16> to vector<144x4xbf16>
    %c0_1 = arith.constant 0 : index
    %c0_2 = arith.constant 0 : index
    %7 = vector.load %arg3[%c0_1, %c0_2] : memref<36x128xbf16, #tpu.memory_space<vmem>>, vector<4x128xbf16>
    %cst_3 = arith.constant dense<0.000000e+00> : vector<144x128xf32>
    %8 = tpu.matmul %6, %7, %cst_3 {dimension_numbers = #tpu.dot_dimension_numbers<[1], [0], [0], [1], [0, 0, 1, 1], [], []>} : vector<144x4xbf16>, vector<4x128xbf16>, vector<144x128xf32> -> vector<144x128xf32>
    %9 = arith.addf %5, %8 : vector<144x128xf32>
    %10 = vector.extract_strided_slice %4 {offsets = [1, 0], sizes = [144, 4], strides = [1, 1]} : vector<182x4xbf16> to vector<144x4xbf16>
    %c4 = arith.constant 4 : index
    %c0_4 = arith.constant 0 : index
    %11 = vector.load %arg3[%c4, %c0_4] : memref<36x128xbf16, #tpu.memory_space<vmem>>, vector<4x128xbf16>
    %cst_5 = arith.constant dense<0.000000e+00> : vector<144x128xf32>
    %12 = tpu.matmul %10, %11, %cst_5 {dimension_numbers = #tpu.dot_dimension_numbers<[1], [0], [0], [1], [0, 0, 1, 1], [], []>} : vector<144x4xbf16>, vector<4x128xbf16>, vector<144x128xf32> -> vector<144x128xf32>
    %13 = arith.addf %9, %12 : vector<144x128xf32>
    %14 = vector.extract_strided_slice %4 {offsets = [2, 0], sizes = [144, 4], strides = [1, 1]} : vector<182x4xbf16> to vector<144x4xbf16>
    %c8 = arith.constant 8 : index
    %c0_6 = arith.constant 0 : index
    %15 = vector.load %arg3[%c8, %c0_6] : memref<36x128xbf16, #tpu.memory_space<vmem>>, vector<4x128xbf16>
    %cst_7 = arith.constant dense<0.000000e+00> : vector<144x128xf32>
    %16 = tpu.matmul %14, %15, %cst_7 {dimension_numbers = #tpu.dot_dimension_numbers<[1], [0], [0], [1], [0, 0, 1, 1], [], []>} : vector<144x4xbf16>, vector<4x128xbf16>, vector<144x128xf32> -> vector<144x128xf32>
    %17 = arith.addf %13, %16 : vector<144x128xf32>
    %18 = vector.extract_strided_slice %4 {offsets = [18, 0], sizes = [144, 4], strides = [1, 1]} : vector<182x4xbf16> to vector<144x4xbf16>
    %c12 = arith.constant 12 : index
    %c0_8 = arith.constant 0 : index
    %19 = vector.load %arg3[%c12, %c0_8] : memref<36x128xbf16, #tpu.memory_space<vmem>>, vector<4x128xbf16>
    %cst_9 = arith.constant dense<0.000000e+00> : vector<144x128xf32>
    %20 = tpu.matmul %18, %19, %cst_9 {dimension_numbers = #tpu.dot_dimension_numbers<[1], [0], [0], [1], [0, 0, 1, 1], [], []>} : vector<144x4xbf16>, vector<4x128xbf16>, vector<144x128xf32> -> vector<144x128xf32>
    %21 = arith.addf %17, %20 : vector<144x128xf32>
    %22 = vector.extract_strided_slice %4 {offsets = [19, 0], sizes = [144, 4], strides = [1, 1]} : vector<182x4xbf16> to vector<144x4xbf16>
    %c16 = arith.constant 16 : index
    %c0_10 = arith.constant 0 : index
    %23 = vector.load %arg3[%c16, %c0_10] : memref<36x128xbf16, #tpu.memory_space<vmem>>, vector<4x128xbf16>
    %cst_11 = arith.constant dense<0.000000e+00> : vector<144x128xf32>
    %24 = tpu.matmul %22, %23, %cst_11 {dimension_numbers = #tpu.dot_dimension_numbers<[1], [0], [0], [1], [0, 0, 1, 1], [], []>} : vector<144x4xbf16>, vector<4x128xbf16>, vector<144x128xf32> -> vector<144x128xf32>
    %25 = arith.addf %21, %24 : vector<144x128xf32>
    %26 = vector.extract_strided_slice %4 {offsets = [20, 0], sizes = [144, 4], strides = [1, 1]} : vector<182x4xbf16> to vector<144x4xbf16>
    %c20 = arith.constant 20 : index
    %c0_12 = arith.constant 0 : index
    %27 = vector.load %arg3[%c20, %c0_12] : memref<36x128xbf16, #tpu.memory_space<vmem>>, vector<4x128xbf16>
    %cst_13 = arith.constant dense<0.000000e+00> : vector<144x128xf32>
    %28 = tpu.matmul %26, %27, %cst_13 {dimension_numbers = #tpu.dot_dimension_numbers<[1], [0], [0], [1], [0, 0, 1, 1], [], []>} : vector<144x4xbf16>, vector<4x128xbf16>, vector<144x128xf32> -> vector<144x128xf32>
    %29 = arith.addf %25, %28 : vector<144x128xf32>
    %30 = vector.extract_strided_slice %4 {offsets = [36, 0], sizes = [144, 4], strides = [1, 1]} : vector<182x4xbf16> to vector<144x4xbf16>
    %c24 = arith.constant 24 : index
    %c0_14 = arith.constant 0 : index
    %31 = vector.load %arg3[%c24, %c0_14] : memref<36x128xbf16, #tpu.memory_space<vmem>>, vector<4x128xbf16>
    %cst_15 = arith.constant dense<0.000000e+00> : vector<144x128xf32>
    %32 = tpu.matmul %30, %31, %cst_15 {dimension_numbers = #tpu.dot_dimension_numbers<[1], [0], [0], [1], [0, 0, 1, 1], [], []>} : vector<144x4xbf16>, vector<4x128xbf16>, vector<144x128xf32> -> vector<144x128xf32>
    %33 = arith.addf %29, %32 : vector<144x128xf32>
    %34 = vector.extract_strided_slice %4 {offsets = [37, 0], sizes = [144, 4], strides = [1, 1]} : vector<182x4xbf16> to vector<144x4xbf16>
    %c28 = arith.constant 28 : index
    %c0_16 = arith.constant 0 : index
    %35 = vector.load %arg3[%c28, %c0_16] : memref<36x128xbf16, #tpu.memory_space<vmem>>, vector<4x128xbf16>
    %cst_17 = arith.constant dense<0.000000e+00> : vector<144x128xf32>
    %36 = tpu.matmul %34, %35, %cst_17 {dimension_numbers = #tpu.dot_dimension_numbers<[1], [0], [0], [1], [0, 0, 1, 1], [], []>} : vector<144x4xbf16>, vector<4x128xbf16>, vector<144x128xf32> -> vector<144x128xf32>
    %37 = arith.addf %33, %36 : vector<144x128xf32>
    %38 = vector.extract_strided_slice %4 {offsets = [38, 0], sizes = [144, 4], strides = [1, 1]} : vector<182x4xbf16> to vector<144x4xbf16>
    %c32 = arith.constant 32 : index
    %c0_18 = arith.constant 0 : index
    %39 = vector.load %arg3[%c32, %c0_18] : memref<36x128xbf16, #tpu.memory_space<vmem>>, vector<4x128xbf16>
    %cst_19 = arith.constant dense<0.000000e+00> : vector<144x128xf32>
    %40 = tpu.matmul %38, %39, %cst_19 {dimension_numbers = #tpu.dot_dimension_numbers<[1], [0], [0], [1], [0, 0, 1, 1], [], []>} : vector<144x4xbf16>, vector<4x128xbf16>, vector<144x128xf32> -> vector<144x128xf32>
    %41 = arith.addf %37, %40 : vector<144x128xf32>
    %c0_20 = arith.constant 0 : index
    %c0_21 = arith.constant 0 : index
    %42 = vector.load %arg4[%c0_20, %c0_21] : memref<1x128xf32, #tpu.memory_space<vmem>>, vector<1x128xf32>
    %43 = vector.broadcast %42 : vector<1x128xf32> to vector<144x128xf32>
    %44 = arith.addf %41, %43 : vector<144x128xf32>
    %cst_22 = arith.constant 0.000000e+00 : f32
    %45 = vector.broadcast %cst_22 : f32 to vector<144x128xf32>
    %46 = arith.maximumf %44, %45 : vector<144x128xf32>
    %47 = arith.truncf %46 : vector<144x128xf32> to vector<144x128xbf16>
    %c0_23 = arith.constant 0 : index
    %c0_24 = arith.constant 0 : index
    %48 = vector.load %arg5[%c0_23, %c0_24] : memref<128x512xbf16, #tpu.memory_space<vmem>>, vector<128x512xbf16>
    %cst_25 = arith.constant dense<0.000000e+00> : vector<144x512xf32>
    %49 = tpu.matmul %47, %48, %cst_25 {dimension_numbers = #tpu.dot_dimension_numbers<[1], [0], [0], [1], [0, 0, 1, 1], [], []>} : vector<144x128xbf16>, vector<128x512xbf16>, vector<144x512xf32> -> vector<144x512xf32>
    %c0_26 = arith.constant 0 : index
    %c0_27 = arith.constant 0 : index
    %50 = vector.load %arg6[%c0_26, %c0_27] : memref<1x512xf32, #tpu.memory_space<vmem>>, vector<1x512xf32>
    %51 = vector.broadcast %50 : vector<1x512xf32> to vector<144x512xf32>
    %52 = arith.addf %49, %51 : vector<144x512xf32>
    %cst_28 = arith.constant 0.000000e+00 : f32
    %53 = vector.broadcast %cst_28 : f32 to vector<144x512xf32>
    %54 = arith.maximumf %52, %53 : vector<144x512xf32>
    %55 = arith.truncf %54 : vector<144x512xf32> to vector<144x512xbf16>
    %c0_29 = arith.constant 0 : index
    %c0_30 = arith.constant 0 : index
    %56 = vector.load %arg7[%c0_29, %c0_30] : memref<512x32xbf16, #tpu.memory_space<vmem>>, vector<512x32xbf16>
    %cst_31 = arith.constant dense<0.000000e+00> : vector<144x32xf32>
    %57 = tpu.matmul %55, %56, %cst_31 {dimension_numbers = #tpu.dot_dimension_numbers<[1], [0], [0], [1], [0, 0, 1, 1], [], []>} : vector<144x512xbf16>, vector<512x32xbf16>, vector<144x32xf32> -> vector<144x32xf32>
    %c0_32 = arith.constant 0 : index
    %c0_33 = arith.constant 0 : index
    %58 = vector.load %arg8[%c0_32, %c0_33] : memref<1x32xf32, #tpu.memory_space<vmem>>, vector<1x32xf32>
    %59 = vector.broadcast %58 : vector<1x32xf32> to vector<144x32xf32>
    %60 = arith.addf %57, %59 : vector<144x32xf32>
    %cst_34 = arith.constant 0.000000e+00 : f32
    %61 = vector.broadcast %cst_34 : f32 to vector<144x32xf32>
    %62 = arith.subf %61, %60 : vector<144x32xf32>
    %63 = math.exp %62 : vector<144x32xf32>
    %cst_35 = arith.constant 1.000000e+00 : f32
    %64 = vector.broadcast %cst_35 : f32 to vector<144x32xf32>
    %65 = arith.addf %64, %63 : vector<144x32xf32>
    %cst_36 = arith.constant 1.000000e+00 : f32
    %66 = vector.broadcast %cst_36 : f32 to vector<144x32xf32>
    %67 = arith.divf %66, %65 : vector<144x32xf32>
    %68 = vector.extract_strided_slice %67 {offsets = [0, 0], sizes = [144, 16], strides = [1, 1]} : vector<144x32xf32> to vector<144x16xf32>
    %69 = vector.extract_strided_slice %67 {offsets = [0, 16], sizes = [144, 16], strides = [1, 1]} : vector<144x32xf32> to vector<144x16xf32>
    %70 = arith.subf %68, %69 : vector<144x16xf32>
    %cst_37 = arith.constant -5.000000e+01 : f32
    %71 = vector.broadcast %cst_37 : f32 to vector<144x16xf32>
    %72 = arith.mulf %71, %70 : vector<144x16xf32>
    %73 = math.exp %72 : vector<144x16xf32>
    %cst_38 = arith.constant 1.000000e+00 : f32
    %74 = vector.broadcast %cst_38 : f32 to vector<144x16xf32>
    %75 = arith.addf %74, %73 : vector<144x16xf32>
    %cst_39 = arith.constant 1.000000e+00 : f32
    %76 = vector.broadcast %cst_39 : f32 to vector<144x16xf32>
    %77 = arith.divf %76, %75 : vector<144x16xf32>
    %78 = tpu.concatenate %68, %69, %77 in 1 : vector<144x16xf32>, vector<144x16xf32>, vector<144x16xf32> -> vector<144x48xf32>
    %79 = arith.truncf %78 : vector<144x48xf32> to vector<144x48xbf16>
    %c0_40 = arith.constant 0 : index
    %c0_41 = arith.constant 0 : index
    %c0_42 = arith.constant 0 : index
    %80 = vector.load %arg9[%c0_40, %c0_41, %c0_42] : memref<1x144x48xbf16, #tpu.memory_space<vmem>>, vector<1x144x48xbf16>
    %81 = vector.shape_cast %80 : vector<1x144x48xbf16> to vector<144x48xbf16>
    %82 = vector.shape_cast %79 : vector<144x48xbf16> to vector<1x144x48xbf16>
    tpu.vector_store %arg9[%c0_40, %c0_41, %c0_42], %82 {strides = array<i32>} : memref<1x144x48xbf16, #tpu.memory_space<vmem>>, vector<1x144x48xbf16>,
    return
  }
  func.func @transform_0(%arg0: i32, %arg1: i32) -> (i32, i32, i32) {
    %c0_i32 = arith.constant 0 : i32
    %c0_i32_0 = arith.constant 0 : i32
    %c0_i32_1 = arith.constant 0 : i32
    return %arg0, %c0_i32, %c0_i32_0 : i32, i32, i32
  }
  func.func @transform_1(%arg0: i32, %arg1: i32) -> (i32, i32) {
    %c0_i32 = arith.constant 0 : i32
    %c0_i32_0 = arith.constant 0 : i32
    %c0_i32_1 = arith.constant 0 : i32
    return %c0_i32, %c0_i32_0 : i32, i32
  }
  func.func @transform_2(%arg0: i32, %arg1: i32) -> (i32, i32) {
    %c0_i32 = arith.constant 0 : i32
    %c0_i32_0 = arith.constant 0 : i32
    %c0_i32_1 = arith.constant 0 : i32
    return %c0_i32, %c0_i32_0 : i32, i32
  }
  func.func @transform_3(%arg0: i32, %arg1: i32) -> (i32, i32) {
    %c0_i32 = arith.constant 0 : i32
    %c0_i32_0 = arith.constant 0 : i32
    %c0_i32_1 = arith.constant 0 : i32
    return %c0_i32, %c0_i32_0 : i32, i32
  }
  func.func @transform_4(%arg0: i32, %arg1: i32) -> (i32, i32) {
    %c0_i32 = arith.constant 0 : i32
    %c0_i32_0 = arith.constant 0 : i32
    %c0_i32_1 = arith.constant 0 : i32
    return %c0_i32, %c0_i32_0 : i32, i32
  }
  func.func @transform_5(%arg0: i32, %arg1: i32) -> (i32, i32) {
    %c0_i32 = arith.constant 0 : i32
    %c0_i32_0 = arith.constant 0 : i32
    %c0_i32_1 = arith.constant 0 : i32
    return %c0_i32, %c0_i32_0 : i32, i32
  }
  func.func @transform_6(%arg0: i32, %arg1: i32) -> (i32, i32) {
    %c0_i32 = arith.constant 0 : i32
    %c0_i32_0 = arith.constant 0 : i32
    %c0_i32_1 = arith.constant 0 : i32
    return %c0_i32, %c0_i32_0 : i32, i32
  }
  func.func @transform_7(%arg0: i32, %arg1: i32) -> (i32, i32, i32) {
    %c0_i32 = arith.constant 0 : i32
    %c0_i32_0 = arith.constant 0 : i32
    return %arg0, %arg1, %c0_i32 : i32, i32, i32
  }
}

</mosaic_0001>

<bundles_post_ra>
// kernel: tpu_custom_call.1
= control target key start
LH: loop header
LB: loop body
LE: loop exit
PB: predicated region body
PF: predicated region fallthrough
CT: control target
= control target key end

     0   :  { %s4828_s24 = smov 0   ;;  %s4830_s25 = smov 0   ;;  %s6195_s0 = inlined_call_operand.vmem [shape: bf16[2,328,4], index: 0, kind: input, shape index: {}]   ;;  %s6196_s1 = inlined_call_operand.vmem [shape: bf16[36,128], index: 1, kind: input, shape index: {}]   ;;  %s6197_s2 = inlined_call_operand.vmem [shape: f32[1,128], index: 2, kind: input, shape index: {}]   ;;  %s6198_s3 = inlined_call_operand.vmem [shape: bf16[128,512], index: 3, kind: input, shape index: {}]   ;;  %s6199_s4 = inlined_call_operand.vmem [shape: f32[1,512], index: 4, kind: input, shape index: {}]   ;;  %s6200_s5 = inlined_call_operand.vmem [shape: bf16[512,32], index: 5, kind: input, shape index: {}]   ;;  %s6201_s6 = inlined_call_operand.vmem [shape: f32[1,32], index: 6, kind: input, shape index: {}]   ;;  %s6202_s7 = inlined_call_operand.vmem [shape: bf16[2,288,48], index: 7, kind: output, shape index: {}]  }
   0x1   :  { %s4832_s26 = smov 0   ;;  %s4834_s27 = smov 0  }
   0x2   :  { %s4836_s28 = smov 0  }
   0x3 LB: > { %s26_s29 = sadd.s32 1, %s4773_s26  ;;  %s29_s30 = sadd.s32 1, %s4777_s27  ;;  %s4781_s28 = sphi %s4836_s28, %s17_s28   ;;  %s4777_s27 = sphi %s4834_s27, %s6206_s27   ;;  %s4773_s26 = sphi %s4832_s26, %s6205_s26   ;;  %s4769_s25 = sphi %s4830_s25, %s6204_s25   ;;  %s4765_s24 = sphi %s4828_s24, %s6203_s24  }
   0x4   : > { %p27_p0 = scmp.ge.s32.totalorder %s26_s29, 2  ;;  %p3624_p1 = scmp.ge.s32.totalorder %s4781_s28, 1 }
   0x5   : > { %p251_p2 = scmp.lt.s32.totalorder %s4781_s28, 5 }
   0x6   : > { %s6208_s29 = smov (%p27_p0, %s26_s29), 0  ;;  %s6210_s30 = smov (!%p27_p0, %s29_s30), %s4777_s27 }
   0x7   : > { %p252_p3 = pnand %p3624_p1, %p251_p2  ;;  %p31_p4 = scmp.ge.s32.totalorder %s6210_s30, 2 }
   0x8   : > { %v4497_v0 = vld [vmem:[%s6196_s1] ss:$0 sps:$4 sm:$0xcc] (!%p252_p3)   ;;  %v4783_v1 = vmov (!%p252_p3), 0.0   ;;  %vm490_vm0 = vcmask (!%p252_p3), 1041408   ;;  %p287_p5 = scmp.lt.s32.totalorder (!%p252_p3), %s4769_s25, 1 }
   0x9   : > { %s6212_s30 = smov (%p31_p4, %s6210_s30), 0  ;;  %255 = sbr.rel (%p252_p3) target bundleno = 1311 (0x51f), region = 48 }
   0xa   : > { %4061 = vmatprep.subr.bf16.mxu0 (!%p252_p3), %v4783_v1  ;;  %4403 = vmatprep.subr.bf16.mxu1 (!%p252_p3), %v4783_v1  ;;  %s303_s10 = smul.u32 (!%p252_p3), 144, %s4765_s24  ;;  %v461_v2 = vrot.slane (!%p252_p3), %v4497_v0, 2  ;;  %vm4784_vm1 = vmmov (!%p252_p3), 0   ;;  %vm381_vm2 = vsmask.f32 (!%p252_p3), 7424  ;;  %vm462_vm3 = vcmask (!%p252_p3), 31744  }
   0xb   : > { %4063 = vmatprep.mubr.msk.bf16.mxu0 (!%p252_p3), %vm4784_vm1, %v4783_v1  ;;  %4083 = vmatprep.mubr.msk.bf16.mxu1 (!%p252_p3), %vm4784_vm1, %v4783_v1  ;;  %v725_v10 = vld [vmem:[%s6196_s1 + $0x4] sm:$0x3] (!%p252_p3)  ;;  %v331_v17 = vld [vmem:[%s6196_s1] sm:$0x3] (!%p252_p3)  ;;  %vm726_vm4 = vcmask (!%p252_p3), 1046528   ;;  %vm1251_vm6 = vcmask (!%p252_p3), 1045504  }
   0xc   : > { %v492_v3 = vsel (!%p252_p3), %vm490_vm0, %v461_v2, 0  ;;  %s304_s11 = sshra.s32 (!%p252_p3), %s303_s10, 3  ;;  %v774_v27 = vsel (!%p252_p3), %vm490_vm0, %v725_v10, 0  ;;  %v618_v33 = vsel (!%p252_p3), %vm490_vm0, %v331_v17, 0  ;;  %vm1047_vm5 = vsmask.f32 (!%p252_p3), 6400 }
   0xd   : > { %4062 = vmatpush3.bf16.msra.mxu0 (!%p252_p3), %v492_v3  ;;  %4404 = vmatpush3.bf16.msra.mxu1 (!%p252_p3), %v492_v3  ;;  %s3627_s13 = sshll.u32 (!%p252_p3), %s304_s11, 2  ;;  %v4509_v2 = vld [vmem:[%s6196_s1 + $0x4] ss:$0 sps:$4 sm:$0xcc] (!%p252_p3)   ;;  %vm1572_vm7 = vsmask.f32 (!%p252_p3), 5376 }
   0xe   : > { %4137 = vmatprep.subr.bf16.mxu0 (!%p252_p3), %v4783_v1  ;;  %4099 = vmatprep.subr.bf16.mxu1 (!%p252_p3), %v4783_v1  ;;  %vm1780_vm8 = vcmask (!%p252_p3), 1044480   ;;  %s4786_s9 = smov (!%p252_p3), 112   ;;  %s4787_s10 = smov (!%p252_p3), 32   ;;  %vm3424_vm9 = vcmask (!%p252_p3), 261120   ;;  %vm3515_vm10 = vcmask (!%p252_p3), 388096  }
   0xf   : > { %s292_s11 = smul.u32 (!%p252_p3), 18, %s4765_s24 }
  0x10   : > { %s6214_s25 = smov (!%p287_p5, %s4769_s25), 1 }
  0x11   : > { %s4405_s12 = smul.u32 164, %s6214_s25  ;;  %p295_p6 = scmp.lt.s32.totalorder %s292_s11, 35 }
  0x13   : > { %s291_s16 = scalar_lea.vmem %s6195_s0, %s4405_s12  ;;  %s4406_s12 = smul.u32 36, %s6214_s25 }
  0x14   : > { %s4879_s17 = scalar_lea.vmem %s291_s16, %s3627_s13  ;;  %s6216_s11 = smov (!%p295_p6, %s292_s11), 35 }
  0x15   : > { %v4882_v4 = vld [vmem:[%s4879_s17] sm:$0xff]   ;;  %v4885_v5 = vld [vmem:[%s4879_s17 + $0x8] sm:$0xff]   ;;  %v4897_v11 = vld [vmem:[%s4879_s17 + $0x30] sm:$0xff]   ;;  %s298_s13 = sadd.s32 %s4406_s12, %s6216_s11 }
  0x16   : > { %v383_v6 = vshrl.u32 %v4882_v4, 16  ;;  %v385_v7 = vshll.u32 %v4882_v4, 16  ;;  %v390_v8 = vshll.u32 %v4885_v5, 16  ;;  %v4891_v9 = vld [vmem:[%s4879_s17 + $0x28] sm:$0xff]   ;;  %v394_v12 = vshrl.u32 %v4885_v5, 16  ;;  %v4909_v18 = vld [vmem:[%s4879_s17 + $0x10] sm:$0xff]  }
  0x17   : > { %v4903_v16 = vshll.u32 %v4891_v9, 16  ;;  %v4912_v19 = vld [vmem:[%s4879_s17 + $0x38] sm:$0xff]   ;;  %v4915_v20 = vshrl.u32 %v4891_v9, 16  ;;  %v4918_v21 = vshll.u32 %v4897_v11, 16  ;;  %v4924_v25 = vshll.u32 %v4909_v18, 16  ;;  %v4951_v38 = vld [vmem:[%s4879_s17 + $0x40] sm:$0xff]  }
  0x18   : > { %v387_v13 = vrot.slane %v385_v7, 1  ;;  %v392_v14 = vrot.slane %v390_v8, 1  ;;  %v4900_v15 = vrot.slane %v390_v8, 2  ;;  %v4920_v22 = vrot.slane %v394_v12, 1  ;;  %v4947_v37 = vld [vmem:[%s4879_s17 + $0x18] sm:$0xff]   ;;  %v4960_v42 = vld [vmem:[%s4879_s17 + $0x20] sm:$0xff]  }
  0x19   : > { %v424_v24 = vrot.slane %v4903_v16, 1  ;;  %v432_v26 = vrot.slane %v4918_v21, 1  ;;  %v4935_v31 = vshrl.u32 %v4897_v11, 16  ;;  %v4938_v32 = vshll.u32 %v4912_v19, 16  ;;  %v326_v39 = vld [vmem:[%s4879_s17 + $0x48] sm:$0xf] }
  0x1a   : > { %v388_v23 = vor.u32 %v387_v13, %v383_v6  ;;  %v1050_v28 = vor.u32 %v4900_v15, %v4920_v22  ;;  %v396_v35 = vor.u32 %v394_v12, %v392_v14  ;;  %v400_v36 = vrot.slane %v4924_v25, 1  ;;  %v327_v6 = vld [vmem:[%s4879_s17 + $0x4c] sm:$0xf]  ;;  %s3626_s14 = sshll.u32 %s298_s13, 2 }
  0x1b   : > { %v428_v30 = vor.u32 %v4915_v20, %v424_v24  ;;  %v436_v40 = vor.u32 %v4935_v31, %v432_v26  ;;  %v440_v41 = vrot.slane %v4938_v32, 1  ;;  %v4965_v44 = vshrl.u32 %v4909_v18, 16  ;;  %s6106_s18 = scalar_lea.vmem %s6202_s7, %s3626_s14 }
  0x1c   : > { %v393_v29 = vsel %vm381_vm2, %v388_v23, %v392_v14  ;;  %v401_v43 = vsel %vm381_vm2, %v396_v35, %v400_v36  ;;  %v4968_v45 = vshll.u32 %v4947_v37, 16  ;;  %v3637_v46 = vcombine.low %v326_v39, %v326_v39 }
  0x1d   : > { %4064 = vmatmul.mubr.msk.bf16.vlgmr.msra.gmra.mrb[0].mxu0 %vm462_vm3, %v393_v29  ;;  %v433_v34 = vsel %vm381_vm2, %v428_v30, %v432_v26  ;;  %v441_v47 = vsel %vm381_vm2, %v436_v40, %v440_v41  ;;  %v4972_v48 = vshrl.u32 %v4912_v19, 16  ;;  %v4975_v49 = vshll.u32 %v4951_v38, 16 }
  0x1e   : > { %4138 = vmatpush3.bf16.msra.mxu0 %v774_v27  ;;  %4067 = vmatprep.mubr.msk.bf16.mxu0 %vm4784_vm1, %v4783_v1  ;;  %v404_v50 = vor.u32 %v4965_v44, %v400_v36  ;;  %v408_v51 = vrot.slane %v4968_v45, 1  ;;  %v4983_v52 = vshll.u32 %v4960_v42, 16  ;;  %v454_v53 = vshll.u32 %v3637_v46, 16 }
  0x1f   : > { %4084 = vmatmul.mubr.msk.bf16.vlgmr.msra.gmra.mrb[0].mxu1 %vm462_vm3, %v433_v34  ;;  %4213 = vmatprep.subr.bf16.mxu0 %v4783_v1  ;;  %v4987_v54 = vrot.slane %v4951_v38, 1  ;;  %v744_v55 = vrot.slane %v3637_v46, 1  ;;  %v444_v56 = vor.u32 %v4972_v48, %v440_v41  ;;  %v448_v57 = vrot.slane %v4975_v49, 1 }
  0x20   : > { %4100 = vmatpush3.bf16.msra.mxu1 %v618_v33  ;;  %4087 = vmatprep.mubr.msk.bf16.mxu1 %vm4784_vm1, %v4783_v1  ;;  %v409_v59 = vsel %vm381_vm2, %v404_v50, %v408_v51  ;;  %v4999_v60 = vshrl.u32 %v4947_v37, 16  ;;  %v416_v61 = vrot.slane %v4983_v52, 1  ;;  %v5003_v62 = vshrl.u32 %v4951_v38, 16 }
  0x21   : > { %4175 = vmatprep.subr.bf16.mxu1 %v4783_v1  ;;  %v4995_v58 = vsel %vm726_vm4, %v4987_v54, %v744_v55  ;;  %v456_v63 = vrot.slane %v454_v53, 1  ;;  %v449_v0 = vsel %vm381_vm2, %v444_v56, %v448_v57  ;;  %v5020_v10 = vshrl.u32 %v4960_v42, 16 }
  0x22   : > { %v412_v3 = vor.u32 %v4999_v60, %v408_v51  ;;  %v452_v7 = vor.u32 %v5003_v62, %v448_v57  ;;  %v913_v12 = vrot.slane %v4509_v2, 2  ;;  %v5023_v14 = vcombine.low %v326_v39, %v327_v6  ;;  %v4510_v57 = vld [vmem:[%s6196_s1 + $0x8] ss:$0 sps:$4 sm:$0xcc]   ;;  %v1428_v2 = vld [vmem:[%s6196_s1 + $0xc] sm:$0x3] }
  0x23   : > { %v420_v17 = vor.u32 %v5020_v10, %v416_v61  ;;  %v727_v29 = vrot.slane %v4882_v4, 1  ;;  %v728_v30 = vrot.slane %v4885_v5, 1  ;;  %v732_v39 = vrot.slane %v4947_v37, 1 }
  0x24   : > { %v417_v8 = vsel %vm381_vm2, %v412_v3, %v416_v61  ;;  %v457_v13 = vsel %vm381_vm2, %v452_v7, %v456_v63  ;;  %v921_v23 = vsel %vm490_vm0, %v913_v12, 0  ;;  %v906_v26 = vrot.slane %v5023_v14, 1 }
  0x25   : > { %4068 = vmatmul.mubr.msk.bf16.gmra.mrb[4].mxu0 %vm462_vm3, %v401_v43  ;;  %v425_v27 = vsel %vm381_vm2, %v420_v17, %v424_v24  ;;  %v1046_v24 = vld [vmem:[%s6196_s1 + $0x8] sm:$0x3]  ;;  %v729_v34 = vsel %vm726_vm4, %v727_v29, %v728_v30  ;;  %v734_v41 = vrot.slane %v4960_v42, 1  ;;  %v736_v46 = vrot.slane %v4891_v9, 1 }
  0x26   : > { %4071 = vmatprep.mubr.msk.bf16.mxu0 %vm4784_vm1, %v4783_v1  ;;  %v5043_v33 = vsel %vm726_vm4, %v4987_v54, %v906_v26  ;;  %v1125_v35 = vsel %vm490_vm0, %v1046_v24, 0  ;;  %v738_v50 = vrot.slane %v4897_v11, 1  ;;  %v740_v53 = vrot.slane %v4912_v19, 1 }
  0x27   : > { %4088 = vmatmul.mubr.msk.bf16.gmra.mrb[4].mxu1 %vm462_vm3, %v441_v47  ;;  %v735_v43 = vsel %vm726_vm4, %v732_v39, %v734_v41  ;;  %v737_v47 = vsel %vm726_vm4, %v734_v41, %v736_v46  ;;  %v1052_v61 = vrot.slane %v4924_v25, 2  ;;  %v1055_v3 = vrot.slane %v4999_v60, 1 }
  0x28   : > { %4091 = vmatprep.mubr.msk.bf16.mxu1 %vm4784_vm1, %v4783_v1  ;;  %v5104_v51 = vsel %vm726_vm4, %v736_v46, %v738_v50  ;;  %v5116_v55 = vsel %vm726_vm4, %v738_v50, %v740_v53  ;;  %v5128_v56 = vsel %vm726_vm4, %v740_v53, %v4987_v54  ;;  %v1051_v54 = vrot.slane %v4965_v44, 1 }
  0x29   : > { %v1056_v6 = vrot.slane %v4968_v45, 2  ;;  %v1446_v7 = vsel %vm490_vm0, %v1428_v2, 0  ;;  %v1059_v22 = vrot.slane %v5020_v10, 1  ;;  %v1063_v17 = vrot.slane %v4915_v20, 1 }
  0x2a   : > { %v1068_v24 = vrot.slane %v4918_v21, 2  ;;  %v1075_v41 = vrot.slane %v5003_v62, 1  ;;  %v1083_v50 = vshll.u32 %v5023_v14, 16 }
  0x2d   : > { %4072 = vmatmul.mubr.msk.bf16.gmra.mrb[8].mxu0 %vm462_vm3, %v409_v59  ;;  %v1274_v59 = vrot.slane %v4510_v57, 2  ;;  %v1085_v57 = vrot.slane %v1083_v50, 2 }
  0x2e   : > { %4075 = vmatprep.mubr.msk.bf16.mxu0 %vm4784_vm1, %v4783_v1 }
  0x2f   : > { %4092 = vmatmul.mubr.msk.bf16.gmra.mrb[8].mxu1 %vm462_vm3, %v449_v0  ;;  %v1303_v63 = vsel %vm490_vm0, %v1274_v59, 0  ;;  %v1053_v0 = vor.u32 %v1052_v61, %v1051_v54 }
  0x30   : > { %4095 = vmatprep.mubr.msk.bf16.mxu1 %vm4784_vm1, %v4783_v1 }
  0x35   : > { %4076 = vmatmul.mubr.msk.bf16.gmra.mrb[12].mxu0 %vm462_vm3, %v417_v8  ;;  %v1057_v8 = vor.u32 %v1056_v6, %v1055_v3  ;;  %v4512_v6 = vld [vmem:[%s6196_s1 + $0xc] ss:$0 sps:$4 sm:$0xcc]  }
  0x36   : > { %4079 = vmatprep.mubr.msk.bf16.mxu0 %vm4784_vm1, %v4783_v1 }
  0x37   : > { %4096 = vmatmul.mubr.msk.bf16.gmra.mrb[12].mxu1 %vm462_vm3, %v457_v13  ;;  %v1058_v15 = vsel %vm1047_vm5, %v1053_v0, %v1057_v8 }
  0x38   : > { %4101 = vmatprep.mubr.msk.bf16.mxu1 %vm4784_vm1, %v4783_v1 }
  0x3d   : > { %4080 = vmatmul.mubr.msk.bf16.gmra.mrb[16].mxu0 %vm462_vm3, %v425_v27 }
  0x3e   : > { %4139 = vmatprep.mubr.msk.bf16.mxu0 %vm4784_vm1, %v4783_v1 }
  0x3f   : > { %4102 = vmatmul.mubr.msk.bf16.vlgmr.msra.gmra.mrb[16].mxu1 %vm462_vm3, %v4882_v4  ;;  %v730_v4 = vrot.slane %v4909_v18, 1 }
  0x40   : > { %4176 = vmatpush3.bf16.msra.mxu1 %v921_v23  ;;  %4105 = vmatprep.mubr.msk.bf16.mxu1 %vm4784_vm1, %v4783_v1  ;;  %v1064_v23 = vrot.slane %v4903_v16, 2 }
  0x41   : > { %4251 = vmatprep.subr.bf16.mxu1 %v4783_v1  ;;  %v731_v36 = vsel %vm726_vm4, %v728_v30, %v730_v4  ;;  %v733_v40 = vsel %vm726_vm4, %v730_v4, %v732_v39  ;;  %v1067_v30 = vrot.slane %v4935_v31, 1  ;;  %v1071_v4 = vrot.slane %v4972_v48, 1 }
  0x42   : > { %v1065_v27 = vor.u32 %v1064_v23, %v1063_v17  ;;  %v1257_v23 = vrot.slane %v4960_v42, 2 }
  0x45   : > { %4140 = vmatmul.mubr.msk.bf16.vlgmr.msra.gmra.mrb[20].mxu0 %vm462_vm3, %v729_v34  ;;  %v1069_v34 = vor.u32 %v1068_v24, %v1067_v30  ;;  %v1261_v24 = vrot.slane %v4897_v11, 2 }
  0x46   : > { %4214 = vmatpush3.bf16.msra.mxu0 %v1125_v35  ;;  %4143 = vmatprep.mubr.msk.bf16.mxu0 %vm4784_vm1, %v4783_v1 }
  0x47   : > { %4106 = vmatmul.mubr.msk.bf16.gmra.mrb[20].mxu1 %vm462_vm3, %v4885_v5  ;;  %4289 = vmatprep.subr.bf16.mxu0 %v4783_v1  ;;  %v1070_v35 = vsel %vm1047_vm5, %v1065_v27, %v1069_v34 }
  0x48   : > { %4109 = vmatprep.mubr.msk.bf16.mxu1 %vm4784_vm1, %v4783_v1 }
  0x4d   : > { %4144 = vmatmul.mubr.msk.bf16.gmra.mrb[24].mxu0 %vm462_vm3, %v731_v36 }
  0x4e   : > { %4147 = vmatprep.mubr.msk.bf16.mxu0 %vm4784_vm1, %v4783_v1 }
  0x4f   : > { %4110 = vmatmul.mubr.msk.bf16.gmra.mrb[24].mxu1 %vm462_vm3, %v4909_v18 }
  0x50   : > { %4113 = vmatprep.mubr.msk.bf16.mxu1 %vm4784_vm1, %v4783_v1 }
  0x55   : > { %4148 = vmatmul.mubr.msk.bf16.gmra.mrb[28].mxu0 %vm462_vm3, %v733_v40 }
  0x56   : > { %4151 = vmatprep.mubr.msk.bf16.mxu0 %vm4784_vm1, %v4783_v1 }
  0x57   : > { %4114 = vmatmul.mubr.msk.bf16.gmra.mrb[28].mxu1 %vm462_vm3, %v4947_v37 }
  0x58   : > { %4117 = vmatprep.mubr.msk.bf16.mxu1 %vm4784_vm1, %v4783_v1 }
  0x5d   : > { %4152 = vmatmul.mubr.msk.bf16.gmra.mrb[32].mxu0 %vm462_vm3, %v735_v43 }
  0x5e   : > { %4155 = vmatprep.mubr.msk.bf16.mxu0 %vm4784_vm1, %v4783_v1 }
  0x5f   : > { %4118 = vmatmul.mubr.msk.bf16.gmra.mrb[32].mxu1 %vm462_vm3, %v4960_v42 }
  0x60   : > { %4121 = vmatprep.mubr.msk.bf16.mxu1 %vm4784_vm1, %v4783_v1 }
  0x65   : > { %4156 = vmatmul.mubr.msk.bf16.gmra.mrb[36].mxu0 %vm462_vm3, %v737_v47 }
  0x66   : > { %4159 = vmatprep.mubr.msk.bf16.mxu0 %vm4784_vm1, %v4783_v1 }
  0x67   : > { %4122 = vmatmul.mubr.msk.bf16.gmra.mrb[36].mxu1 %vm462_vm3, %v4891_v9 }
  0x68   : > { %4125 = vmatprep.mubr.msk.bf16.mxu1 %vm4784_vm1, %v4783_v1 }
  0x6d   : > { %4160 = vmatmul.mubr.msk.bf16.gmra.mrb[40].mxu0 %vm462_vm3, %v5104_v51 }
  0x6e   : > { %4163 = vmatprep.mubr.msk.bf16.mxu0 %vm4784_vm1, %v4783_v1 }
  0x6f   : > { %4126 = vmatmul.mubr.msk.bf16.gmra.mrb[40].mxu1 %vm462_vm3, %v4897_v11 }
  0x70   : > { %4129 = vmatprep.mubr.msk.bf16.mxu1 %vm4784_vm1, %v4783_v1 }
  0x75   : > { %4164 = vmatmul.mubr.msk.bf16.gmra.mrb[44].mxu0 %vm462_vm3, %v5116_v55 }
  0x76   : > { %4167 = vmatprep.mubr.msk.bf16.mxu0 %vm4784_vm1, %v4783_v1 }
  0x77   : > { %4130 = vmatmul.mubr.msk.bf16.gmra.mrb[44].mxu1 %vm462_vm3, %v4912_v19 }
  0x78   : > { %4133 = vmatprep.mubr.msk.bf16.mxu1 %vm4784_vm1, %v4783_v1 }
  0x7d   : > { %4168 = vmatmul.mubr.msk.bf16.gmra.mrb[48].mxu0 %vm462_vm3, %v5128_v56 }
  0x7e   : > { %4171 = vmatprep.mubr.msk.bf16.mxu0 %vm4784_vm1, %v4783_v1 }
  0x7f   : > { %4134 = vmatmul.mubr.msk.bf16.gmra.mrb[48].mxu1 %vm462_vm3, %v4951_v38 }
  0x80   : > { %4177 = vmatprep.mubr.msk.bf16.mxu1 %vm4784_vm1, %v4783_v1 }
  0x85   : > { %4172 = vmatmul.mubr.msk.bf16.gmra.mrb[52].mxu0 %vm462_vm3, %v4995_v58  ;;  %v1054_v58 = vsel %vm1047_vm5, %v1050_v28, %v1053_v0  ;;  %v1060_v28 = vrot.slane %v4983_v52, 2 }
  0x86   : > { %4215 = vmatprep.mubr.msk.bf16.mxu0 %vm4784_vm1, %v4783_v1 }
  0x87   : > { %4178 = vmatmul.mubr.msk.bf16.vlgmr.msra.gmra.mrb[52].mxu1 %vm462_vm3, %v731_v36  ;;  %v1061_v12 = vor.u32 %v1060_v28, %v1059_v22  ;;  %v1072_v36 = vrot.slane %v4938_v32, 2 }
  0x88   : > { %4252 = vmatpush3.bf16.msra.mxu1 %v1303_v63  ;;  %4181 = vmatprep.mubr.msk.bf16.mxu1 %vm4784_vm1, %v4783_v1 }
  0x89   : > { %4327 = vmatprep.subr.bf16.mxu1 %v4783_v1  ;;  %v1062_v13 = vsel %vm1047_vm5, %v1057_v8, %v1061_v12  ;;  %v1066_v29 = vsel %vm1047_vm5, %v1061_v12, %v1065_v27  ;;  %v1073_v39 = vor.u32 %v1072_v36, %v1071_v4  ;;  %v1253_v8 = vrot.slane %v4909_v18, 2 }
  0x8a   : > { %v1255_v12 = vrot.slane %v4947_v37, 2 }
  0x8c   : > { %v1258_v27 = vsel %vm1251_vm6, %v1255_v12, %v1257_v23 }
  0x8d   : > { %4216 = vmatmul.mubr.msk.bf16.vlgmr.msra.gmra.mrb[56].mxu0 %vm462_vm3, %v1054_v58 }
  0x8e   : > { %4290 = vmatpush3.bf16.msra.mxu0 %v1446_v7  ;;  %4219 = vmatprep.mubr.msk.bf16.mxu0 %vm4784_vm1, %v4783_v1  ;;  %v1252_v7 = vrot.slane %v4885_v5, 2  ;;  %v1779_v5 = vld [vmem:[%s6196_s1 + $0x10] sm:$0x3] }
  0x8f   : > { %4182 = vmatmul.mubr.msk.bf16.gmra.mrb[56].mxu1 %vm462_vm3, %v733_v40  ;;  %4365 = vmatprep.subr.bf16.mxu0 %v4783_v1  ;;  %v1074_v40 = vsel %vm1047_vm5, %v1069_v34, %v1073_v39  ;;  %v1828_v17 = vsel %vm490_vm0, %v1779_v5, 0  ;;  %v1263_v34 = vrot.slane %v4912_v19, 2 }
  0x90   : > { %4185 = vmatprep.mubr.msk.bf16.mxu1 %vm4784_vm1, %v4783_v1  ;;  %v1254_v22 = vsel %vm1251_vm6, %v1252_v7, %v1253_v8 }
  0x95   : > { %4220 = vmatmul.mubr.msk.bf16.gmra.mrb[60].mxu0 %vm462_vm3, %v1058_v15 }
  0x96   : > { %4223 = vmatprep.mubr.msk.bf16.mxu0 %vm4784_vm1, %v4783_v1 }
  0x97   : > { %4186 = vmatmul.mubr.msk.bf16.gmra.mrb[60].mxu1 %vm462_vm3, %v735_v43  ;;  %v1076_v43 = vrot.slane %v4975_v49, 2 }
  0x98   : > { %4189 = vmatprep.mubr.msk.bf16.mxu1 %vm4784_vm1, %v4783_v1 }
  0x99   : > { %v1077_v46 = vor.u32 %v1076_v43, %v1075_v41 }
  0x9b   : > { %v1078_v53 = vsel %vm1047_vm5, %v1073_v39, %v1077_v46  ;;  %v1264_v39 = vsel %vm1251_vm6, %v1261_v24, %v1263_v34 }
  0x9d   : > { %4224 = vmatmul.mubr.msk.bf16.gmra.mrb[64].mxu0 %vm462_vm3, %v1062_v13  ;;  %v1256_v13 = vsel %vm1251_vm6, %v1253_v8, %v1255_v12 }
  0x9e   : > { %4227 = vmatprep.mubr.msk.bf16.mxu0 %vm4784_vm1, %v4783_v1 }
  0x9f   : > { %4190 = vmatmul.mubr.msk.bf16.gmra.mrb[64].mxu1 %vm462_vm3, %v737_v47  ;;  %v1080_v47 = vshrl.u32 %v5023_v14, 16 }
  0xa0   : > { %4193 = vmatprep.mubr.msk.bf16.mxu1 %vm4784_vm1, %v4783_v1 }
  0xa5   : > { %4228 = vmatmul.mubr.msk.bf16.gmra.mrb[68].mxu0 %vm462_vm3, %v1066_v29  ;;  %v1259_v29 = vrot.slane %v4891_v9, 2 }
  0xa6   : > { %4231 = vmatprep.mubr.msk.bf16.mxu0 %vm4784_vm1, %v4783_v1 }
  0xa7   : > { %4194 = vmatmul.mubr.msk.bf16.gmra.mrb[68].mxu1 %vm462_vm3, %v5104_v51  ;;  %v5220_v51 = vld [vmem:[%s4879_s17 + $0x50] sm:$0xf]  ;;  %v1260_v30 = vsel %vm1251_vm6, %v1257_v23, %v1259_v29  ;;  %v1262_v9 = vsel %vm1251_vm6, %v1259_v29, %v1261_v24 }
  0xa8   : > { %4197 = vmatprep.mubr.msk.bf16.mxu1 %vm4784_vm1, %v4783_v1  ;;  %v5229_v59 = vcombine.low %v5220_v51, %v5220_v51 }
  0xaa   : > { %v1089_v54 = vshrl.u32 %v5229_v59, 16  ;;  %v1092_v61 = vshll.u32 %v5229_v59, 16  ;;  %v908_v63 = vrot.slane %v5229_v59, 1 }
  0xac   : > { %v1091_v2 = vrot.slane %v1089_v54, 1  ;;  %v1094_v58 = vrot.slane %v1092_v61, 2  ;;  %v909_v3 = vsel %vm726_vm4, %v906_v26, %v908_v63  ;;  %v1625_v26 = vrot.slane %v4512_v6, 2 }
  0xad   : > { %4232 = vmatmul.mubr.msk.bf16.gmra.mrb[72].mxu0 %vm462_vm3, %v1070_v35 }
  0xae   : > { %4235 = vmatprep.mubr.msk.bf16.mxu0 %vm4784_vm1, %v4783_v1  ;;  %v1654_v28 = vsel %vm490_vm0, %v1625_v26, 0 }
  0xaf   : > { %4198 = vmatmul.mubr.msk.bf16.gmra.mrb[72].mxu1 %vm462_vm3, %v5116_v55  ;;  %v1082_v55 = vrot.slane %v1080_v47, 1 }
  0xb0   : > { %4201 = vmatprep.mubr.msk.bf16.mxu1 %vm4784_vm1, %v4783_v1 }
  0xb5   : > { %4236 = vmatmul.mubr.msk.bf16.gmra.mrb[76].mxu0 %vm462_vm3, %v1074_v40 }
  0xb6   : > { %4239 = vmatprep.mubr.msk.bf16.mxu0 %vm4784_vm1, %v4783_v1 }
  0xb7   : > { %4202 = vmatmul.mubr.msk.bf16.gmra.mrb[76].mxu1 %vm462_vm3, %v5128_v56  ;;  %v1086_v56 = vor.u32 %v1085_v57, %v1082_v55 }
  0xb8   : > { %4205 = vmatprep.mubr.msk.bf16.mxu1 %vm4784_vm1, %v4783_v1 }
  0xb9   : > { %v1087_v0 = vsel %vm1047_vm5, %v1077_v46, %v1086_v56  ;;  %v1265_v46 = vrot.slane %v4951_v38, 2 }
  0xbb   : > { %v1266_v54 = vsel %vm1251_vm6, %v1263_v34, %v1265_v46 }
  0xbd   : > { %4240 = vmatmul.mubr.msk.bf16.gmra.mrb[80].mxu0 %vm462_vm3, %v1078_v53 }
  0xbe   : > { %4243 = vmatprep.mubr.msk.bf16.mxu0 %vm4784_vm1, %v4783_v1 }
  0xbf   : > { %4206 = vmatmul.mubr.msk.bf16.gmra.mrb[80].mxu1 %vm462_vm3, %v5043_v33  ;;  %v1095_v33 = vor.u32 %v1094_v58, %v1091_v2  ;;  %v1267_v2 = vrot.slane %v5023_v14, 2  ;;  %v329_v58 = vld [vmem:[%s4879_s17 + $0x54] sm:$0xf] }
  0xc0   : > { %4209 = vmatprep.mubr.msk.bf16.mxu1 %vm4784_vm1, %v4783_v1  ;;  %v5343_v26 = vcombine.low %v5220_v51, %v329_v58 }
  0xc1   : > { %v1096_v15 = vsel %vm1047_vm5, %v1086_v56, %v1095_v33  ;;  %v1268_v8 = vsel %vm1251_vm6, %v1265_v46, %v1267_v2 }
  0xc2   : > { %v1435_v5 = vrot.slane %v5343_v26, 2 }
  0xc4   : > { %v1436_v29 = vsel %vm1251_vm6, %v1267_v2, %v1435_v5 }
  0xc5   : > { %4244 = vmatmul.mubr.msk.bf16.gmra.mrb[84].mxu0 %vm462_vm3, %v1087_v0 }
  0xc6   : > { %4247 = vmatprep.mubr.msk.bf16.mxu0 %vm4784_vm1, %v4783_v1 }
  0xc7   : > { %4210 = vmatmul.mubr.msk.bf16.gmra.mrb[84].mxu1 %vm462_vm3, %v909_v3 }
  0xc8   : > { %4253 = vmatprep.mubr.msk.bf16.mxu1 %vm4784_vm1, %v4783_v1 }
  0xcd   : > { %4248 = vmatmul.mubr.msk.bf16.gmra.mrb[88].mxu0 %vm462_vm3, %v1096_v15 }
  0xce   : > { %4291 = vmatprep.mubr.msk.bf16.mxu0 %vm4784_vm1, %v4783_v1 }
  0xcf   : > { %4254 = vmatmul.mubr.msk.bf16.vlgmr.msra.gmra.mrb[88].mxu1 %vm462_vm3, %v1254_v22 }
  0xd0   : > { %4328 = vmatpush3.bf16.msra.mxu1 %v1654_v28  ;;  %4257 = vmatprep.mubr.msk.bf16.mxu1 %vm4784_vm1, %v4783_v1 }
  0xd5   : > { %4292 = vmatmul.mubr.msk.bf16.vlgmr.msra.gmra.mrb[92].mxu0 %vm462_vm3, %v1256_v13 }
  0xd6   : > { %4366 = vmatpush3.bf16.msra.mxu0 %v1828_v17  ;;  %4295 = vmatprep.mubr.msk.bf16.mxu0 %vm4784_vm1, %v4783_v1 }
  0xd7   : > { %4258 = vmatmul.mubr.msk.bf16.gmra.mrb[92].mxu1 %vm462_vm3, %v1256_v13  ;;  %v1269_v13 = vrot.slane %v5229_v59, 2  ;;  %v1573_v59 = vrot.slane %v4965_v44, 2 }
  0xd8   : > { %4261 = vmatprep.mubr.msk.bf16.mxu1 %vm4784_vm1, %v4783_v1 }
  0xd9   : > { %v1270_v34 = vsel %vm1251_vm6, %v1267_v2, %v1269_v13 }
  0xdd   : > { %4296 = vmatmul.mubr.msk.bf16.gmra.mrb[96].mxu0 %vm462_vm3, %v1258_v27 }
  0xde   : > { %4299 = vmatprep.mubr.msk.bf16.mxu0 %vm4784_vm1, %v4783_v1 }
  0xdf   : > { %4262 = vmatmul.mubr.msk.bf16.gmra.mrb[96].mxu1 %vm462_vm3, %v1258_v27 }
  0xe0   : > { %4265 = vmatprep.mubr.msk.bf16.mxu1 %vm4784_vm1, %v4783_v1 }
  0xe5   : > { %4300 = vmatmul.mubr.msk.bf16.gmra.mrb[100].mxu0 %vm462_vm3, %v1260_v30 }
  0xe6   : > { %4303 = vmatprep.mubr.msk.bf16.mxu0 %vm4784_vm1, %v4783_v1 }
  0xe7   : > { %4266 = vmatmul.mubr.msk.bf16.gmra.mrb[100].mxu1 %vm462_vm3, %v1260_v30  ;;  %v5363_v30 = vld [vmem:[%s4879_s17 + $0x58] ss:$0 sps:$4 sm:$0x77]  }
  0xe8   : > { %4269 = vmatprep.mubr.msk.bf16.mxu1 %vm4784_vm1, %v4783_v1  ;;  %v1437_v46 = vrot.slane %v5363_v30, 2 }
  0xed   : > { %4304 = vmatmul.mubr.msk.bf16.gmra.mrb[104].mxu0 %vm462_vm3, %v1262_v9 }
  0xee   : > { %4307 = vmatprep.mubr.msk.bf16.mxu0 %vm4784_vm1, %v4783_v1 }
  0xef   : > { %4270 = vmatmul.mubr.msk.bf16.gmra.mrb[104].mxu1 %vm462_vm3, %v1262_v9 }
  0xf0   : > { %v5300_v35 = vpop.f32.mrb[0].mxu0  ;;  %4273 = vmatprep.mubr.msk.bf16.mxu1 %vm4784_vm1, %v4783_v1 }
  0xf1   : > { %v4065_v11 = vpop.f32.mrb[1].mxu0 }
  0xf2   : > { %v5304_v4 = vpop.f32.mrb[2].mxu0  ;;  %v5306_v36 = vpop.f32.mrb[0].mxu1 }
  0xf3   : > { %v4066_v40 = vpop.f32.mrb[3].mxu0  ;;  %v4085_v41 = vpop.f32.mrb[1].mxu1 }
  0xf4   : > { %v5309_v43 = vpop.f32.mrb[2].mxu1  ;;  %v1576_v40 = vrot.slane %v4999_v60, 2  ;;  %v1577_v41 = vrot.slane %v4968_v45, 3 }
  0xf5   : > { %4308 = vmatmul.mubr.msk.bf16.gmra.mrb[108].mxu0 %vm462_vm3, %v1264_v39  ;;  %v4086_v19 = vpop.f32.mrb[3].mxu1 }
  0xf6   : > { %4311 = vmatprep.mubr.msk.bf16.mxu0 %vm4784_vm1, %v4783_v1  ;;  %v1578_v44 = vor.u32 %v1577_v41, %v1576_v40  ;;  %v1584_v40 = vrot.slane %v4915_v20, 2  ;;  %v1585_v41 = vrot.slane %v4903_v16, 3 }
  0xf7   : > { %4274 = vmatmul.mubr.msk.bf16.gmra.mrb[108].mxu1 %vm462_vm3, %v1264_v39  ;;  %v1574_v39 = vrot.slane %v4924_v25, 3 }
  0xf8   : > { %v5316_v53 = vpop.f32.mrb[4].mxu0  ;;  %4277 = vmatprep.mubr.msk.bf16.mxu1 %vm4784_vm1, %v4783_v1 }
  0xf9   : > { %v4069_v55 = vpop.f32.mrb[5].mxu0  ;;  %v1575_v25 = vor.u32 %v1574_v39, %v1573_v59 }
  0xfa   : > { %v5320_v57 = vpop.f32.mrb[6].mxu0  ;;  %v5322_v56 = vpop.f32.mrb[4].mxu1 }
  0xfb   : > { %v4070_v61 = vpop.f32.mrb[7].mxu0  ;;  %v4089_v63 = vpop.f32.mrb[5].mxu1 }
  0xfc   : > { %v5325_v0 = vpop.f32.mrb[6].mxu1  ;;  %v1438_v61 = vsel %vm1251_vm6, %v1435_v5, %v1437_v46  ;;  %v1781_v5 = vrot.slane %v4909_v18, 3 }
  0xfd   : > { %4312 = vmatmul.mubr.msk.bf16.gmra.mrb[112].mxu0 %vm462_vm3, %v1266_v54  ;;  %v4090_v38 = vpop.f32.mrb[7].mxu1 }
  0xfe   : > { %4315 = vmatprep.mubr.msk.bf16.mxu0 %vm4784_vm1, %v4783_v1 }
  0xff   : > { %4278 = vmatmul.mubr.msk.bf16.gmra.mrb[112].mxu1 %vm462_vm3, %v1266_v54 }
 0x100   : > { %v5333_v3 = vpop.f32.mrb[8].mxu0  ;;  %4281 = vmatprep.mubr.msk.bf16.mxu1 %vm4784_vm1, %v4783_v1 }
 0x101   : > { %v4073_v6 = vpop.f32.mrb[9].mxu0 }
 0x102   : > { %v5337_v33 = vpop.f32.mrb[10].mxu0  ;;  %v5339_v7 = vpop.f32.mrb[8].mxu1  ;;  %v1579_v6 = vsel %vm1572_vm7, %v1575_v25, %v1578_v44 }
 0x103   : > { %v4074_v15 = vpop.f32.mrb[11].mxu0  ;;  %v4093_v22 = vpop.f32.mrb[9].mxu1 }
 0x104   : > { %v5345_v28 = vpop.f32.mrb[10].mxu1  ;;  %v1581_v15 = vrot.slane %v4983_v52, 3 }
 0x105   : > { %4316 = vmatmul.mubr.msk.bf16.gmra.mrb[116].mxu0 %vm462_vm3, %v1268_v8  ;;  %v4094_v12 = vpop.f32.mrb[11].mxu1 }
 0x106   : > { %4319 = vmatprep.mubr.msk.bf16.mxu0 %vm4784_vm1, %v4783_v1 }
 0x107   : > { %4282 = vmatmul.mubr.msk.bf16.gmra.mrb[116].mxu1 %vm462_vm3, %v1268_v8  ;;  %v1580_v8 = vrot.slane %v5020_v10, 2 }
 0x108   : > { %v5353_v17 = vpop.f32.mrb[12].mxu0  ;;  %4285 = vmatprep.mubr.msk.bf16.mxu1 %vm4784_vm1, %v4783_v1 }
 0x109   : > { %v4077_v51 = vpop.f32.mrb[13].mxu0  ;;  %v1582_v52 = vor.u32 %v1581_v15, %v1580_v8  ;;  %v1589_v8 = vrot.slane %v4918_v21, 3 }
 0x10a   : > { %v5357_v23 = vpop.f32.mrb[14].mxu0  ;;  %v5359_v27 = vpop.f32.mrb[12].mxu1 }
 0x10b   : > { %v4078_v24 = vpop.f32.mrb[15].mxu0  ;;  %v4097_v9 = vpop.f32.mrb[13].mxu1  ;;  %v1583_v39 = vsel %vm1572_vm7, %v1578_v44, %v1582_v52  ;;  %v1586_v44 = vor.u32 %v1585_v41, %v1584_v40 }
 0x10c   : > { %v5366_v11 = vpop.f32.mrb[14].mxu1 }
 0x10d   : > { %4320 = vmatmul.mubr.msk.bf16.gmra.mrb[120].mxu0 %vm462_vm3, %v1436_v29  ;;  %v4098_v19 = vpop.f32.mrb[15].mxu1 }
 0x10e   : > { %4323 = vmatprep.mubr.msk.bf16.mxu0 %vm4784_vm1, %v4783_v1 }
 0x10f   : > { %4286 = vmatmul.mubr.msk.bf16.gmra.mrb[120].mxu1 %vm462_vm3, %v1270_v34 }
 0x110   : > { %v5377_v55 = vpop.f32.mrb[16].mxu0  ;;  %4329 = vmatprep.mubr.msk.bf16.mxu1 %vm4784_vm1, %v4783_v1 }
 0x111   : > { %v4081_v60 = vpop.f32.mrb[17].mxu0 }
 0x112   : > { %v654_v45 = vpop.f32.mrb[16].mxu1  ;;  %v5381_v54 = vpop.f32.mrb[18].mxu0 }
 0x113   : > { %v655_v63 = vadd.f32 %v654_v45, %v5300_v35  ;;  %v4103_v38 = vpop.f32.mrb[17].mxu1  ;;  %v4082_v2 = vpop.f32.mrb[19].mxu0  ;;  %v1782_v35 = vrot.slane %v4947_v37, 3 }
 0x114   : > { %v657_v58 = vpop.f32.mrb[18].mxu1 }
 0x115   : > { %v658_v22 = vadd.f32 %v657_v58, %v5304_v4  ;;  %4324 = vmatmul.mubr.msk.bf16.gmra.mrb[124].mxu0 %vm462_vm3, %v1438_v61  ;;  %v4104_v12 = vpop.f32.mrb[19].mxu1  ;;  %v1783_v24 = vsel %vm1780_vm8, %v1781_v5, %v1782_v35  ;;  %v1587_v58 = vsel %vm1572_vm7, %v1582_v52, %v1586_v44 }
 0x116   : > { %4367 = vmatprep.mubr.msk.bf16.mxu0 %vm4784_vm1, %v4783_v1 }
 0x117   : > { %4330 = vmatmul.mubr.msk.bf16.vlgmr.msra.gmra.mrb[124].mxu1 %vm462_vm3, %v1579_v6  ;;  %v1588_v6 = vrot.slane %v4935_v31, 2 }
 0x118   : > { %v810_v13 = vpop.f32.mrb[20].mxu0  ;;  %4333 = vmatprep.mubr.msk.bf16.mxu1 %vm4784_vm1, %v4783_v1 }
 0x119   : > { %v5397_v10 = vadd.f32 %v810_v13, %v655_v63  ;;  %v4141_v4 = vpop.f32.mrb[21].mxu0 }
 0x11a   : > { %v662_v51 = vpop.f32.mrb[20].mxu1  ;;  %v813_v29 = vpop.f32.mrb[22].mxu0 }
 0x11b   : > { %v663_v9 = vadd.f32 %v662_v51, %v5316_v53  ;;  %v4107_v18 = vpop.f32.mrb[21].mxu1  ;;  %v5401_v34 = vadd.f32 %v813_v29, %v658_v22  ;;  %v4142_v37 = vpop.f32.mrb[23].mxu0  ;;  %v1784_v53 = vrot.slane %v4960_v42, 3 }
 0x11c   : > { %v665_v59 = vpop.f32.mrb[22].mxu1  ;;  %v1592_v37 = vrot.slane %v4972_v48, 2 }
 0x11d   : > { %v666_v19 = vadd.f32 %v665_v59, %v5320_v57  ;;  %4368 = vmatmul.mubr.msk.bf16.vlgmr.msra.gmra.mrb[128].mxu0 %vm462_vm3, %v1783_v24  ;;  %v4108_v46 = vpop.f32.mrb[23].mxu1  ;;  %v1785_v45 = vsel %vm1780_vm8, %v1782_v35, %v1784_v53  ;;  %v1590_v35 = vor.u32 %v1589_v8, %v1588_v6  ;;  %v1593_v59 = vrot.slane %v4938_v32, 3  ;;  %v4517_v6 = vld [vmem:[%s6198_s3 + $0x4] ss:$16 sps:$4 sm:$0xff]   ;;  %v4741_v8 = vld [vmem:[%s4879_s17 + $0x38] sm:$0xff]  }
 0x11e   : > { %4371 = vmatprep.mubr.msk.bf16.mxu0 %vm4784_vm1, %v4783_v1  ;;  %2219 = vmatprep.subr.bf16.mxu1 %v4517_v6 }
 0x11f   : > { %4334 = vmatmul.mubr.msk.bf16.gmra.mrb[128].mxu1 %vm462_vm3, %v1583_v39  ;;  %v1591_v18 = vsel %vm1572_vm7, %v1586_v44, %v1590_v35  ;;  %v1594_v46 = vor.u32 %v1593_v59, %v1592_v37 }
 0x120   : > { %v818_v25 = vpop.f32.mrb[24].mxu0  ;;  %4337 = vmatprep.mubr.msk.bf16.mxu1 %vm4784_vm1, %v4783_v1 }
 0x121   : > { %v5414_v20 = vadd.f32 %v818_v25, %v663_v9  ;;  %v4145_v16 = vpop.f32.mrb[25].mxu0 }
 0x122   : > { %v670_v57 = vpop.f32.mrb[24].mxu1  ;;  %v821_v60 = vpop.f32.mrb[26].mxu0 }
 0x123   : > { %v671_v61 = vadd.f32 %v670_v57, %v5333_v3  ;;  %v4111_v63 = vpop.f32.mrb[25].mxu1  ;;  %v5418_v38 = vadd.f32 %v821_v60, %v666_v19  ;;  %v4146_v42 = vpop.f32.mrb[27].mxu0  ;;  %v4739_v3 = vld [vmem:[%s4879_s17 + $0x28] sm:$0xff]  }
 0x124   : > { %v673_v2 = vpop.f32.mrb[26].mxu1  ;;  %v1786_v12 = vrot.slane %v4739_v3, 3  ;;  %v1596_v63 = vrot.slane %v5003_v62, 2  ;;  %v1597_v42 = vrot.slane %v4975_v49, 3  ;;  %v1790_v62 = vrot.slane %v4741_v8, 3 }
 0x125   : > { %v674_v15 = vadd.f32 %v673_v2, %v5337_v33  ;;  %4372 = vmatmul.mubr.msk.bf16.gmra.mrb[132].mxu0 %vm462_vm3, %v1785_v45  ;;  %v4112_v22 = vpop.f32.mrb[27].mxu1  ;;  %v4518_v49 = vld [vmem:[%s6198_s3 + $0x8] ss:$16 sps:$4 sm:$0xff]   ;;  %v4527_v8 = vld [vmem:[%s6198_s3 + $0x40] ss:$16 sps:$4 sm:$0xff]  }
 0x126   : > { %4375 = vmatprep.mubr.msk.bf16.mxu0 %vm4784_vm1, %v4783_v1  ;;  %v1787_v52 = vsel %vm1780_vm8, %v1784_v53, %v1786_v12  ;;  %v1598_v22 = vor.u32 %v1597_v42, %v1596_v63 }
 0x127   : > { %4338 = vmatmul.mubr.msk.bf16.gmra.mrb[132].mxu1 %vm462_vm3, %v1587_v58 }
 0x128   : > { %v826_v5 = vpop.f32.mrb[28].mxu0  ;;  %4341 = vmatprep.mubr.msk.bf16.mxu1 %vm4784_vm1, %v4783_v1 }
 0x129   : > { %v5431_v31 = vadd.f32 %v826_v5, %v671_v61  ;;  %v4149_v21 = vpop.f32.mrb[29].mxu0  ;;  %v1595_v61 = vsel %vm1572_vm7, %v1590_v35, %v1594_v46 }
 0x12a   : > { %v678_v33 = vpop.f32.mrb[28].mxu1  ;;  %v829_v13 = vpop.f32.mrb[30].mxu0 }
 0x12b   : > { %v679_v4 = vadd.f32 %v678_v33, %v5353_v17  ;;  %v4115_v51 = vpop.f32.mrb[29].mxu1  ;;  %v5435_v29 = vadd.f32 %v829_v13, %v674_v15  ;;  %v4150_v24 = vpop.f32.mrb[31].mxu0  ;;  %v4740_v17 = vld [vmem:[%s4879_s17 + $0x30] sm:$0xff]  }
 0x12c   : > { %v681_v9 = vpop.f32.mrb[30].mxu1  ;;  %v1788_v41 = vrot.slane %v4740_v17, 3  ;;  %v1599_v24 = vsel %vm1572_vm7, %v1594_v46, %v1598_v22  ;;  %v1608_v46 = vshll.u32 %v5343_v26, 16 }
 0x12d   : > { %v682_v39 = vadd.f32 %v681_v9, %v5357_v23  ;;  %4376 = vmatmul.mubr.msk.bf16.gmra.mrb[136].mxu0 %vm462_vm3, %v1787_v52  ;;  %v4116_v40 = vpop.f32.mrb[31].mxu1  ;;  %v1600_v9 = vrot.slane %v1080_v47, 2  ;;  %v4742_v47 = vld [vmem:[%s4879_s17 + $0x40] sm:$0xff]  }
 0x12e   : > { %4379 = vmatprep.mubr.msk.bf16.mxu0 %vm4784_vm1, %v4783_v1  ;;  %v1789_v25 = vsel %vm1780_vm8, %v1786_v12, %v1788_v41  ;;  %v1791_v21 = vsel %vm1780_vm8, %v1788_v41, %v1790_v62  ;;  %v1792_v40 = vrot.slane %v4742_v47, 3  ;;  %v4533_v47 = vld [vmem:[%s6198_s3 + $0x60] ss:$16 sps:$4 sm:$0xff]  }
 0x12f   : > { %4342 = vmatmul.mubr.msk.bf16.gmra.mrb[136].mxu1 %vm462_vm3, %v1591_v18  ;;  %v1601_v18 = vrot.slane %v1083_v50, 3  ;;  %v4524_v50 = vld [vmem:[%s6198_s3 + $0x28] ss:$16 sps:$4 sm:$0xff]  }
 0x130   : > { %v834_v19 = vpop.f32.mrb[32].mxu0  ;;  %4345 = vmatprep.mubr.msk.bf16.mxu1 %vm4784_vm1, %v4783_v1 }
 0x131   : > { %v5448_v48 = vadd.f32 %v834_v19, %v679_v4  ;;  %v4153_v32 = vpop.f32.mrb[33].mxu0  ;;  %v1602_v41 = vor.u32 %v1601_v18, %v1600_v9  ;;  %v1605_v19 = vshrl.u32 %v5343_v26, 16 }
 0x132   : > { %v686_v53 = vpop.f32.mrb[32].mxu1  ;;  %v837_v23 = vpop.f32.mrb[34].mxu0 }
 0x133   : > { %v687_v44 = vadd.f32 %v686_v53, %v5377_v55  ;;  %v4119_v16 = vpop.f32.mrb[33].mxu1  ;;  %v5452_v57 = vadd.f32 %v837_v23, %v682_v39  ;;  %v4154_v60 = vpop.f32.mrb[35].mxu0  ;;  %v4515_v55 = vld [vmem:[%s6198_s3] ss:$16 sps:$4 sm:$0xff]   ;;  %v4523_v39 = vld [vmem:[%s6198_s3 + $0x24] ss:$16 sps:$4 sm:$0xff]   ;;  %v1603_v42 = vsel %vm1572_vm7, %v1598_v22, %v1602_v41 }
 0x134   : > { %v689_v45 = vpop.f32.mrb[34].mxu1  ;;  %2220 = vmatpush1.bf16.msra.mxu1 %v4515_v55  ;;  %v1614_v22 = vshrl.u32 %v5363_v30, 16 }
 0x135   : > { %v690_v2 = vadd.f32 %v689_v45, %v5381_v54  ;;  %4380 = vmatmul.mubr.msk.bf16.gmra.mrb[140].mxu0 %vm462_vm3, %v1789_v25  ;;  %v4120_v58 = vpop.f32.mrb[35].mxu1  ;;  %v4520_v54 = vld [vmem:[%s6198_s3 + $0xc] ss:$16 sps:$4 sm:$0xff]   ;;  %2221 = vmatprep.subr.bf16.mxu1 %v4523_v39 }
 0x136   : > { %4383 = vmatprep.mubr.msk.bf16.mxu0 %vm4784_vm1, %v4783_v1  ;;  %2342 = vmatprep.subr.bf16.mxu0 %v4520_v54  ;;  %v1610_v58 = vrot.slane %v1608_v46, 3 }
 0x137   : > { %4346 = vmatmul.mubr.msk.bf16.gmra.mrb[140].mxu1 %vm462_vm3, %v1595_v61  ;;  %2343 = vmatpush1.bf16.msra.mxu0 %v4518_v49  ;;  %v4532_v49 = vld [vmem:[%s6198_s3 + $0x4c] ss:$16 sps:$4 sm:$0xff]  }
 0x138   : > { %v842_v15 = vpop.f32.mrb[36].mxu0  ;;  %4349 = vmatprep.mubr.msk.bf16.mxu1 %vm4784_vm1, %v4783_v1 }
 0x139   : > { %v5477_v3 = vadd.f32 %v842_v15, %v687_v44  ;;  %v4157_v12 = vpop.f32.mrb[37].mxu0  ;;  %v1793_v44 = vsel %vm1780_vm8, %v1790_v62, %v1792_v40  ;;  %v1794_v62 = vrot.slane %v5023_v14, 3  ;;  %v1617_v14 = vshll.u32 %v5363_v30, 16 }
 0x13a   : > { %v694_v5 = vpop.f32.mrb[36].mxu1  ;;  %v845_v35 = vpop.f32.mrb[38].mxu0 }
 0x13b   : > { %v695_v33 = vadd.f32 %v694_v5, %v5306_v36  ;;  %v4123_v13 = vpop.f32.mrb[37].mxu1  ;;  %v5481_v52 = vadd.f32 %v845_v35, %v690_v2  ;;  %v4158_v4 = vpop.f32.mrb[39].mxu0  ;;  %v4521_v36 = vld [vmem:[%s6198_s3 + $0x20] ss:$16 sps:$4 sm:$0xff]   ;;  %v1607_v2 = vrot.slane %v1605_v19, 2 }
 0x13c   : > { %v697_v51 = vpop.f32.mrb[38].mxu1  ;;  %2222 = vmatpush1.bf16.msra.mxu1 %v4521_v36 }
 0x13d   : > { %v698_v37 = vadd.f32 %v697_v51, %v5309_v43  ;;  %4384 = vmatmul.mubr.msk.bf16.gmra.mrb[144].mxu0 %vm462_vm3, %v1791_v21  ;;  %v4124_v59 = vpop.f32.mrb[39].mxu1  ;;  %v4526_v43 = vld [vmem:[%s6198_s3 + $0x2c] ss:$16 sps:$4 sm:$0xff]   ;;  %v1611_v15 = vor.u32 %v1610_v58, %v1607_v2  ;;  %v4539_v2 = vld [vmem:[%s6198_s3 + $0x80] ss:$16 sps:$4 sm:$0xff]   ;;  %v1798_v58 = vrot.slane %v5363_v30, 3 }
 0x13e   : > { %4387 = vmatprep.mubr.msk.bf16.mxu0 %vm4784_vm1, %v4783_v1  ;;  %2344 = vmatprep.subr.bf16.mxu0 %v4526_v43  ;;  %v1619_v59 = vrot.slane %v1617_v14, 3  ;;  %v4542_v30 = vld [vmem:[%s6198_s3 + $0x88] ss:$16 sps:$4 sm:$0xff]  }
 0x13f   : > { %4350 = vmatmul.mubr.msk.bf16.gmra.mrb[144].mxu1 %vm462_vm3, %v1599_v24  ;;  %2345 = vmatpush1.bf16.msra.mxu0 %v4524_v50  ;;  %v1612_v18 = vsel %vm1572_vm7, %v1602_v41, %v1611_v15  ;;  %v4538_v50 = vld [vmem:[%s6198_s3 + $0x6c] ss:$16 sps:$4 sm:$0xff]  }
 0x140   : > { %v850_v17 = vpop.f32.mrb[40].mxu0  ;;  %4353 = vmatprep.mubr.msk.bf16.mxu1 %vm4784_vm1, %v4783_v1  ;;  %2346 = vmatprep.subr.bf16.mxu0 %v4532_v49 }
 0x141   : > { %v5510_v32 = vadd.f32 %v850_v17, %v695_v33  ;;  %v4161_v53 = vpop.f32.mrb[41].mxu0  ;;  %v1795_v33 = vsel %vm1780_vm8, %v1792_v40, %v1794_v62  ;;  %v1796_v40 = vrot.slane %v5343_v26, 3 }
 0x142   : > { %v702_v23 = vpop.f32.mrb[40].mxu1  ;;  %v853_v25 = vpop.f32.mrb[42].mxu0 }
 0x143   : > { %v703_v16 = vadd.f32 %v702_v23, %v5322_v56  ;;  %v4127_v60 = vpop.f32.mrb[41].mxu1  ;;  %v5514_v45 = vadd.f32 %v853_v25, %v698_v37  ;;  %v4162_v61 = vpop.f32.mrb[43].mxu0  ;;  %v4529_v56 = vld [vmem:[%s6198_s3 + $0x44] ss:$16 sps:$4 sm:$0xff]   ;;  %v1616_v37 = vrot.slane %v1614_v22, 2  ;;  %v1797_v53 = vsel %vm1780_vm8, %v1794_v62, %v1796_v40 }
 0x144   : > { %v705_v63 = vpop.f32.mrb[42].mxu1  ;;  %2223 = vmatprep.subr.bf16.mxu1 %v4529_v56  ;;  %v1799_v62 = vsel %vm1780_vm8, %v1796_v40, %v1798_v58 }
 0x145   : > { %v706_v55 = vadd.f32 %v705_v63, %v5325_v0  ;;  %4388 = vmatmul.mubr.msk.bf16.gmra.mrb[148].mxu0 %vm462_vm3, %v1793_v44  ;;  %v4128_v6 = vpop.f32.mrb[43].mxu1  ;;  %v4530_v0 = vld [vmem:[%s6198_s3 + $0x48] ss:$16 sps:$4 sm:$0xff]   ;;  %2224 = vmatpush1.bf16.msra.mxu1 %v4527_v8  ;;  %v1620_v17 = vor.u32 %v1619_v59, %v1616_v37 }
 0x146   : > { %4391 = vmatprep.mubr.msk.bf16.mxu0 %vm4784_vm1, %v4783_v1  ;;  %2347 = vmatpush1.bf16.msra.mxu0 %v4530_v0  ;;  %v4548_v59 = vld [vmem:[%s6198_s3 + $0xa8] ss:$16 sps:$4 sm:$0xff]  }
 0x147   : > { %4354 = vmatmul.mubr.msk.bf16.gmra.mrb[148].mxu1 %vm462_vm3, %v1603_v42  ;;  %2348 = vmatprep.subr.bf16.mxu0 %v4538_v50  ;;  %v1621_v61 = vsel %vm1572_vm7, %v1611_v15, %v1620_v17  ;;  %v4544_v15 = vld [vmem:[%s6198_s3 + $0x8c] ss:$16 sps:$4 sm:$0xff]  }
 0x148   : > { %v858_v54 = vpop.f32.mrb[44].mxu0  ;;  %4357 = vmatprep.mubr.msk.bf16.mxu1 %vm4784_vm1, %v4783_v1 }
 0x149   : > { %v5539_v12 = vadd.f32 %v858_v54, %v703_v16  ;;  %v4165_v5 = vpop.f32.mrb[45].mxu0 }
 0x14a   : > { %v710_v35 = vpop.f32.mrb[44].mxu1  ;;  %v861_v21 = vpop.f32.mrb[46].mxu0 }
 0x14b   : > { %v711_v13 = vadd.f32 %v710_v35, %v5339_v7  ;;  %v4131_v4 = vpop.f32.mrb[45].mxu1  ;;  %v5543_v51 = vadd.f32 %v861_v21, %v706_v55  ;;  %v4166_v24 = vpop.f32.mrb[47].mxu0  ;;  %v4535_v7 = vld [vmem:[%s6198_s3 + $0x64] ss:$16 sps:$4 sm:$0xff]  }
 0x14c   : > { %v713_v9 = vpop.f32.mrb[46].mxu1  ;;  %2225 = vmatprep.subr.bf16.mxu1 %v4535_v7  ;;  %v4547_v35 = vld [vmem:[%s6198_s3 + $0xa4] ss:$16 sps:$4 sm:$0xff]  }
 0x14d   : > { %v714_v36 = vadd.f32 %v713_v9, %v5345_v28  ;;  %4392 = vmatmul.mubr.msk.bf16.gmra.mrb[152].mxu0 %vm462_vm3, %v1795_v33  ;;  %v4132_v39 = vpop.f32.mrb[47].mxu1  ;;  %v4536_v28 = vld [vmem:[%s6198_s3 + $0x68] ss:$16 sps:$4 sm:$0xff]   ;;  %2226 = vmatpush1.bf16.msra.mxu1 %v4533_v47 }
 0x14e   : > { %4395 = vmatprep.mubr.msk.bf16.mxu0 %vm4784_vm1, %v4783_v1  ;;  %2349 = vmatpush1.bf16.msra.mxu0 %v4536_v28 }
 0x14f   : > { %4358 = vmatmul.mubr.msk.bf16.gmra.mrb[152].mxu1 %vm462_vm3, %v1612_v18  ;;  %2350 = vmatprep.subr.bf16.mxu0 %v4544_v15 }
 0x150   : > { %v866_v43 = vpop.f32.mrb[48].mxu0  ;;  %4361 = vmatprep.mubr.msk.bf16.mxu1 %vm4784_vm1, %v4783_v1 }
 0x151   : > { %v5566_v41 = vadd.f32 %v866_v43, %v711_v13  ;;  %v4169_v26 = vpop.f32.mrb[49].mxu0 }
 0x152   : > { %v718_v19 = vpop.f32.mrb[48].mxu1  ;;  %v869_v46 = vpop.f32.mrb[50].mxu0  ;;  %2351 = vmatpush1.bf16.msra.mxu0 %v4542_v30 }
 0x153   : > { %v719_v23 = vadd.f32 %v718_v19, %v5359_v27  ;;  %v4135_v25 = vpop.f32.mrb[49].mxu1  ;;  %v5570_v44 = vadd.f32 %v869_v46, %v714_v36  ;;  %v4170_v16 = vpop.f32.mrb[51].mxu0  ;;  %v4541_v27 = vld [vmem:[%s6198_s3 + $0x84] ss:$16 sps:$4 sm:$0xff]   ;;  %v4550_v36 = vld [vmem:[%s6198_s3 + $0xac] ss:$16 sps:$4 sm:$0xff]  }
 0x154   : > { %v721_v60 = vpop.f32.mrb[50].mxu1  ;;  %2227 = vmatprep.subr.bf16.mxu1 %v4541_v27  ;;  %2352 = vmatprep.subr.bf16.mxu0 %v4550_v36 }
 0x155   : > { %v722_v63 = vadd.f32 %v721_v60, %v5366_v11  ;;  %4396 = vmatmul.mubr.msk.bf16.gmra.mrb[156].mxu0 %vm462_vm3, %v1797_v53  ;;  %v4136_v42 = vpop.f32.mrb[51].mxu1  ;;  %2228 = vmatpush1.bf16.msra.mxu1 %v4539_v2  ;;  %v4551_v53 = vld [vmem:[%s6198_s3 + $0xc0] ss:$16 sps:$4 sm:$0xff]   ;;  %v4556_v60 = vld [vmem:[%s6198_s3 + $0xcc] ss:$16 sps:$4 sm:$0xff]  }
 0x156   : > { %4399 = vmatprep.mubr.msk.bf16.mxu0 %vm4784_vm1, %v4783_v1  ;;  %2229 = vmatprep.subr.bf16.mxu1 %v4547_v35 }
 0x157   : > { %4362 = vmatmul.mubr.msk.bf16.gmra.mrb[156].mxu1 %vm462_vm3, %v1621_v61  ;;  %2353 = vmatpush1.bf16.msra.mxu0 %v4548_v59 }
 0x158   : > { %v874_v11 = vpop.f32.mrb[52].mxu0  ;;  %2354 = vmatprep.subr.bf16.mxu0 %v4556_v60 }
 0x159   : > { %v5585_v55 = vadd.f32 %v874_v11, %v719_v23  ;;  %v4173_v6 = vpop.f32.mrb[53].mxu0 }
 0x15a   : > { %v957_v8 = vpop.f32.mrb[52].mxu1  ;;  %v877_v56 = vpop.f32.mrb[54].mxu0 }
 0x15b   : > { %v1028_v0 = vadd.f32 %v957_v8, %v5397_v10  ;;  %v4179_v49 = vpop.f32.mrb[53].mxu1  ;;  %v5589_v54 = vadd.f32 %v877_v56, %v722_v63  ;;  %v4174_v1 = vpop.f32.mrb[55].mxu0  ;;  %v4545_v10 = vld [vmem:[%s6198_s3 + $0xa0] ss:$16 sps:$4 sm:$0xff]  }
 0x15c   : > { %v960_v22 = vpop.f32.mrb[54].mxu1  ;;  %2230 = vmatpush1.bf16.msra.mxu1 %v4545_v10  ;;  %v4559_v49 = vld [vmem:[%s6198_s3 + $0xe4] ss:$16 sps:$4 sm:$0xff]  }
 0x15d   : > { %v1029_v14 = vadd.f32 %v960_v22, %v5401_v34  ;;  %4400 = vmatmul.mubr.msk.bf16.gmra.mrb[160].mxu0 %vm462_vm3, %v1799_v62  ;;  %v4180_v5 = vpop.f32.mrb[55].mxu1 }
 0x160   : > { %v1161_v21 = vpop.f32.mrb[56].mxu0 }
 0x161   : > { %v5605_v33 = vadd.f32 %v1161_v21, %v1028_v0  ;;  %v4217_v13 = vpop.f32.mrb[57].mxu0  ;;  %v4557_v0 = vld [vmem:[%s6198_s3 + $0xe0] ss:$16 sps:$4 sm:$0xff]  }
 0x162   : > { %v965_v34 = vpop.f32.mrb[56].mxu1  ;;  %v1164_v4 = vpop.f32.mrb[58].mxu0 }
 0x163   : > { %v1030_v24 = vadd.f32 %v965_v34, %v5414_v20  ;;  %v4183_v9 = vpop.f32.mrb[57].mxu1  ;;  %v5608_v18 = vadd.f32 %v1164_v4, %v1029_v14  ;;  %v4218_v37 = vpop.f32.mrb[59].mxu0  ;;  %v4785_v34 = vmov 0  }
 0x164   : > { %v968_v39 = vpop.f32.mrb[58].mxu1  ;;  %2251 = vmatprep.mubr.bf16.mxu1 %v4785_v34  ;;  %2374 = vmatprep.mubr.bf16.mxu0 %v4785_v34 }
 0x165   : > { %v1031_v47 = vadd.f32 %v968_v39, %v5418_v38  ;;  %v4184_v7 = vpop.f32.mrb[59].mxu1  ;;  %v4553_v38 = vld [vmem:[%s6198_s3 + $0xc4] ss:$16 sps:$4 sm:$0xff]  }
 0x166   : > { %2231 = vmatprep.subr.bf16.mxu1 %v4553_v38 }
 0x167   : > { %2232 = vmatpush1.bf16.msra.mxu1 %v4551_v53 }
 0x168   : > { %v1169_v40 = vpop.f32.mrb[60].mxu0  ;;  %2233 = vmatprep.subr.bf16.mxu1 %v4559_v49 }
 0x169   : > { %v5617_v20 = vadd.f32 %v1169_v40, %v1030_v24  ;;  %v4221_v28 = vpop.f32.mrb[61].mxu0 }
 0x16a   : > { %v973_v50 = vpop.f32.mrb[60].mxu1  ;;  %v1172_v43 = vpop.f32.mrb[62].mxu0 }
 0x16b   : > { %v1032_v17 = vadd.f32 %v973_v50, %v5431_v31  ;;  %v4187_v26 = vpop.f32.mrb[61].mxu1  ;;  %v5620_v19 = vadd.f32 %v1172_v43, %v1031_v47  ;;  %v4222_v46 = vpop.f32.mrb[63].mxu0  ;;  %v4554_v31 = vld [vmem:[%s6198_s3 + $0xc8] ss:$16 sps:$4 sm:$0xff]   ;;  %2234 = vmatpush1.bf16.msra.mxu1 %v4557_v0 }
 0x16c   : > { %v976_v23 = vpop.f32.mrb[62].mxu1  ;;  %2355 = vmatpush1.bf16.msra.mxu0 %v4554_v31 }
 0x16d   : > { %v1033_v25 = vadd.f32 %v976_v23, %v5435_v29  ;;  %v4188_v16 = vpop.f32.mrb[63].mxu1 }
 0x170   : > { %v1177_v61 = vpop.f32.mrb[64].mxu0 }
 0x171   : > { %v5635_v63 = vadd.f32 %v1177_v61, %v1032_v17  ;;  %v4225_v42 = vpop.f32.mrb[65].mxu0 }
 0x172   : > { %v981_v2 = vpop.f32.mrb[64].mxu1  ;;  %v1180_v27 = vpop.f32.mrb[66].mxu0 }
 0x173   : > { %v1034_v29 = vadd.f32 %v981_v2, %v5448_v48  ;;  %v4191_v58 = vpop.f32.mrb[65].mxu1  ;;  %v5638_v11 = vadd.f32 %v1180_v27, %v1033_v25  ;;  %v4226_v6 = vpop.f32.mrb[67].mxu0  ;;  %v4562_v48 = vld [vmem:[%s6198_s3 + $0xec] ss:$16 sps:$4 sm:$0xff]  }
 0x174   : > { %v984_v8 = vpop.f32.mrb[66].mxu1  ;;  %2356 = vmatprep.subr.bf16.mxu0 %v4562_v48 }
 0x175   : > { %v1035_v56 = vadd.f32 %v984_v8, %v5452_v57  ;;  %v4192_v62 = vpop.f32.mrb[67].mxu1  ;;  %v4560_v57 = vld [vmem:[%s6198_s3 + $0xe8] ss:$16 sps:$4 sm:$0xff]  }
 0x176   : > { %2357 = vmatpush1.bf16.msra.mxu0 %v4560_v57 }
 0x178   : > { %v1185_v1 = vpop.f32.mrb[68].mxu0 }
 0x179   : > { %v5653_v30 = vadd.f32 %v1185_v1, %v1034_v29  ;;  %v4229_v15 = vpop.f32.mrb[69].mxu0 }
 0x17a   : > { %v989_v22 = vpop.f32.mrb[68].mxu1  ;;  %v1188_v14 = vpop.f32.mrb[70].mxu0 }
 0x17b   : > { %v1036_v5 = vadd.f32 %v989_v22, %v5477_v3  ;;  %v4195_v10 = vpop.f32.mrb[69].mxu1  ;;  %v5656_v35 = vadd.f32 %v1188_v14, %v1035_v56  ;;  %v4230_v21 = vpop.f32.mrb[71].mxu0 }
 0x17c   : > { %v992_v13 = vpop.f32.mrb[70].mxu1 }
 0x17d   : > { %v1037_v4 = vadd.f32 %v992_v13, %v5481_v52  ;;  %v4196_v24 = vpop.f32.mrb[71].mxu1 }
 0x180   : > { %v1193_v9 = vpop.f32.mrb[72].mxu0 }
 0x181   : > { %v5661_v37 = vadd.f32 %v1193_v9, %v1036_v5  ;;  %v4233_v59 = vpop.f32.mrb[73].mxu0 }
 0x182   : > { %v997_v36 = vpop.f32.mrb[72].mxu1  ;;  %v1196_v39 = vpop.f32.mrb[74].mxu0 }
 0x183   : > { %v1038_v3 = vadd.f32 %v997_v36, %v5510_v32  ;;  %v4199_v47 = vpop.f32.mrb[73].mxu1  ;;  %v5664_v7 = vadd.f32 %v1196_v39, %v1037_v4  ;;  %v4234_v40 = vpop.f32.mrb[75].mxu0 }
 0x184   : > { %v1000_v28 = vpop.f32.mrb[74].mxu1 }
 0x185   : > { %v1039_v50 = vadd.f32 %v1000_v28, %v5514_v45  ;;  %v4200_v43 = vpop.f32.mrb[75].mxu1 }
 0x188   : > { %v1201_v17 = vpop.f32.mrb[76].mxu0 }
 0x189   : > { %v5667_v26 = vadd.f32 %v1201_v17, %v1038_v3  ;;  %v4237_v52 = vpop.f32.mrb[77].mxu0 }
 0x18a   : > { %v1005_v46 = vpop.f32.mrb[76].mxu1  ;;  %v1204_v53 = vpop.f32.mrb[78].mxu0 }
 0x18b   : > { %v1040_v38 = vadd.f32 %v1005_v46, %v5539_v12  ;;  %v4203_v23 = vpop.f32.mrb[77].mxu1  ;;  %v5670_v25 = vadd.f32 %v1204_v53, %v1039_v50  ;;  %v4238_v32 = vpop.f32.mrb[79].mxu0 }
 0x18c   : > { %v1008_v16 = vpop.f32.mrb[78].mxu1 }
 0x18d   : > { %v1041_v31 = vadd.f32 %v1008_v16, %v5543_v51  ;;  %v4204_v60 = vpop.f32.mrb[79].mxu1 }
 0x190   : > { %v1209_v61 = vpop.f32.mrb[80].mxu0 }
 0x191   : > { %v5673_v42 = vadd.f32 %v1209_v61, %v1040_v38  ;;  %v4241_v45 = vpop.f32.mrb[81].mxu0 }
 0x192   : > { %v1013_v2 = vpop.f32.mrb[80].mxu1  ;;  %v1212_v27 = vpop.f32.mrb[82].mxu0 }
 0x193   : > { %v1042_v29 = vadd.f32 %v1013_v2, %v5566_v41  ;;  %v4207_v58 = vpop.f32.mrb[81].mxu1  ;;  %v5676_v6 = vadd.f32 %v1212_v27, %v1041_v31  ;;  %v4242_v12 = vpop.f32.mrb[83].mxu0 }
 0x194   : > { %v1016_v8 = vpop.f32.mrb[82].mxu1 }
 0x195   : > { %v1043_v56 = vadd.f32 %v1016_v8, %v5570_v44  ;;  %v4208_v62 = vpop.f32.mrb[83].mxu1 }
 0x198   : > { %v1217_v0 = vpop.f32.mrb[84].mxu0 }
 0x199   : > { %v5679_v49 = vadd.f32 %v1217_v0, %v1042_v29  ;;  %v4245_v51 = vpop.f32.mrb[85].mxu0 }
 0x19a   : > { %v1021_v48 = vpop.f32.mrb[84].mxu1  ;;  %v1220_v1 = vpop.f32.mrb[86].mxu0 }
 0x19b   : > { %v1044_v57 = vadd.f32 %v1021_v48, %v5585_v55  ;;  %v4211_v15 = vpop.f32.mrb[85].mxu1  ;;  %v5682_v22 = vadd.f32 %v1220_v1, %v1043_v56  ;;  %v4246_v41 = vpop.f32.mrb[87].mxu0  ;;  %v4563_v1 = vld [vmem:[%s6200_s5 + $0x40] sm:$0xff]  }
 0x19c   : > { %v1024_v14 = vpop.f32.mrb[86].mxu1  ;;  %3921 = vmatprep.subr.bf16.mxu1 %v4563_v1 }
 0x19d   : > { %v1045_v5 = vadd.f32 %v1024_v14, %v5589_v54  ;;  %v4212_v10 = vpop.f32.mrb[87].mxu1 }
 0x1a0   : > { %v1225_v21 = vpop.f32.mrb[88].mxu0 }
 0x1a1   : > { %v5685_v13 = vadd.f32 %v1225_v21, %v1044_v57  ;;  %v4249_v44 = vpop.f32.mrb[89].mxu0 }
 0x1a2   : > { %v1339_v4 = vpop.f32.mrb[88].mxu1  ;;  %v1228_v24 = vpop.f32.mrb[90].mxu0 }
 0x1a3   : > { %v1410_v9 = vadd.f32 %v1339_v4, %v5605_v33  ;;  %v4255_v59 = vpop.f32.mrb[89].mxu1  ;;  %v5688_v36 = vadd.f32 %v1228_v24, %v1045_v5  ;;  %v4250_v55 = vpop.f32.mrb[91].mxu0 }
 0x1a4   : > { %v1342_v39 = vpop.f32.mrb[90].mxu1 }
 0x1a5   : > { %v1411_v3 = vadd.f32 %v1342_v39, %v5608_v18  ;;  %v4256_v47 = vpop.f32.mrb[91].mxu1 }
 0x1a8   : > { %v1482_v40 = vpop.f32.mrb[92].mxu0 }
 0x1a9   : > { %v5691_v28 = vadd.f32 %v1482_v40, %v1410_v9  ;;  %v4293_v54 = vpop.f32.mrb[93].mxu0 }
 0x1aa   : > { %v1347_v50 = vpop.f32.mrb[92].mxu1  ;;  %v1485_v43 = vpop.f32.mrb[94].mxu0 }
 0x1ab   : > { %v1412_v17 = vadd.f32 %v1347_v50, %v5617_v20  ;;  %v4259_v52 = vpop.f32.mrb[93].mxu1  ;;  %v5694_v46 = vadd.f32 %v1485_v43, %v1411_v3  ;;  %v4294_v33 = vpop.f32.mrb[95].mxu0 }
 0x1ac   : > { %v1350_v53 = vpop.f32.mrb[94].mxu1 }
 0x1ad   : > { %v1413_v38 = vadd.f32 %v1350_v53, %v5620_v19  ;;  %v4260_v23 = vpop.f32.mrb[95].mxu1 }
 0x1b0   : > { %v1490_v32 = vpop.f32.mrb[96].mxu0 }
 0x1b1   : > { %v5697_v16 = vadd.f32 %v1490_v32, %v1412_v17  ;;  %v4297_v18 = vpop.f32.mrb[97].mxu0 }
 0x1b2   : > { %v1355_v31 = vpop.f32.mrb[96].mxu1  ;;  %v1493_v60 = vpop.f32.mrb[98].mxu0 }
 0x1b3   : > { %v1414_v61 = vadd.f32 %v1355_v31, %v5635_v63  ;;  %v4263_v45 = vpop.f32.mrb[97].mxu1  ;;  %v5700_v2 = vadd.f32 %v1493_v60, %v1413_v38  ;;  %v4298_v20 = vpop.f32.mrb[99].mxu0 }
 0x1b4   : > { %v1358_v27 = vpop.f32.mrb[98].mxu1 }
 0x1b5   : > { %v1415_v29 = vadd.f32 %v1358_v27, %v5638_v11  ;;  %v4264_v58 = vpop.f32.mrb[99].mxu1  ;;  %v4565_v11 = vld [vmem:[%s6200_s5 + $0xc0] sm:$0xff]  }
 0x1b6   : > { %3991 = vmatprep.subr.bf16.mxu0 %v4565_v11 }
 0x1b8   : > { %v1498_v12 = vpop.f32.mrb[100].mxu0 }
 0x1b9   : > { %v5703_v8 = vadd.f32 %v1498_v12, %v1414_v61  ;;  %v4301_v19 = vpop.f32.mrb[101].mxu0 }
 0x1ba   : > { %v1363_v56 = vpop.f32.mrb[100].mxu1  ;;  %v1501_v62 = vpop.f32.mrb[102].mxu0 }
 0x1bb   : > { %v1416_v0 = vadd.f32 %v1363_v56, %v5653_v30  ;;  %v4267_v51 = vpop.f32.mrb[101].mxu1  ;;  %v5706_v48 = vadd.f32 %v1501_v62, %v1415_v29  ;;  %v4302_v63 = vpop.f32.mrb[103].mxu0 }
 0x1bc   : > { %v1366_v57 = vpop.f32.mrb[102].mxu1 }
 0x1bd   : > { %v1417_v15 = vadd.f32 %v1366_v57, %v5656_v35  ;;  %v4268_v41 = vpop.f32.mrb[103].mxu1 }
 0x1c0   : > { %v1506_v14 = vpop.f32.mrb[104].mxu0 }
 0x1c1   : > { %v5715_v30 = vadd.f32 %v1506_v14, %v1416_v0  ;;  %v4305_v5 = vpop.f32.mrb[105].mxu0 }
 0x1c2   : > { %v1371_v10 = vpop.f32.mrb[104].mxu1  ;;  %v1509_v21 = vpop.f32.mrb[106].mxu0 }
 0x1c3   : > { %v1418_v44 = vadd.f32 %v1371_v10, %v5661_v37  ;;  %v4271_v4 = vpop.f32.mrb[105].mxu1  ;;  %v5718_v24 = vadd.f32 %v1509_v21, %v1417_v15  ;;  %v4306_v9 = vpop.f32.mrb[107].mxu0 }
 0x1c4   : > { %v1374_v59 = vpop.f32.mrb[106].mxu1 }
 0x1c5   : > { %v1419_v55 = vadd.f32 %v1374_v59, %v5664_v7  ;;  %v4272_v39 = vpop.f32.mrb[107].mxu1 }
 0x1c8   : > { %v1514_v35 = vpop.f32.mrb[108].mxu0 }
 0x1c9   : > { %v5721_v3 = vadd.f32 %v1514_v35, %v1418_v44  ;;  %v4309_v47 = vpop.f32.mrb[109].mxu0 }
 0x1ca   : > { %v1379_v40 = vpop.f32.mrb[108].mxu1  ;;  %v1517_v54 = vpop.f32.mrb[110].mxu0 }
 0x1cb   : > { %v1420_v50 = vadd.f32 %v1379_v40, %v5667_v26  ;;  %v4275_v43 = vpop.f32.mrb[109].mxu1  ;;  %v5724_v17 = vadd.f32 %v1517_v54, %v1419_v55  ;;  %v4310_v37 = vpop.f32.mrb[111].mxu0 }
 0x1cc   : > { %v1382_v52 = vpop.f32.mrb[110].mxu1 }
 0x1cd   : > { %v1421_v33 = vadd.f32 %v1382_v52, %v5670_v25  ;;  %v4276_v53 = vpop.f32.mrb[111].mxu1 }
 0x1d0   : > { %v1522_v38 = vpop.f32.mrb[112].mxu0 }
 0x1d1   : > { %v5727_v23 = vadd.f32 %v1522_v38, %v1420_v50  ;;  %v4313_v7 = vpop.f32.mrb[113].mxu0 }
 0x1d2   : > { %v1387_v32 = vpop.f32.mrb[112].mxu1  ;;  %v1525_v18 = vpop.f32.mrb[114].mxu0 }
 0x1d3   : > { %v1422_v31 = vadd.f32 %v1387_v32, %v5673_v42  ;;  %v4279_v60 = vpop.f32.mrb[113].mxu1  ;;  %v5730_v61 = vadd.f32 %v1525_v18, %v1421_v33  ;;  %v4314_v26 = vpop.f32.mrb[115].mxu0 }
 0x1d4   : > { %v1390_v45 = vpop.f32.mrb[114].mxu1 }
 0x1d5   : > { %v1423_v20 = vadd.f32 %v1390_v45, %v5676_v6  ;;  %v4280_v27 = vpop.f32.mrb[115].mxu1 }
 0x1d8   : > { %v1530_v29 = vpop.f32.mrb[116].mxu0 }
 0x1d9   : > { %v5733_v58 = vadd.f32 %v1530_v29, %v1422_v31  ;;  %v4317_v25 = vpop.f32.mrb[117].mxu0 }
 0x1da   : > { %v1395_v12 = vpop.f32.mrb[116].mxu1  ;;  %v1533_v19 = vpop.f32.mrb[118].mxu0 }
 0x1db   : > { %v1424_v56 = vadd.f32 %v1395_v12, %v5679_v49  ;;  %v4283_v62 = vpop.f32.mrb[117].mxu1  ;;  %v5736_v0 = vadd.f32 %v1533_v19, %v1423_v20  ;;  %v4318_v42 = vpop.f32.mrb[119].mxu0 }
 0x1dc   : > { %v1398_v51 = vpop.f32.mrb[118].mxu1 }
 0x1dd   : > { %v1425_v63 = vadd.f32 %v1398_v51, %v5682_v22  ;;  %v4284_v1 = vpop.f32.mrb[119].mxu1  ;;  %v4569_v51 = vld [vmem:[%s6200_s5 + $0xc8] sm:$0xff]  }
 0x1e0   : > { %v1538_v11 = vpop.f32.mrb[120].mxu0 }
 0x1e1   : > { %v5739_v57 = vadd.f32 %v1538_v11, %v1424_v56  ;;  %v4321_v6 = vpop.f32.mrb[121].mxu0  ;;  %v4566_v56 = vld [vmem:[%s6200_s5 + $0x80] sm:$0xff]  }
 0x1e2   : > { %v1403_v15 = vpop.f32.mrb[120].mxu1  ;;  %v1541_v41 = vpop.f32.mrb[122].mxu0 }
 0x1e3   : > { %v1426_v14 = vadd.f32 %v1403_v15, %v5685_v13  ;;  %v4287_v5 = vpop.f32.mrb[121].mxu1  ;;  %v5742_v10 = vadd.f32 %v1541_v41, %v1425_v63  ;;  %v4322_v49 = vpop.f32.mrb[123].mxu0 }
 0x1e4   : > { %v1406_v21 = vpop.f32.mrb[122].mxu1 }
 0x1e5   : > { %v1427_v44 = vadd.f32 %v1406_v21, %v5688_v36  ;;  %v4288_v4 = vpop.f32.mrb[123].mxu1  ;;  %v5754_v36 = vld [vmem:[%s6197_s2] ss:$0 sm:$0xff]  ;;  %v4570_v21 = vld [vmem:[%s6200_s5 + $0x88] sm:$0xff]  }
 0x1e8   : > { %v1546_v9 = vpop.f32.mrb[124].mxu0 }
 0x1e9   : > { %v5745_v59 = vadd.f32 %v1546_v9, %v1426_v14  ;;  %v4325_v22 = vpop.f32.mrb[125].mxu0 }
 0x1ea   : > { %v1690_v55 = vpop.f32.mrb[124].mxu1  ;;  %v1549_v39 = vpop.f32.mrb[126].mxu0 }
 0x1eb   : > { %v1761_v35 = vadd.f32 %v1690_v55, %v5691_v28  ;;  %v4331_v47 = vpop.f32.mrb[125].mxu1  ;;  %v5748_v40 = vadd.f32 %v1549_v39, %v1427_v44  ;;  %v4326_v13 = vpop.f32.mrb[127].mxu0  ;;  %v4571_v44 = vld [vmem:[%s6200_s5 + $0x50] sm:$0xff]  }
 0x1ec   : > { %v1693_v54 = vpop.f32.mrb[126].mxu1  ;;  %v4572_v47 = vld [vmem:[%s6200_s5 + $0x10] sm:$0xff]  }
 0x1ed   : > { %v1762_v50 = vadd.f32 %v1693_v54, %v5694_v46  ;;  %v4332_v43 = vpop.f32.mrb[127].mxu1  ;;  %v4574_v13 = vld [vmem:[%s6200_s5 + $0x90] sm:$0xff]  }
 0x1ee   : > { %v4575_v43 = vld [vmem:[%s6200_s5 + $0x58] sm:$0xff]  }
 0x1f0   : > { %v1864_v37 = vpop.f32.mrb[128].mxu0 }
 0x1f1   : > { %v1935_v52 = vadd.f32 %v1864_v37, %v1761_v35  ;;  %v4369_v33 = vpop.f32.mrb[129].mxu0  ;;  %v4577_v37 = vld [vmem:[%s6200_s5 + $0xd8] sm:$0xff]  }
 0x1f2   : > { %v1698_v53 = vpop.f32.mrb[128].mxu1  ;;  %v1867_v38 = vpop.f32.mrb[130].mxu0 }
 0x1f3   : > { %v1763_v28 = vadd.f32 %v1698_v53, %v5697_v16  ;;  %v1960_v7 = vadd.f32 %v5754_v36, %v1935_v52  ;;  %v4335_v32 = vpop.f32.mrb[129].mxu1  ;;  %v1936_v18 = vadd.f32 %v1867_v38, %v1762_v50  ;;  %v4370_v31 = vpop.f32.mrb[131].mxu0  ;;  %v4564_v16 = vld [vmem:[%s6200_s5] sm:$0xff]  }
 0x1f4   : > { %v1701_v60 = vpop.f32.mrb[130].mxu1 }
 0x1f5   : > { %v1764_v46 = vadd.f32 %v1701_v60, %v5700_v2  ;;  %v1961_v26 = vadd.f32 %v5754_v36, %v1936_v18  ;;  %v4336_v45 = vpop.f32.mrb[131].mxu1  ;;  %v1978_v20 = vmax.f32 %v1960_v7, 0.0  ;;  %v4567_v2 = vld [vmem:[%s6200_s5 + $0x48] sm:$0xff]   ;;  %v4578_v60 = vld [vmem:[%s6200_s5 + $0x98] sm:$0xff]  }
 0x1f7   : > { %v1979_v27 = vmax.f32 %v1961_v26, 0.0 }
 0x1f8   : > { %v1872_v29 = vpop.f32.mrb[132].mxu0 }
 0x1f9   : > { %v1996_v25 = vpack.c.bf16 %v1979_v27, %v1978_v20  ;;  %v1937_v12 = vadd.f32 %v1872_v29, %v1763_v28  ;;  %v4373_v19 = vpop.f32.mrb[133].mxu0 }
 0x1fa   : > { %v1706_v62 = vpop.f32.mrb[132].mxu1  ;;  %v1875_v42 = vpop.f32.mrb[134].mxu0  ;;  %v4582_v19 = vld [vmem:[%s6200_s5 + $0xa0] sm:$0xff]  }
 0x1fb   : > { %v1765_v63 = vadd.f32 %v1706_v62, %v5703_v8  ;;  %v1962_v1 = vadd.f32 %v5754_v36, %v1937_v12  ;;  %v4339_v11 = vpop.f32.mrb[133].mxu1  ;;  %v1938_v6 = vadd.f32 %v1875_v42, %v1764_v46  ;;  %v4374_v15 = vpop.f32.mrb[135].mxu0  ;;  %2252 = vmatmul.mubr.bf16.vlgmr.msra.gmra.mrb[160].mxu1 %v1996_v25  ;;  %2375 = vmatmul.mubr.bf16.vlgmr.msra.gmra.mrb[164].mxu0 %v1996_v25  ;;  %v4568_v8 = vld [vmem:[%s6200_s5 + $0x8] sm:$0xff]   ;;  %v4579_v46 = vld [vmem:[%s6200_s5 + $0x60] sm:$0xff]  }
 0x1fc   : > { %v1709_v41 = vpop.f32.mrb[134].mxu1  ;;  %2261 = vmatprep.mubr.bf16.mxu1 %v4785_v34  ;;  %2384 = vmatprep.mubr.bf16.mxu0 %v4785_v34  ;;  %v4580_v12 = vld [vmem:[%s6200_s5 + $0x20] sm:$0xff]   ;;  %v4583_v62 = vld [vmem:[%s6200_s5 + $0x68] sm:$0xff]  }
 0x1fd   : > { %v1766_v14 = vadd.f32 %v1709_v41, %v5706_v48  ;;  %v1963_v5 = vadd.f32 %v5754_v36, %v1938_v6  ;;  %v4340_v49 = vpop.f32.mrb[135].mxu1  ;;  %3922 = vmatpush3.bf16.msra.mxu1 %v4564_v16  ;;  %3992 = vmatpush3.bf16.msra.mxu0 %v4566_v56  ;;  %v4573_v48 = vld [vmem:[%s6200_s5 + $0xd0] sm:$0xff]   ;;  %v1980_v4 = vmax.f32 %v1962_v1, 0.0  ;;  %v4585_v42 = vld [vmem:[%s6200_s5 + $0xe8] sm:$0xff]  }
 0x1fe   : > { %3923 = vmatprep.subr.bf16.mxu1 %v4567_v2  ;;  %3993 = vmatprep.subr.bf16.mxu0 %v4569_v51  ;;  %v4587_v49 = vld [vmem:[%s6200_s5 + $0x70] sm:$0xff]  }
 0x1ff   : > { %v1981_v9 = vmax.f32 %v1963_v5, 0.0  ;;  %v4586_v5 = vld [vmem:[%s6200_s5 + $0xa8] sm:$0xff]  }
 0x200   : > { %v1880_v22 = vpop.f32.mrb[136].mxu0 }
 0x201   : > { %v1939_v55 = vadd.f32 %v1880_v22, %v1765_v63  ;;  %v4377_v39 = vpop.f32.mrb[137].mxu0  ;;  %v1997_v35 = vpack.c.bf16 %v1981_v9, %v1980_v4  ;;  %3924 = vmatpush3.bf16.msra.mxu1 %v4568_v8  ;;  %3994 = vmatpush3.bf16.msra.mxu0 %v4570_v21  ;;  %v4588_v22 = vld [vmem:[%s6200_s5 + $0x30] sm:$0xff]  }
 0x202   : > { %v1714_v54 = vpop.f32.mrb[136].mxu1  ;;  %v1883_v50 = vpop.f32.mrb[138].mxu0  ;;  %3925 = vmatprep.subr.bf16.mxu1 %v4571_v44  ;;  %3995 = vmatprep.subr.bf16.mxu0 %v4573_v48 }
 0x203   : > { %v1767_v52 = vadd.f32 %v1714_v54, %v5715_v30  ;;  %v1964_v33 = vadd.f32 %v5754_v36, %v1939_v55  ;;  %v4343_v53 = vpop.f32.mrb[137].mxu1  ;;  %v1940_v38 = vadd.f32 %v1883_v50, %v1766_v14  ;;  %v4378_v28 = vpop.f32.mrb[139].mxu0  ;;  %2262 = vmatmul.mubr.bf16.gmra.mrb[164].mxu1 %v1997_v35  ;;  %2385 = vmatmul.mubr.bf16.gmra.mrb[168].mxu0 %v1997_v35  ;;  %v4576_v30 = vld [vmem:[%s6200_s5 + $0x18] sm:$0xff]   ;;  %v4590_v55 = vld [vmem:[%s6200_s5 + $0xb0] sm:$0xff]  }
 0x204   : > { %v1717_v7 = vpop.f32.mrb[138].mxu1  ;;  %2271 = vmatprep.mubr.bf16.mxu1 %v4785_v34  ;;  %2394 = vmatprep.mubr.bf16.mxu0 %v4785_v34 }
 0x205   : > { %v1768_v32 = vadd.f32 %v1717_v7, %v5718_v24  ;;  %v1965_v18 = vadd.f32 %v5754_v36, %v1940_v38  ;;  %v4344_v31 = vpop.f32.mrb[139].mxu1  ;;  %3926 = vmatpush3.bf16.msra.mxu1 %v4572_v47  ;;  %3996 = vmatpush3.bf16.msra.mxu0 %v4574_v13  ;;  %v4581_v24 = vld [vmem:[%s6200_s5 + $0xe0] sm:$0xff]   ;;  %v1982_v26 = vmax.f32 %v1964_v33, 0.0 }
 0x206   : > { %3927 = vmatprep.subr.bf16.mxu1 %v4575_v43  ;;  %3997 = vmatprep.subr.bf16.mxu0 %v4577_v37 }
 0x207   : > { %v1983_v45 = vmax.f32 %v1965_v18, 0.0 }
 0x208   : > { %v1888_v20 = vpop.f32.mrb[140].mxu0 }
 0x209   : > { %v1941_v27 = vadd.f32 %v1888_v20, %v1767_v52  ;;  %v4381_v29 = vpop.f32.mrb[141].mxu0  ;;  %v1998_v25 = vpack.c.bf16 %v1983_v45, %v1982_v26  ;;  %3928 = vmatpush3.bf16.msra.mxu1 %v4576_v30  ;;  %3998 = vmatpush3.bf16.msra.mxu0 %v4578_v60 }
 0x20a   : > { %v1722_v16 = vpop.f32.mrb[140].mxu1  ;;  %v1891_v56 = vpop.f32.mrb[142].mxu0  ;;  %3929 = vmatprep.subr.bf16.mxu1 %v4579_v46  ;;  %3999 = vmatprep.subr.bf16.mxu0 %v4581_v24 }
 0x20b   : > { %v1769_v2 = vadd.f32 %v1722_v16, %v5721_v3  ;;  %v1966_v51 = vadd.f32 %v5754_v36, %v1941_v27  ;;  %v4347_v63 = vpop.f32.mrb[141].mxu1  ;;  %v1942_v1 = vadd.f32 %v1891_v56, %v1768_v32  ;;  %v4382_v11 = vpop.f32.mrb[143].mxu0  ;;  %2272 = vmatmul.mubr.bf16.gmra.mrb[168].mxu1 %v1998_v25  ;;  %2395 = vmatmul.mubr.bf16.gmra.mrb[172].mxu0 %v1998_v25  ;;  %v4584_v3 = vld [vmem:[%s6200_s5 + $0x28] sm:$0xff]  }
 0x20c   : > { %v1725_v6 = vpop.f32.mrb[142].mxu1  ;;  %2281 = vmatprep.mubr.bf16.mxu1 %v4785_v34  ;;  %2404 = vmatprep.mubr.bf16.mxu0 %v4785_v34 }
 0x20d   : > { %v1770_v15 = vadd.f32 %v1725_v6, %v5724_v17  ;;  %v1967_v41 = vadd.f32 %v5754_v36, %v1942_v1  ;;  %v4348_v14 = vpop.f32.mrb[143].mxu1  ;;  %3930 = vmatpush3.bf16.msra.mxu1 %v4580_v12  ;;  %4000 = vmatpush3.bf16.msra.mxu0 %v4582_v19  ;;  %v4589_v17 = vld [vmem:[%s6200_s5 + $0xf0] sm:$0xff]   ;;  %v1984_v8 = vmax.f32 %v1966_v51, 0.0 }
 0x20e   : > { %3931 = vmatprep.subr.bf16.mxu1 %v4583_v62  ;;  %4001 = vmatprep.subr.bf16.mxu0 %v4585_v42 }
 0x20f   : > { %v1985_v21 = vmax.f32 %v1967_v41, 0.0 }
 0x210   : > { %v1896_v44 = vpop.f32.mrb[144].mxu0 }
 0x211   : > { %v1943_v48 = vadd.f32 %v1896_v44, %v1769_v2  ;;  %v4385_v4 = vpop.f32.mrb[145].mxu0  ;;  %v1999_v9 = vpack.c.bf16 %v1985_v21, %v1984_v8  ;;  %3932 = vmatpush3.bf16.msra.mxu1 %v4584_v3  ;;  %4002 = vmatpush3.bf16.msra.mxu0 %v4586_v5 }
 0x212   : > { %v1730_v39 = vpop.f32.mrb[144].mxu1  ;;  %v1899_v35 = vpop.f32.mrb[146].mxu0  ;;  %3933 = vmatprep.subr.bf16.mxu1 %v4587_v49  ;;  %4003 = vmatprep.subr.bf16.mxu0 %v4589_v17 }
 0x213   : > { %v1771_v47 = vadd.f32 %v1730_v39, %v5727_v23  ;;  %v1968_v13 = vadd.f32 %v5754_v36, %v1943_v48  ;;  %v4351_v54 = vpop.f32.mrb[145].mxu1  ;;  %v1944_v50 = vadd.f32 %v1899_v35, %v1770_v15  ;;  %v4386_v43 = vpop.f32.mrb[147].mxu0  ;;  %2282 = vmatmul.mubr.bf16.gmra.mrb[172].mxu1 %v1999_v9  ;;  %2405 = vmatmul.mubr.bf16.gmra.mrb[176].mxu0 %v1999_v9 }
 0x214   : > { %v1733_v37 = vpop.f32.mrb[146].mxu1  ;;  %2291 = vmatprep.mubr.bf16.mxu1 %v4785_v34  ;;  %2414 = vmatprep.mubr.bf16.mxu0 %v4785_v34 }
 0x215   : > { %v1772_v52 = vadd.f32 %v1733_v37, %v5730_v61  ;;  %v1969_v33 = vadd.f32 %v5754_v36, %v1944_v50  ;;  %v4352_v53 = vpop.f32.mrb[147].mxu1  ;;  %3934 = vmatpush3.bf16.msra.mxu1 %v4588_v22  ;;  %4004 = vmatpush3.bf16.msra.mxu0 %v4590_v55  ;;  %v1986_v23 = vmax.f32 %v1968_v13, 0.0 }
 0x217   : > { %v1987_v38 = vmax.f32 %v1969_v33, 0.0 }
 0x218   : > { %v1904_v28 = vpop.f32.mrb[148].mxu0 }
 0x219   : > { %v1945_v7 = vadd.f32 %v1904_v28, %v1771_v47  ;;  %v4389_v32 = vpop.f32.mrb[149].mxu0  ;;  %v2000_v18 = vpack.c.bf16 %v1987_v38, %v1986_v23 }
 0x21a   : > { %v1738_v31 = vpop.f32.mrb[148].mxu1  ;;  %v1907_v30 = vpop.f32.mrb[150].mxu0  ;;  %v4592_v32 = vld [vmem:[%s6200_s5 + $0x38] sm:$0xff]  }
 0x21b   : > { %v1773_v60 = vadd.f32 %v1738_v31, %v5733_v58  ;;  %v1970_v46 = vadd.f32 %v5754_v36, %v1945_v7  ;;  %v4355_v24 = vpop.f32.mrb[149].mxu1  ;;  %v1946_v26 = vadd.f32 %v1907_v30, %v1772_v52  ;;  %v4390_v61 = vpop.f32.mrb[151].mxu0  ;;  %2292 = vmatmul.mubr.bf16.gmra.mrb[176].mxu1 %v2000_v18  ;;  %2415 = vmatmul.mubr.bf16.gmra.mrb[180].mxu0 %v2000_v18  ;;  %v4591_v7 = vld [vmem:[%s6200_s5 + $0x78] sm:$0xff]   ;;  %v2039_v18 = vlaneseq }
 0x21c   : > { %v1741_v45 = vpop.f32.mrb[150].mxu1  ;;  %2301 = vmatprep.mubr.bf16.mxu1 %v4785_v34  ;;  %2424 = vmatprep.mubr.bf16.mxu0 %v4785_v34 }
 0x21d   : > { %v1774_v20 = vadd.f32 %v1741_v45, %v5736_v0  ;;  %v1971_v27 = vadd.f32 %v5754_v36, %v1946_v26  ;;  %v4356_v29 = vpop.f32.mrb[151].mxu1  ;;  %v1988_v25 = vmax.f32 %v1970_v46, 0.0  ;;  %3935 = vmatprep.subr.bf16.mxu1 %v4591_v7  ;;  %v2040_v31 = vshrl.u32 %v2039_v18, 7  ;;  %v2037_v46 = vld [vmem:[%s6199_s4] sm:$0xf] }
 0x21e   : > { %3936 = vmatpush3.bf16.msra.mxu1 %v4592_v32 }
 0x21f   : > { %v1989_v12 = vmax.f32 %v1971_v27, 0.0  ;;  %v2041_v30 = vsub.s32 0, %v2040_v31  ;;  %v2045_v24 = vsub.s32 1, %v2040_v31  ;;  %v2053_v26 = vsub.s32 3, %v2040_v31 }
 0x220   : > { %v1912_v58 = vpop.f32.mrb[152].mxu0 }
 0x221   : > { %v1947_v19 = vadd.f32 %v1912_v58, %v1773_v60  ;;  %v4393_v16 = vpop.f32.mrb[153].mxu0  ;;  %v2001_v56 = vpack.c.bf16 %v1989_v12, %v1988_v25  ;;  %v2049_v60 = vsub.s32 2, %v2040_v31  ;;  %v5899_v61 = vrot.slane %v2037_v46, %v2041_v30 }
 0x222   : > { %v1746_v62 = vpop.f32.mrb[152].mxu1  ;;  %v1915_v42 = vpop.f32.mrb[154].mxu0  ;;  %v5905_v27 = vrot.slane %v2037_v46, %v2053_v26 }
 0x223   : > { %v1775_v2 = vadd.f32 %v1746_v62, %v5739_v57  ;;  %v1972_v51 = vadd.f32 %v5754_v36, %v1947_v19  ;;  %v4359_v63 = vpop.f32.mrb[153].mxu1  ;;  %v1948_v1 = vadd.f32 %v1915_v42, %v1774_v20  ;;  %v4394_v11 = vpop.f32.mrb[155].mxu0  ;;  %2302 = vmatmul.mubr.bf16.gmra.mrb[180].mxu1 %v2001_v56  ;;  %2425 = vmatmul.mubr.bf16.gmra.mrb[184].mxu0 %v2001_v56 }
 0x224   : > { %v1749_v0 = vpop.f32.mrb[154].mxu1  ;;  %2311 = vmatprep.mubr.bf16.mxu1 %v4785_v34  ;;  %2434 = vmatprep.mubr.bf16.mxu0 %v4785_v34  ;;  %v5901_v45 = vrot.slane %v2037_v46, %v2049_v60  ;;  %v5903_v20 = vrot.slane %v2037_v46, %v2045_v24 }
 0x225   : > { %v1776_v6 = vadd.f32 %v1749_v0, %v5742_v10  ;;  %v1973_v15 = vadd.f32 %v5754_v36, %v1948_v1  ;;  %v4360_v41 = vpop.f32.mrb[155].mxu1  ;;  %v1990_v14 = vmax.f32 %v1972_v51, 0.0 }
 0x227   : > { %v1991_v3 = vmax.f32 %v1973_v15, 0.0 }
 0x228   : > { %v1920_v57 = vpop.f32.mrb[156].mxu0 }
 0x229   : > { %v1949_v5 = vadd.f32 %v1920_v57, %v1775_v2  ;;  %v4397_v49 = vpop.f32.mrb[157].mxu0  ;;  %v2002_v17 = vpack.c.bf16 %v1991_v3, %v1990_v14 }
 0x22a   : > { %v1754_v8 = vpop.f32.mrb[156].mxu1  ;;  %v1923_v21 = vpop.f32.mrb[158].mxu0 }
 0x22b   : > { %v1777_v44 = vadd.f32 %v1754_v8, %v5745_v59  ;;  %v1974_v48 = vadd.f32 %v5754_v36, %v1949_v5  ;;  %v4363_v4 = vpop.f32.mrb[157].mxu1  ;;  %v1950_v9 = vadd.f32 %v1923_v21, %v1776_v6  ;;  %v4398_v22 = vpop.f32.mrb[159].mxu0  ;;  %2312 = vmatmul.mubr.bf16.gmra.mrb[184].mxu1 %v2002_v17  ;;  %2435 = vmatmul.mubr.bf16.gmra.mrb[188].mxu0 %v2002_v17 }
 0x22c   : > { %v1757_v10 = vpop.f32.mrb[158].mxu1  ;;  %2321 = vmatprep.mubr.bf16.mxu1 %v4785_v34  ;;  %2444 = vmatprep.mubr.bf16.mxu0 %v4785_v34 }
 0x22d   : > { %v1778_v55 = vadd.f32 %v1757_v10, %v5748_v40  ;;  %v1975_v39 = vadd.f32 %v5754_v36, %v1950_v9  ;;  %v4364_v35 = vpop.f32.mrb[159].mxu1  ;;  %v1992_v47 = vmax.f32 %v1974_v48, 0.0 }
 0x22f   : > { %v1993_v13 = vmax.f32 %v1975_v39, 0.0 }
 0x230   : > { %v1928_v59 = vpop.f32.mrb[160].mxu0 }
 0x231   : > { %v1951_v54 = vadd.f32 %v1928_v59, %v1777_v44  ;;  %v4401_v50 = vpop.f32.mrb[161].mxu0  ;;  %v2003_v43 = vpack.c.bf16 %v1993_v13, %v1992_v47 }
 0x232   : > { %v1931_v37 = vpop.f32.mrb[162].mxu0 }
 0x233   : > { %v1976_v52 = vadd.f32 %v5754_v36, %v1951_v54  ;;  %v1952_v33 = vadd.f32 %v1931_v37, %v1778_v55  ;;  %v4402_v53 = vpop.f32.mrb[163].mxu0  ;;  %2322 = vmatmul.mubr.bf16.gmra.mrb[188].mxu1 %v2003_v43  ;;  %2445 = vmatmul.mubr.bf16.gmra.mrb[192].mxu0 %v2003_v43 }
 0x234   : > { %2331 = vmatprep.mubr.bf16.mxu1 %v4785_v34  ;;  %2454 = vmatprep.mubr.bf16.mxu0 %v4785_v34  ;;  %v4593_v34 = vld [vmem:[%s6200_s5 + $0xf8] sm:$0xff]  }
 0x235   : > { %v1977_v40 = vadd.f32 %v5754_v36, %v1952_v33  ;;  %v1994_v23 = vmax.f32 %v1976_v52, 0.0  ;;  %v4594_v36 = vld [vmem:[%s6200_s5 + $0xb8] sm:$0xff]   ;;  %4005 = vmatprep.subr.bf16.mxu0 %v4593_v34 }
 0x236   : > { %4006 = vmatpush3.bf16.msra.mxu0 %v4594_v36 }
 0x237   : > { %v1995_v38 = vmax.f32 %v1977_v40, 0.0 }
 0x239   : > { %v2004_v28 = vpack.c.bf16 %v1995_v38, %v1994_v23 }
 0x23b   : > { %2332 = vmatmul.mubr.bf16.gmra.mrb[192].mxu1 %v2004_v28  ;;  %2455 = vmatmul.mubr.bf16.gmra.mrb[196].mxu0 %v2004_v28 }
 0x2ce   : > { %v2253_v29 = vpop.f32.mrb[160].mxu1  ;;  %v2376_v25 = vpop.f32.mrb[164].mxu0 }
 0x2cf   : > { %v2254_v12 = vadd.f32 %v2253_v29, %v5899_v61  ;;  %v2377_v58 = vadd.f32 %v2376_v25, %v5901_v45  ;;  %v2255_v19 = vpop.f32.mrb[161].mxu1  ;;  %v2378_v16 = vpop.f32.mrb[165].mxu0 }
 0x2d0   : > { %v2256_v56 = vadd.f32 %v2255_v19, %v5903_v20  ;;  %v2379_v62 = vadd.f32 %v2378_v16, %v5905_v27  ;;  %v2257_v42 = vpop.f32.mrb[162].mxu1  ;;  %v2380_v2 = vpop.f32.mrb[166].mxu0 }
 0x2d1   : > { %v2258_v51 = vadd.f32 %v2257_v42, %v5899_v61  ;;  %v2381_v63 = vadd.f32 %v2380_v2, %v5901_v45  ;;  %v2259_v1 = vpop.f32.mrb[163].mxu1  ;;  %v2382_v11 = vpop.f32.mrb[167].mxu0  ;;  %v2465_v15 = vmax.f32 %v2254_v12, 0.0  ;;  %v2467_v41 = vmax.f32 %v2377_v58, 0.0 }
 0x2d2   : > { %v2260_v0 = vadd.f32 %v2259_v1, %v5903_v20  ;;  %v2383_v6 = vadd.f32 %v2382_v11, %v5905_v27  ;;  %v2466_v57 = vmax.f32 %v2256_v56, 0.0  ;;  %v2468_v5 = vmax.f32 %v2379_v62, 0.0 }
 0x2d3   : > { %v2469_v14 = vmax.f32 %v2258_v51, 0.0  ;;  %v2471_v3 = vmax.f32 %v2381_v63, 0.0 }
 0x2d4   : > { %v2470_v49 = vmax.f32 %v2260_v0, 0.0  ;;  %v2472_v17 = vmax.f32 %v2383_v6, 0.0 }
 0x2d5   : > { %v2537_v8 = vpack.c.bf16 %v2469_v14, %v2465_v15  ;;  %v2539_v21 = vpack.c.bf16 %v2471_v3, %v2467_v41 }
 0x2d6   : > { %v2538_v44 = vpack.c.bf16 %v2470_v49, %v2466_v57  ;;  %v2540_v48 = vpack.c.bf16 %v2472_v17, %v2468_v5  ;;  %v2263_v4 = vpop.f32.mrb[164].mxu1  ;;  %v2386_v9 = vpop.f32.mrb[168].mxu0 }
 0x2d7   : > { %v2264_v22 = vadd.f32 %v2263_v4, %v5899_v61  ;;  %v2387_v10 = vadd.f32 %v2386_v9, %v5901_v45  ;;  %v2265_v55 = vpop.f32.mrb[165].mxu1  ;;  %v2388_v39 = vpop.f32.mrb[169].mxu0 }
 0x2d8   : > { %v2266_v35 = vadd.f32 %v2265_v55, %v5903_v20  ;;  %v2389_v47 = vadd.f32 %v2388_v39, %v5905_v27  ;;  %v2267_v13 = vpop.f32.mrb[166].mxu1  ;;  %v2390_v59 = vpop.f32.mrb[170].mxu0  ;;  %2868 = vmatprep.mubr.bf16.mxu1 %v2538_v44  ;;  %2973 = vmatprep.mubr.bf16.mxu0 %v2540_v48 }
 0x2d9   : > { %v2268_v54 = vadd.f32 %v2267_v13, %v5899_v61  ;;  %v2391_v50 = vadd.f32 %v2390_v59, %v5901_v45  ;;  %v2269_v43 = vpop.f32.mrb[167].mxu1  ;;  %v2392_v37 = vpop.f32.mrb[171].mxu0  ;;  %2869 = vmatmul.mubr.bf16.vlgmr.msra.gmra.mrb[196].mxu1 %v2537_v8  ;;  %2974 = vmatmul.mubr.bf16.vlgmr.msra.gmra.mrb[200].mxu0 %v2539_v21  ;;  %v2473_v53 = vmax.f32 %v2264_v22, 0.0  ;;  %v2475_v40 = vmax.f32 %v2387_v10, 0.0 }
 0x2da   : > { %v2270_v52 = vadd.f32 %v2269_v43, %v5903_v20  ;;  %v2393_v33 = vadd.f32 %v2392_v37, %v5905_v27  ;;  %v2474_v28 = vmax.f32 %v2266_v35, 0.0  ;;  %v2476_v7 = vmax.f32 %v2389_v47, 0.0 }
 0x2db   : > { %v2477_v23 = vmax.f32 %v2268_v54, 0.0  ;;  %v2479_v38 = vmax.f32 %v2391_v50, 0.0 }
 0x2dc   : > { %v2478_v32 = vmax.f32 %v2270_v52, 0.0  ;;  %v2480_v34 = vmax.f32 %v2393_v33, 0.0 }
 0x2dd   : > { %v2541_v36 = vpack.c.bf16 %v2477_v23, %v2473_v53  ;;  %v2543_v18 = vpack.c.bf16 %v2479_v38, %v2475_v40 }
 0x2de   : > { %v2542_v31 = vpack.c.bf16 %v2478_v32, %v2474_v28  ;;  %v2544_v30 = vpack.c.bf16 %v2480_v34, %v2476_v7  ;;  %v2273_v60 = vpop.f32.mrb[168].mxu1  ;;  %v2396_v46 = vpop.f32.mrb[172].mxu0 }
 0x2df   : > { %v2274_v24 = vadd.f32 %v2273_v60, %v5899_v61  ;;  %v2397_v26 = vadd.f32 %v2396_v46, %v5901_v45  ;;  %v2275_v29 = vpop.f32.mrb[169].mxu1  ;;  %v2398_v25 = vpop.f32.mrb[173].mxu0 }
 0x2e0   : > { %v2276_v12 = vadd.f32 %v2275_v29, %v5903_v20  ;;  %v2399_v58 = vadd.f32 %v2398_v25, %v5905_v27  ;;  %v2277_v19 = vpop.f32.mrb[170].mxu1  ;;  %v2400_v16 = vpop.f32.mrb[174].mxu0  ;;  %2876 = vmatprep.mubr.bf16.mxu1 %v2542_v31  ;;  %2981 = vmatprep.mubr.bf16.mxu0 %v2544_v30 }
 0x2e1   : > { %v2278_v56 = vadd.f32 %v2277_v19, %v5899_v61  ;;  %v2401_v62 = vadd.f32 %v2400_v16, %v5901_v45  ;;  %v2279_v42 = vpop.f32.mrb[171].mxu1  ;;  %v2402_v2 = vpop.f32.mrb[175].mxu0  ;;  %2877 = vmatmul.mubr.bf16.gmra.mrb[200].mxu1 %v2541_v36  ;;  %2982 = vmatmul.mubr.bf16.gmra.mrb[204].mxu0 %v2543_v18  ;;  %v2481_v1 = vmax.f32 %v2274_v24, 0.0  ;;  %v2483_v11 = vmax.f32 %v2397_v26, 0.0 }
 0x2e2   : > { %v2280_v51 = vadd.f32 %v2279_v42, %v5903_v20  ;;  %v2403_v63 = vadd.f32 %v2402_v2, %v5905_v27  ;;  %v2482_v15 = vmax.f32 %v2276_v12, 0.0  ;;  %v2484_v41 = vmax.f32 %v2399_v58, 0.0 }
 0x2e3   : > { %v2485_v0 = vmax.f32 %v2278_v56, 0.0  ;;  %v2487_v6 = vmax.f32 %v2401_v62, 0.0 }
 0x2e4   : > { %v2486_v14 = vmax.f32 %v2280_v51, 0.0  ;;  %v2488_v3 = vmax.f32 %v2403_v63, 0.0 }
 0x2e5   : > { %v2545_v57 = vpack.c.bf16 %v2485_v0, %v2481_v1  ;;  %v2547_v5 = vpack.c.bf16 %v2487_v6, %v2483_v11 }
 0x2e6   : > { %v2546_v49 = vpack.c.bf16 %v2486_v14, %v2482_v15  ;;  %v2548_v17 = vpack.c.bf16 %v2488_v3, %v2484_v41  ;;  %v2283_v8 = vpop.f32.mrb[172].mxu1  ;;  %v2406_v21 = vpop.f32.mrb[176].mxu0 }
 0x2e7   : > { %v2284_v44 = vadd.f32 %v2283_v8, %v5899_v61  ;;  %v2407_v48 = vadd.f32 %v2406_v21, %v5901_v45  ;;  %v2285_v4 = vpop.f32.mrb[173].mxu1  ;;  %v2408_v9 = vpop.f32.mrb[177].mxu0 }
 0x2e8   : > { %v2286_v22 = vadd.f32 %v2285_v4, %v5903_v20  ;;  %v2409_v10 = vadd.f32 %v2408_v9, %v5905_v27  ;;  %v2287_v55 = vpop.f32.mrb[174].mxu1  ;;  %v2410_v39 = vpop.f32.mrb[178].mxu0  ;;  %2884 = vmatprep.mubr.bf16.mxu1 %v2546_v49  ;;  %2989 = vmatprep.mubr.bf16.mxu0 %v2548_v17 }
 0x2e9   : > { %v2288_v35 = vadd.f32 %v2287_v55, %v5899_v61  ;;  %v2411_v47 = vadd.f32 %v2410_v39, %v5901_v45  ;;  %v2289_v13 = vpop.f32.mrb[175].mxu1  ;;  %v2412_v59 = vpop.f32.mrb[179].mxu0  ;;  %2885 = vmatmul.mubr.bf16.gmra.mrb[204].mxu1 %v2545_v57  ;;  %2990 = vmatmul.mubr.bf16.gmra.mrb[208].mxu0 %v2547_v5  ;;  %v2489_v43 = vmax.f32 %v2284_v44, 0.0  ;;  %v2491_v37 = vmax.f32 %v2407_v48, 0.0 }
 0x2ea   : > { %v2290_v54 = vadd.f32 %v2289_v13, %v5903_v20  ;;  %v2413_v50 = vadd.f32 %v2412_v59, %v5905_v27  ;;  %v2490_v53 = vmax.f32 %v2286_v22, 0.0  ;;  %v2492_v40 = vmax.f32 %v2409_v10, 0.0 }
 0x2eb   : > { %v2493_v52 = vmax.f32 %v2288_v35, 0.0  ;;  %v2495_v33 = vmax.f32 %v2411_v47, 0.0 }
 0x2ec   : > { %v2494_v23 = vmax.f32 %v2290_v54, 0.0  ;;  %v2496_v38 = vmax.f32 %v2413_v50, 0.0 }
 0x2ed   : > { %v2549_v28 = vpack.c.bf16 %v2493_v52, %v2489_v43  ;;  %v2551_v7 = vpack.c.bf16 %v2495_v33, %v2491_v37 }
 0x2ee   : > { %v2550_v32 = vpack.c.bf16 %v2494_v23, %v2490_v53  ;;  %v2552_v34 = vpack.c.bf16 %v2496_v38, %v2492_v40  ;;  %v2293_v36 = vpop.f32.mrb[176].mxu1  ;;  %v2416_v18 = vpop.f32.mrb[180].mxu0 }
 0x2ef   : > { %v2294_v31 = vadd.f32 %v2293_v36, %v5899_v61  ;;  %v2417_v30 = vadd.f32 %v2416_v18, %v5901_v45  ;;  %v2295_v60 = vpop.f32.mrb[177].mxu1  ;;  %v2418_v46 = vpop.f32.mrb[181].mxu0 }
 0x2f0   : > { %v2296_v24 = vadd.f32 %v2295_v60, %v5903_v20  ;;  %v2419_v26 = vadd.f32 %v2418_v46, %v5905_v27  ;;  %v2297_v29 = vpop.f32.mrb[178].mxu1  ;;  %v2420_v25 = vpop.f32.mrb[182].mxu0  ;;  %2892 = vmatprep.mubr.bf16.mxu1 %v2550_v32  ;;  %2997 = vmatprep.mubr.bf16.mxu0 %v2552_v34 }
 0x2f1   : > { %v2298_v12 = vadd.f32 %v2297_v29, %v5899_v61  ;;  %v2421_v58 = vadd.f32 %v2420_v25, %v5901_v45  ;;  %v2299_v19 = vpop.f32.mrb[179].mxu1  ;;  %v2422_v16 = vpop.f32.mrb[183].mxu0  ;;  %2893 = vmatmul.mubr.bf16.gmra.mrb[208].mxu1 %v2549_v28  ;;  %2998 = vmatmul.mubr.bf16.gmra.mrb[212].mxu0 %v2551_v7  ;;  %v2497_v42 = vmax.f32 %v2294_v31, 0.0  ;;  %v2499_v2 = vmax.f32 %v2417_v30, 0.0 }
 0x2f2   : > { %v2300_v56 = vadd.f32 %v2299_v19, %v5903_v20  ;;  %v2423_v62 = vadd.f32 %v2422_v16, %v5905_v27  ;;  %v2498_v1 = vmax.f32 %v2296_v24, 0.0  ;;  %v2500_v11 = vmax.f32 %v2419_v26, 0.0 }
 0x2f3   : > { %v2501_v51 = vmax.f32 %v2298_v12, 0.0  ;;  %v2503_v63 = vmax.f32 %v2421_v58, 0.0 }
 0x2f4   : > { %v2502_v0 = vmax.f32 %v2300_v56, 0.0  ;;  %v2504_v6 = vmax.f32 %v2423_v62, 0.0 }
 0x2f5   : > { %v2553_v15 = vpack.c.bf16 %v2501_v51, %v2497_v42  ;;  %v2555_v41 = vpack.c.bf16 %v2503_v63, %v2499_v2 }
 0x2f6   : > { %v2554_v14 = vpack.c.bf16 %v2502_v0, %v2498_v1  ;;  %v2556_v3 = vpack.c.bf16 %v2504_v6, %v2500_v11  ;;  %v2303_v57 = vpop.f32.mrb[180].mxu1  ;;  %v2426_v5 = vpop.f32.mrb[184].mxu0 }
 0x2f7   : > { %v2304_v49 = vadd.f32 %v2303_v57, %v5899_v61  ;;  %v2427_v17 = vadd.f32 %v2426_v5, %v5901_v45  ;;  %v2305_v8 = vpop.f32.mrb[181].mxu1  ;;  %v2428_v21 = vpop.f32.mrb[185].mxu0 }
 0x2f8   : > { %v2306_v44 = vadd.f32 %v2305_v8, %v5903_v20  ;;  %v2429_v48 = vadd.f32 %v2428_v21, %v5905_v27  ;;  %v2307_v4 = vpop.f32.mrb[182].mxu1  ;;  %v2430_v9 = vpop.f32.mrb[186].mxu0  ;;  %2900 = vmatprep.mubr.bf16.mxu1 %v2554_v14  ;;  %3005 = vmatprep.mubr.bf16.mxu0 %v2556_v3 }
 0x2f9   : > { %v2308_v22 = vadd.f32 %v2307_v4, %v5899_v61  ;;  %v2431_v10 = vadd.f32 %v2430_v9, %v5901_v45  ;;  %v2309_v55 = vpop.f32.mrb[183].mxu1  ;;  %v2432_v39 = vpop.f32.mrb[187].mxu0  ;;  %2901 = vmatmul.mubr.bf16.gmra.mrb[212].mxu1 %v2553_v15  ;;  %3006 = vmatmul.mubr.bf16.gmra.mrb[216].mxu0 %v2555_v41  ;;  %v2505_v13 = vmax.f32 %v2304_v49, 0.0  ;;  %v2507_v59 = vmax.f32 %v2427_v17, 0.0 }
 0x2fa   : > { %v2310_v35 = vadd.f32 %v2309_v55, %v5903_v20  ;;  %v2433_v47 = vadd.f32 %v2432_v39, %v5905_v27  ;;  %v2506_v43 = vmax.f32 %v2306_v44, 0.0  ;;  %v2508_v37 = vmax.f32 %v2429_v48, 0.0 }
 0x2fb   : > { %v2509_v54 = vmax.f32 %v2308_v22, 0.0  ;;  %v2511_v50 = vmax.f32 %v2431_v10, 0.0 }
 0x2fc   : > { %v2510_v52 = vmax.f32 %v2310_v35, 0.0  ;;  %v2512_v33 = vmax.f32 %v2433_v47, 0.0 }
 0x2fd   : > { %v2557_v53 = vpack.c.bf16 %v2509_v54, %v2505_v13  ;;  %v2559_v40 = vpack.c.bf16 %v2511_v50, %v2507_v59 }
 0x2fe   : > { %v2558_v23 = vpack.c.bf16 %v2510_v52, %v2506_v43  ;;  %v2560_v38 = vpack.c.bf16 %v2512_v33, %v2508_v37  ;;  %v2313_v28 = vpop.f32.mrb[184].mxu1  ;;  %v2436_v7 = vpop.f32.mrb[188].mxu0 }
 0x2ff   : > { %v2314_v32 = vadd.f32 %v2313_v28, %v5899_v61  ;;  %v2437_v34 = vadd.f32 %v2436_v7, %v5901_v45  ;;  %v2315_v36 = vpop.f32.mrb[185].mxu1  ;;  %v2438_v18 = vpop.f32.mrb[189].mxu0 }
 0x300   : > { %v2316_v31 = vadd.f32 %v2315_v36, %v5903_v20  ;;  %v2439_v30 = vadd.f32 %v2438_v18, %v5905_v27  ;;  %v2317_v60 = vpop.f32.mrb[186].mxu1  ;;  %v2440_v46 = vpop.f32.mrb[190].mxu0  ;;  %2908 = vmatprep.mubr.bf16.mxu1 %v2558_v23  ;;  %3013 = vmatprep.mubr.bf16.mxu0 %v2560_v38 }
 0x301   : > { %v2318_v24 = vadd.f32 %v2317_v60, %v5899_v61  ;;  %v2441_v26 = vadd.f32 %v2440_v46, %v5901_v45  ;;  %v2319_v29 = vpop.f32.mrb[187].mxu1  ;;  %v2442_v25 = vpop.f32.mrb[191].mxu0  ;;  %2909 = vmatmul.mubr.bf16.gmra.mrb[216].mxu1 %v2557_v53  ;;  %3014 = vmatmul.mubr.bf16.gmra.mrb[220].mxu0 %v2559_v40  ;;  %v2513_v19 = vmax.f32 %v2314_v32, 0.0  ;;  %v2515_v16 = vmax.f32 %v2437_v34, 0.0 }
 0x302   : > { %v2320_v12 = vadd.f32 %v2319_v29, %v5903_v20  ;;  %v2443_v58 = vadd.f32 %v2442_v25, %v5905_v27  ;;  %v2514_v42 = vmax.f32 %v2316_v31, 0.0  ;;  %v2516_v2 = vmax.f32 %v2439_v30, 0.0 }
 0x303   : > { %v2517_v56 = vmax.f32 %v2318_v24, 0.0  ;;  %v2519_v62 = vmax.f32 %v2441_v26, 0.0 }
 0x304   : > { %v2518_v51 = vmax.f32 %v2320_v12, 0.0  ;;  %v2520_v63 = vmax.f32 %v2443_v58, 0.0 }
 0x305   : > { %v2561_v1 = vpack.c.bf16 %v2517_v56, %v2513_v19  ;;  %v2563_v11 = vpack.c.bf16 %v2519_v62, %v2515_v16 }
 0x306   : > { %v2562_v0 = vpack.c.bf16 %v2518_v51, %v2514_v42  ;;  %v2564_v6 = vpack.c.bf16 %v2520_v63, %v2516_v2  ;;  %v2323_v15 = vpop.f32.mrb[188].mxu1  ;;  %v2446_v41 = vpop.f32.mrb[192].mxu0 }
 0x307   : > { %v2324_v14 = vadd.f32 %v2323_v15, %v5899_v61  ;;  %v2447_v3 = vadd.f32 %v2446_v41, %v5901_v45  ;;  %v2325_v57 = vpop.f32.mrb[189].mxu1  ;;  %v2448_v5 = vpop.f32.mrb[193].mxu0 }
 0x308   : > { %v2326_v49 = vadd.f32 %v2325_v57, %v5903_v20  ;;  %v2449_v17 = vadd.f32 %v2448_v5, %v5905_v27  ;;  %v2327_v8 = vpop.f32.mrb[190].mxu1  ;;  %v2450_v21 = vpop.f32.mrb[194].mxu0  ;;  %2916 = vmatprep.mubr.bf16.mxu1 %v2562_v0  ;;  %3021 = vmatprep.mubr.bf16.mxu0 %v2564_v6 }
 0x309   : > { %v2328_v44 = vadd.f32 %v2327_v8, %v5899_v61  ;;  %v2451_v48 = vadd.f32 %v2450_v21, %v5901_v45  ;;  %v2329_v4 = vpop.f32.mrb[191].mxu1  ;;  %v2452_v9 = vpop.f32.mrb[195].mxu0  ;;  %2917 = vmatmul.mubr.bf16.gmra.mrb[220].mxu1 %v2561_v1  ;;  %3022 = vmatmul.mubr.bf16.gmra.mrb[224].mxu0 %v2563_v11  ;;  %v2521_v55 = vmax.f32 %v2324_v14, 0.0  ;;  %v2523_v39 = vmax.f32 %v2447_v3, 0.0 }
 0x30a   : > { %v2330_v22 = vadd.f32 %v2329_v4, %v5903_v20  ;;  %v2453_v10 = vadd.f32 %v2452_v9, %v5905_v27  ;;  %v2522_v13 = vmax.f32 %v2326_v49, 0.0  ;;  %v2524_v59 = vmax.f32 %v2449_v17, 0.0 }
 0x30b   : > { %v2525_v35 = vmax.f32 %v2328_v44, 0.0  ;;  %v2527_v47 = vmax.f32 %v2451_v48, 0.0 }
 0x30c   : > { %v2526_v54 = vmax.f32 %v2330_v22, 0.0  ;;  %v2528_v50 = vmax.f32 %v2453_v10, 0.0 }
 0x30d   : > { %v2565_v43 = vpack.c.bf16 %v2525_v35, %v2521_v55  ;;  %v2567_v37 = vpack.c.bf16 %v2527_v47, %v2523_v39 }
 0x30e   : > { %v2566_v52 = vpack.c.bf16 %v2526_v54, %v2522_v13  ;;  %v2568_v33 = vpack.c.bf16 %v2528_v50, %v2524_v59  ;;  %v2333_v53 = vpop.f32.mrb[192].mxu1  ;;  %v2456_v40 = vpop.f32.mrb[196].mxu0 }
 0x30f   : > { %v2334_v23 = vadd.f32 %v2333_v53, %v5899_v61  ;;  %v2457_v38 = vadd.f32 %v2456_v40, %v5901_v45  ;;  %v2335_v28 = vpop.f32.mrb[193].mxu1  ;;  %v2458_v7 = vpop.f32.mrb[197].mxu0 }
 0x310   : > { %v2336_v32 = vadd.f32 %v2335_v28, %v5903_v20  ;;  %v2459_v34 = vadd.f32 %v2458_v7, %v5905_v27  ;;  %v2337_v36 = vpop.f32.mrb[194].mxu1  ;;  %v2460_v18 = vpop.f32.mrb[198].mxu0  ;;  %2924 = vmatprep.mubr.bf16.mxu1 %v2566_v52  ;;  %3029 = vmatprep.mubr.bf16.mxu0 %v2568_v33 }
 0x311   : > { %v2338_v31 = vadd.f32 %v2337_v36, %v5899_v61  ;;  %v2461_v30 = vadd.f32 %v2460_v18, %v5901_v45  ;;  %v2339_v60 = vpop.f32.mrb[195].mxu1  ;;  %v2462_v46 = vpop.f32.mrb[199].mxu0  ;;  %2925 = vmatmul.mubr.bf16.gmra.mrb[224].mxu1 %v2565_v43  ;;  %3030 = vmatmul.mubr.bf16.gmra.mrb[228].mxu0 %v2567_v37  ;;  %v2529_v29 = vmax.f32 %v2334_v23, 0.0  ;;  %v2531_v25 = vmax.f32 %v2457_v38, 0.0 }
 0x312   : > { %v2340_v24 = vadd.f32 %v2339_v60, %v5903_v20  ;;  %v2463_v26 = vadd.f32 %v2462_v46, %v5905_v27  ;;  %v2530_v19 = vmax.f32 %v2336_v32, 0.0  ;;  %v2532_v16 = vmax.f32 %v2459_v34, 0.0  ;;  %v5982_v27 = vld [vmem:[%s6201_s6] ss:$0 sm:$0xff] }
 0x313   : > { %v2533_v12 = vmax.f32 %v2338_v31, 0.0  ;;  %v2535_v58 = vmax.f32 %v2461_v30, 0.0 }
 0x314   : > { %v2534_v56 = vmax.f32 %v2340_v24, 0.0  ;;  %v2536_v62 = vmax.f32 %v2463_v26, 0.0 }
 0x315   : > { %v2569_v42 = vpack.c.bf16 %v2533_v12, %v2529_v29  ;;  %v2571_v61 = vpack.c.bf16 %v2535_v58, %v2531_v25 }
 0x316   : > { %v2570_v2 = vpack.c.bf16 %v2534_v56, %v2530_v19  ;;  %v2572_v45 = vpack.c.bf16 %v2536_v62, %v2532_v16 }
 0x318   : > { %2932 = vmatprep.mubr.bf16.mxu1 %v2570_v2  ;;  %3037 = vmatprep.mubr.bf16.mxu0 %v2572_v45 }
 0x319   : > { %2933 = vmatmul.mubr.bf16.gmra.mrb[228].mxu1 %v2569_v42  ;;  %3038 = vmatmul.mubr.bf16.gmra.mrb[232].mxu0 %v2571_v61 }
 0x3ac   : > { %v3937_v51 = vpop.f32.mrb[196].mxu1  ;;  %v4007_v20 = vpop.f32.mrb[200].mxu0 }
 0x3ad   : > { %v3938_v63 = vpop.f32.mrb[197].mxu1  ;;  %v4008_v1 = vpop.f32.mrb[201].mxu0 }
 0x3ae   : > { %v3939_v11 = vadd.f32 %v3938_v63, %v3937_v51  ;;  %v4009_v0 = vadd.f32 %v4008_v1, %v4007_v20  ;;  %v3940_v6 = vpop.f32.mrb[198].mxu1  ;;  %v4010_v15 = vpop.f32.mrb[202].mxu0 }
 0x3af   : > { %v3941_v41 = vpop.f32.mrb[199].mxu1  ;;  %v4011_v14 = vpop.f32.mrb[203].mxu0 }
 0x3b0   : > { %v2871_v3 = vadd.f32 %v3939_v11, %v5982_v27  ;;  %v3942_v57 = vadd.f32 %v3941_v41, %v3940_v6  ;;  %v4012_v5 = vadd.f32 %v4011_v14, %v4010_v15 }
 0x3b2   : > { %v2976_v49 = vadd.f32 %v4009_v0, %v2871_v3  ;;  %v2874_v17 = vadd.f32 %v3942_v57, %v5982_v27 }
 0x3b4   : > { %v3046_v8 = vsub.f32 0.0, %v2976_v49  ;;  %v2979_v21 = vadd.f32 %v4012_v5, %v2874_v17  ;;  %v3943_v44 = vpop.f32.mrb[200].mxu1  ;;  %v4013_v48 = vpop.f32.mrb[204].mxu0 }
 0x3b5   : > { %v3944_v4 = vpop.f32.mrb[201].mxu1  ;;  %v4014_v9 = vpop.f32.mrb[205].mxu0 }
 0x3b6   : > { %v3064_v22 = vmul.f32 1.442695, %v3046_v8  ;;  %v3047_v10 = vsub.f32 0.0, %v2979_v21  ;;  %v3945_v55 = vadd.f32 %v3944_v4, %v3943_v44  ;;  %v4015_v39 = vadd.f32 %v4014_v9, %v4013_v48  ;;  %v3946_v35 = vpop.f32.mrb[202].mxu1  ;;  %v4016_v47 = vpop.f32.mrb[206].mxu0 }
 0x3b7   : > { %v3947_v13 = vpop.f32.mrb[203].mxu1  ;;  %v4017_v59 = vpop.f32.mrb[207].mxu0 }
 0x3b8   : > { %4595 = vpow2.f32 %v3064_v22  ;;  %v3066_v54 = vmul.f32 1.442695, %v3047_v10  ;;  %v2879_v50 = vadd.f32 %v3945_v55, %v5982_v27  ;;  %v3948_v43 = vadd.f32 %v3947_v13, %v3946_v35 }
 0x3b9   : > { %v4018_v37 = vadd.f32 %v4017_v59, %v4016_v47 }
 0x3ba   : > { %4597 = vpow2.f32 %v3066_v54  ;;  %v2984_v52 = vadd.f32 %v4015_v39, %v2879_v50  ;;  %v2882_v33 = vadd.f32 %v3948_v43, %v5982_v27 }
 0x3bc   : > { %v3048_v53 = vsub.f32 0.0, %v2984_v52  ;;  %v2987_v40 = vadd.f32 %v4018_v37, %v2882_v33  ;;  %v3949_v23 = vpop.f32.mrb[204].mxu1  ;;  %v4019_v38 = vpop.f32.mrb[208].mxu0 }
 0x3bd   : > { %v3950_v28 = vpop.f32.mrb[205].mxu1  ;;  %v4020_v7 = vpop.f32.mrb[209].mxu0 }
 0x3be   : > { %v3068_v32 = vmul.f32 1.442695, %v3048_v53  ;;  %v3049_v34 = vsub.f32 0.0, %v2987_v40  ;;  %v3951_v36 = vadd.f32 %v3950_v28, %v3949_v23  ;;  %v4021_v18 = vadd.f32 %v4020_v7, %v4019_v38  ;;  %v3952_v31 = vpop.f32.mrb[206].mxu1  ;;  %v4022_v30 = vpop.f32.mrb[210].mxu0 }
 0x3bf   : > { %v3953_v60 = vpop.f32.mrb[207].mxu1  ;;  %v4023_v46 = vpop.f32.mrb[211].mxu0 }
 0x3c0   : > { %4599 = vpow2.f32 %v3068_v32  ;;  %v3070_v24 = vmul.f32 1.442695, %v3049_v34  ;;  %v2887_v26 = vadd.f32 %v3951_v36, %v5982_v27  ;;  %v3954_v29 = vadd.f32 %v3953_v60, %v3952_v31 }
 0x3c1   : > { %v4024_v25 = vadd.f32 %v4023_v46, %v4022_v30 }
 0x3c2   : > { %v4596_v12 = vpop.eup %4595  ;;  %4601 = vpow2.f32 %v3070_v24  ;;  %v2992_v58 = vadd.f32 %v4021_v18, %v2887_v26  ;;  %v2890_v19 = vadd.f32 %v3954_v29, %v5982_v27 }
 0x3c3   : > { %v3100_v16 = vadd.f32 1.0, %v4596_v12 }
 0x3c4   : > { %v4598_v56 = vpop.eup %4597  ;;  %v3050_v62 = vsub.f32 0.0, %v2992_v58  ;;  %v2995_v42 = vadd.f32 %v4024_v25, %v2890_v19  ;;  %v3955_v61 = vpop.f32.mrb[208].mxu1 }
 0x3c5   : > { %v4025_v2 = vpop.f32.mrb[212].mxu0  ;;  %4603 = vrcp.f32 %v3100_v16  ;;  %v3101_v45 = vadd.f32 1.0, %v4598_v56  ;;  %v3956_v51 = vpop.f32.mrb[209].mxu1 }
 0x3c6   : > { %v4026_v20 = vpop.f32.mrb[213].mxu0  ;;  %v3072_v63 = vmul.f32 1.442695, %v3050_v62  ;;  %v3051_v1 = vsub.f32 0.0, %v2995_v42  ;;  %v3957_v11 = vadd.f32 %v3956_v51, %v3955_v61  ;;  %v3958_v6 = vpop.f32.mrb[210].mxu1 }
 0x3c7   : > { %v4027_v0 = vadd.f32 %v4026_v20, %v4025_v2  ;;  %v4028_v15 = vpop.f32.mrb[214].mxu0  ;;  %v3959_v41 = vpop.f32.mrb[211].mxu1 }
 0x3c8   : > { %v4029_v14 = vpop.f32.mrb[215].mxu0  ;;  %4605 = vpow2.f32 %v3072_v63  ;;  %v3074_v3 = vmul.f32 1.442695, %v3051_v1  ;;  %v2895_v57 = vadd.f32 %v3957_v11, %v5982_v27  ;;  %v3960_v5 = vadd.f32 %v3959_v41, %v3958_v6 }
 0x3c9   : > { %4607 = vrcp.f32 %v3101_v45  ;;  %v4030_v49 = vadd.f32 %v4029_v14, %v4028_v15 }
 0x3ca   : > { %v4600_v17 = vpop.eup %4599  ;;  %4609 = vpow2.f32 %v3074_v3  ;;  %v3000_v8 = vadd.f32 %v4027_v0, %v2895_v57  ;;  %v2898_v21 = vadd.f32 %v3960_v5, %v5982_v27 }
 0x3cb   : > { %v3102_v44 = vadd.f32 1.0, %v4600_v17 }
 0x3cc   : > { %v4602_v48 = vpop.eup %4601  ;;  %v3052_v4 = vsub.f32 0.0, %v3000_v8  ;;  %v3003_v9 = vadd.f32 %v4030_v49, %v2898_v21  ;;  %v3961_v22 = vpop.f32.mrb[212].mxu1 }
 0x3cd   : > { %v4031_v10 = vpop.f32.mrb[216].mxu0  ;;  %4611 = vrcp.f32 %v3102_v44  ;;  %v3103_v55 = vadd.f32 1.0, %v4602_v48  ;;  %v3962_v39 = vpop.f32.mrb[213].mxu1 }
 0x3ce   : > { %v4032_v35 = vpop.f32.mrb[217].mxu0  ;;  %v3076_v47 = vmul.f32 1.442695, %v3052_v4  ;;  %v3053_v13 = vsub.f32 0.0, %v3003_v9  ;;  %v3963_v59 = vadd.f32 %v3962_v39, %v3961_v22  ;;  %v3964_v50 = vpop.f32.mrb[214].mxu1 }
 0x3cf   : > { %v4033_v54 = vadd.f32 %v4032_v35, %v4031_v10  ;;  %v4034_v43 = vpop.f32.mrb[218].mxu0  ;;  %v5992_v37 = vpop.eup %4603 }
 0x3d0   : > { %v3965_v52 = vpop.f32.mrb[215].mxu1  ;;  %v4035_v33 = vpop.f32.mrb[219].mxu0  ;;  %4613 = vpow2.f32 %v3076_v47  ;;  %v3078_v53 = vmul.f32 1.442695, %v3053_v13  ;;  %v2903_v40 = vadd.f32 %v3963_v59, %v5982_v27  ;;  %3172 = vrot.lane.b32.xlu0 %v5992_v37, %s4786_s9 }
 0x3d1   : > { %v3966_v23 = vadd.f32 %v3965_v52, %v3964_v50  ;;  %4615 = vrcp.f32 %v3103_v55  ;;  %v4036_v38 = vadd.f32 %v4035_v33, %v4034_v43 }
 0x3d2   : > { %v4606_v28 = vpop.eup %4605  ;;  %4617 = vpow2.f32 %v3078_v53  ;;  %v3008_v7 = vadd.f32 %v4033_v54, %v2903_v40 }
 0x3d3   : > { %v2906_v32 = vadd.f32 %v3966_v23, %v5982_v27  ;;  %v5998_v34 = vpop.eup %4607  ;;  %v3104_v36 = vadd.f32 1.0, %v4606_v28 }
 0x3d4   : > { %v4610_v18 = vpop.eup %4609  ;;  %v3054_v31 = vsub.f32 0.0, %v3008_v7  ;;  %v3967_v60 = vpop.f32.mrb[216].mxu1  ;;  %3174 = vrot.lane.b32.xlu0 %v5998_v34, %s4786_s9 }
 0x3d5   : > { %v3011_v30 = vadd.f32 %v4036_v38, %v2906_v32  ;;  %v4037_v46 = vpop.f32.mrb[220].mxu0  ;;  %4619 = vrcp.f32 %v3104_v36  ;;  %v3105_v24 = vadd.f32 1.0, %v4610_v18  ;;  %v3968_v26 = vpop.f32.mrb[217].mxu1 }
 0x3d6   : > { %v4038_v29 = vpop.f32.mrb[221].mxu0  ;;  %v3080_v25 = vmul.f32 1.442695, %v3054_v31  ;;  %v3969_v58 = vadd.f32 %v3968_v26, %v3967_v60  ;;  %v3970_v16 = vpop.f32.mrb[218].mxu1 }
 0x3d7   : > { %v3055_v12 = vsub.f32 0.0, %v3011_v30  ;;  %v4039_v19 = vadd.f32 %v4038_v29, %v4037_v46  ;;  %v4040_v56 = vpop.f32.mrb[222].mxu0  ;;  %v6002_v62 = vpop.eup %4611  ;;  %4621 = vrcp.f32 %v3105_v24 }
 0x3d8   : > { %v3971_v42 = vpop.f32.mrb[219].mxu1  ;;  %v4041_v61 = vpop.f32.mrb[223].mxu0  ;;  %4623 = vpow2.f32 %v3080_v25  ;;  %v2911_v45 = vadd.f32 %v3969_v58, %v5982_v27  ;;  %3176 = vrot.lane.b32.xlu1 %v6002_v62, %s4786_s9 }
 0x3d9   : > { %v3082_v2 = vmul.f32 1.442695, %v3055_v12  ;;  %v3972_v51 = vadd.f32 %v3971_v42, %v3970_v16  ;;  %v4042_v20 = vadd.f32 %v4041_v61, %v4040_v56 }
 0x3da   : > { %v4614_v63 = vpop.eup %4613  ;;  %v3016_v1 = vadd.f32 %v4039_v19, %v2911_v45 }
 0x3db   : > { %4625 = vpow2.f32 %v3082_v2  ;;  %v2914_v11 = vadd.f32 %v3972_v51, %v5982_v27  ;;  %v6008_v0 = vpop.eup %4615  ;;  %v3106_v6 = vadd.f32 1.0, %v4614_v63 }
 0x3dc   : > { %v4618_v15 = vpop.eup %4617  ;;  %v3056_v41 = vsub.f32 0.0, %v3016_v1  ;;  %v3973_v3 = vpop.f32.mrb[220].mxu1  ;;  %3178 = vrot.lane.b32.xlu1 %v6008_v0, %s4786_s9 }
 0x3dd   : > { %v3019_v14 = vadd.f32 %v4042_v20, %v2914_v11  ;;  %v4043_v57 = vpop.f32.mrb[224].mxu0  ;;  %4627 = vrcp.f32 %v3106_v6  ;;  %v3107_v5 = vadd.f32 1.0, %v4618_v15  ;;  %v3974_v49 = vpop.f32.mrb[221].mxu1 }
 0x3de   : > { %v4044_v17 = vpop.f32.mrb[225].mxu0  ;;  %v3084_v8 = vmul.f32 1.442695, %v3056_v41  ;;  %v3975_v44 = vadd.f32 %v3974_v49, %v3973_v3  ;;  %v3976_v4 = vpop.f32.mrb[222].mxu1 }
 0x3df   : > { %v3057_v21 = vsub.f32 0.0, %v3019_v14  ;;  %v4045_v48 = vadd.f32 %v4044_v17, %v4043_v57  ;;  %v4046_v9 = vpop.f32.mrb[226].mxu0  ;;  %v6012_v22 = vpop.eup %4619  ;;  %4629 = vrcp.f32 %v3107_v5 }
 0x3e0   : > { %v3977_v10 = vpop.f32.mrb[223].mxu1  ;;  %v4047_v55 = vpop.f32.mrb[227].mxu0  ;;  %4631 = vpow2.f32 %v3084_v8  ;;  %v2919_v35 = vadd.f32 %v3975_v44, %v5982_v27  ;;  %3180 = vrot.lane.b32.xlu0 %v6012_v22, %s4786_s9 }
 0x3e1   : > { %v3086_v39 = vmul.f32 1.442695, %v3057_v21  ;;  %v3978_v47 = vadd.f32 %v3977_v10, %v3976_v4  ;;  %v6017_v13 = vpop.eup %4621  ;;  %v4048_v59 = vadd.f32 %v4047_v55, %v4046_v9 }
 0x3e2   : > { %v4624_v54 = vpop.eup %4623  ;;  %v3024_v50 = vadd.f32 %v4045_v48, %v2919_v35  ;;  %3182 = vrot.lane.b32.xlu1 %v6017_v13, %s4786_s9 }
 0x3e3   : > { %4633 = vpow2.f32 %v3086_v39  ;;  %v2922_v43 = vadd.f32 %v3978_v47, %v5982_v27  ;;  %v3108_v52 = vadd.f32 1.0, %v4624_v54 }
 0x3e4   : > { %v3058_v53 = vsub.f32 0.0, %v3024_v50  ;;  %v3979_v23 = vpop.f32.mrb[224].mxu1  ;;  %v4049_v38 = vpop.f32.mrb[228].mxu0 }
 0x3e5   : > { %v4626_v33 = vpop.eup %4625  ;;  %v3027_v40 = vadd.f32 %v4048_v59, %v2922_v43  ;;  %4635 = vrcp.f32 %v3108_v52  ;;  %v3980_v7 = vpop.f32.mrb[225].mxu1 }
 0x3e6   : > { %v3109_v28 = vadd.f32 1.0, %v4626_v33  ;;  %v4050_v32 = vpop.f32.mrb[229].mxu0  ;;  %v3088_v36 = vmul.f32 1.442695, %v3058_v53  ;;  %v3981_v31 = vadd.f32 %v3980_v7, %v3979_v23  ;;  %v3982_v60 = vpop.f32.mrb[226].mxu1 }
 0x3e7   : > { %v3059_v18 = vsub.f32 0.0, %v3027_v40  ;;  %v4051_v30 = vadd.f32 %v4050_v32, %v4049_v38  ;;  %v4052_v46 = vpop.f32.mrb[230].mxu0  ;;  %v6022_v24 = vpop.eup %4627 }
 0x3e8   : > { %4637 = vrcp.f32 %v3109_v28  ;;  %v3983_v26 = vpop.f32.mrb[227].mxu1  ;;  %v4053_v29 = vpop.f32.mrb[231].mxu0  ;;  %v2927_v12 = vadd.f32 %v3981_v31, %v5982_v27  ;;  %3184 = vrot.lane.b32.xlu0 %v6022_v24, %s4786_s9 }
 0x3e9   : > { %4639 = vpow2.f32 %v3088_v36  ;;  %v3090_v25 = vmul.f32 1.442695, %v3059_v18  ;;  %v3984_v58 = vadd.f32 %v3983_v26, %v3982_v60  ;;  %v6027_v19 = vpop.eup %4629  ;;  %v4054_v16 = vadd.f32 %v4053_v29, %v4052_v46 }
 0x3ea   : > { %v4632_v56 = vpop.eup %4631  ;;  %v3032_v42 = vadd.f32 %v4051_v30, %v2927_v12  ;;  %3186 = vrot.lane.b32.xlu1 %v6027_v19, %s4786_s9 }
 0x3eb   : > { %4641 = vpow2.f32 %v3090_v25  ;;  %v2930_v61 = vadd.f32 %v3984_v58, %v5982_v27  ;;  %v3110_v2 = vadd.f32 1.0, %v4632_v56 }
 0x3ec   : > { %v3060_v51 = vsub.f32 0.0, %v3032_v42  ;;  %v3985_v63 = vpop.f32.mrb[228].mxu1  ;;  %v4055_v1 = vpop.f32.mrb[232].mxu0 }
 0x3ed   : > { %v4634_v45 = vpop.eup %4633  ;;  %v3035_v20 = vadd.f32 %v4054_v16, %v2930_v61  ;;  %4643 = vrcp.f32 %v3110_v2  ;;  %v3986_v6 = vpop.f32.mrb[229].mxu1 }
 0x3ee   : > { %v3111_v11 = vadd.f32 1.0, %v4634_v45  ;;  %v4056_v15 = vpop.f32.mrb[233].mxu0  ;;  %v3092_v41 = vmul.f32 1.442695, %v3060_v51  ;;  %v3987_v3 = vadd.f32 %v3986_v6, %v3985_v63  ;;  %v3988_v5 = vpop.f32.mrb[230].mxu1 }
 0x3ef   : > { %v3061_v14 = vsub.f32 0.0, %v3035_v20  ;;  %v4057_v57 = vadd.f32 %v4056_v15, %v4055_v1  ;;  %v4058_v49 = vpop.f32.mrb[234].mxu0  ;;  %v6032_v17 = vpop.eup %4635 }
 0x3f0   : > { %4645 = vrcp.f32 %v3111_v11  ;;  %v3989_v8 = vpop.f32.mrb[231].mxu1  ;;  %v4059_v21 = vpop.f32.mrb[235].mxu0  ;;  %v2935_v48 = vadd.f32 %v3987_v3, %v5982_v27  ;;  %3188 = vrot.lane.b32.xlu0 %v6032_v17, %s4786_s9 }
 0x3f1   : > { %4647 = vpow2.f32 %v3092_v41  ;;  %v3094_v44 = vmul.f32 1.442695, %v3061_v14  ;;  %v3990_v4 = vadd.f32 %v3989_v8, %v3988_v5  ;;  %v4060_v10 = vadd.f32 %v4059_v21, %v4058_v49 }
 0x3f2   : > { %v6037_v9 = vpop.eup %4637  ;;  %v3040_v39 = vadd.f32 %v4057_v57, %v2935_v48 }
 0x3f3   : > { %v4640_v55 = vpop.eup %4639  ;;  %4649 = vpow2.f32 %v3094_v44  ;;  %v2938_v35 = vadd.f32 %v3990_v4, %v5982_v27  ;;  %3190 = vrot.lane.b32.xlu1 %v6037_v9, %s4786_s9 }
 0x3f4   : > { %v3112_v47 = vadd.f32 1.0, %v4640_v55  ;;  %v3062_v54 = vsub.f32 0.0, %v3040_v39 }
 0x3f5   : > { %v4642_v59 = vpop.eup %4641  ;;  %v3043_v50 = vadd.f32 %v4060_v10, %v2938_v35 }
 0x3f6   : > { %4651 = vrcp.f32 %v3112_v47  ;;  %v3113_v43 = vadd.f32 1.0, %v4642_v59  ;;  %v3096_v52 = vmul.f32 1.442695, %v3062_v54 }
 0x3f7   : > { %v3063_v33 = vsub.f32 0.0, %v3043_v50  ;;  %v6042_v53 = vpop.eup %4643 }
 0x3f8   : > { %4653 = vrcp.f32 %v3113_v43  ;;  %3192 = vrot.lane.b32.xlu0 %v6042_v53, %s4786_s9 }
 0x3f9   : > { %4655 = vpow2.f32 %v3096_v52  ;;  %v3098_v40 = vmul.f32 1.442695, %v3063_v33 }
 0x3fa   : > { %v6046_v27 = vpop.eup %4645 }
 0x3fb   : > { %v4648_v23 = vpop.eup %4647  ;;  %4657 = vpow2.f32 %v3098_v40  ;;  %3194 = vrot.lane.b32.xlu1 %v6046_v27, %s4786_s9 }
 0x3fc   : > { %v3114_v38 = vadd.f32 1.0, %v4648_v23 }
 0x3fd   : > { %v4650_v28 = vpop.eup %4649 }
 0x3fe   : > { %4659 = vrcp.f32 %v3114_v38  ;;  %v3115_v7 = vadd.f32 1.0, %v4650_v28 }
 0x400   : > { %v6050_v32 = vpop.eup %4651  ;;  %4661 = vrcp.f32 %v3115_v7 }
 0x401   : > { %3196 = vrot.lane.b32.xlu0 %v6050_v32, %s4786_s9 }
 0x402   : > { %v6054_v36 = vpop.eup %4653 }
 0x403   : > { %v4656_v18 = vpop.eup %4655  ;;  %3198 = vrot.lane.b32.xlu1 %v6054_v36, %s4786_s9 }
 0x404   : > { %v3116_v31 = vadd.f32 1.0, %v4656_v18 }
 0x405   : > { %v4658_v30 = vpop.eup %4657 }
 0x406   : > { %4663 = vrcp.f32 %v3116_v31  ;;  %v3117_v60 = vadd.f32 1.0, %v4658_v30 }
 0x408   : > { %v6058_v46 = vpop.eup %4659  ;;  %4665 = vrcp.f32 %v3117_v60 }
 0x409   : > { %3200 = vrot.lane.b32.xlu0 %v6058_v46, %s4786_s9 }
 0x40a   : > { %v6062_v26 = vpop.eup %4661 }
 0x40b   : > { %3202 = vrot.lane.b32.xlu1 %v6062_v26, %s4786_s9 }
 0x410   : > { %v6066_v29 = vpop.eup %4663 }
 0x411   : > { %3204 = vrot.lane.b32.xlu0 %v6066_v29, %s4786_s9 }
 0x412   : > { %v6070_v25 = vpop.eup %4665 }
 0x413   : > { %3206 = vrot.lane.b32.xlu1 %v6070_v25, %s4786_s9 }
 0x442   : > { %v3173_v12 = vpop.permute.xlu0 %3172 }
 0x443   : > { %v3226_v58 = vsub.f32 %v5992_v37, %v3173_v12 }
 0x445   : > { %v3244_v16 = vmul.f32 -50.0, %v3226_v58 }
 0x446   : > { %v3175_v56 = vpop.permute.xlu0 %3174 }
 0x447   : > { %v3262_v42 = vmul.f32 1.442695, %v3244_v16  ;;  %v3227_v61 = vsub.f32 %v5998_v34, %v3175_v56 }
 0x449   : > { %4667 = vpow2.f32 %v3262_v42  ;;  %v3245_v2 = vmul.f32 -50.0, %v3227_v61 }
 0x44a   : > { %v3177_v45 = vpop.permute.xlu1 %3176 }
 0x44b   : > { %v3264_v51 = vmul.f32 1.442695, %v3245_v2  ;;  %v3228_v20 = vsub.f32 %v6002_v62, %v3177_v45 }
 0x44d   : > { %4669 = vpow2.f32 %v3264_v51  ;;  %v3246_v63 = vmul.f32 -50.0, %v3228_v20 }
 0x44e   : > { %v3179_v1 = vpop.permute.xlu1 %3178 }
 0x44f   : > { %v3266_v11 = vmul.f32 1.442695, %v3246_v63  ;;  %v3229_v6 = vsub.f32 %v6008_v0, %v3179_v1 }
 0x451   : > { %4671 = vpow2.f32 %v3266_v11  ;;  %v3247_v15 = vmul.f32 -50.0, %v3229_v6 }
 0x452   : > { %v3181_v41 = vpop.permute.xlu0 %3180 }
 0x453   : > { %v4668_v14 = vpop.eup %4667  ;;  %v3268_v3 = vmul.f32 1.442695, %v3247_v15  ;;  %v3230_v57 = vsub.f32 %v6012_v22, %v3181_v41 }
 0x454   : > { %v3298_v5 = vadd.f32 1.0, %v4668_v14  ;;  %v3183_v49 = vpop.permute.xlu1 %3182 }
 0x455   : > { %4673 = vpow2.f32 %v3268_v3  ;;  %v3248_v8 = vmul.f32 -50.0, %v3230_v57  ;;  %v3231_v21 = vsub.f32 %v6017_v13, %v3183_v49 }
 0x456   : > { %4675 = vrcp.f32 %v3298_v5 }
 0x457   : > { %v4670_v44 = vpop.eup %4669  ;;  %v3270_v48 = vmul.f32 1.442695, %v3248_v8  ;;  %v3249_v4 = vmul.f32 -50.0, %v3231_v21 }
 0x458   : > { %v3299_v10 = vadd.f32 1.0, %v4670_v44 }
 0x459   : > { %4677 = vpow2.f32 %v3270_v48  ;;  %v3272_v55 = vmul.f32 1.442695, %v3249_v4 }
 0x45a   : > { %4679 = vrcp.f32 %v3299_v10  ;;  %v3185_v39 = vpop.permute.xlu0 %3184 }
 0x45b   : > { %v4672_v35 = vpop.eup %4671  ;;  %4681 = vpow2.f32 %v3272_v55  ;;  %v3232_v47 = vsub.f32 %v6022_v24, %v3185_v39 }
 0x45c   : > { %v3300_v59 = vadd.f32 1.0, %v4672_v35  ;;  %v3187_v54 = vpop.permute.xlu1 %3186 }
 0x45d   : > { %v3250_v50 = vmul.f32 -50.0, %v3232_v47  ;;  %v3233_v43 = vsub.f32 %v6027_v19, %v3187_v54 }
 0x45e   : > { %4683 = vrcp.f32 %v3300_v59 }
 0x45f   : > { %v4674_v52 = vpop.eup %4673  ;;  %v3274_v33 = vmul.f32 1.442695, %v3250_v50  ;;  %v3251_v40 = vmul.f32 -50.0, %v3233_v43 }
 0x460   : > { %v3301_v23 = vadd.f32 1.0, %v4674_v52  ;;  %v4676_v28 = vpop.eup %4675 }
 0x461   : > { %4685 = vpow2.f32 %v3274_v33  ;;  %v3276_v38 = vmul.f32 1.442695, %v3251_v40 }
 0x462   : > { %4687 = vrcp.f32 %v3301_v23  ;;  %v3189_v7 = vpop.permute.xlu0 %3188 }
 0x463   : > { %v4678_v18 = vpop.eup %4677  ;;  %4689 = vpow2.f32 %v3276_v38  ;;  %v3234_v31 = vsub.f32 %v6032_v17, %v3189_v7 }
 0x464   : > { %v4680_v30 = vpop.eup %4679  ;;  %v3302_v60 = vadd.f32 1.0, %v4678_v18 }
 0x465   : > { %v3191_v12 = vpop.permute.xlu1 %3190  ;;  %v4682_v58 = vpop.eup %4681  ;;  %v3252_v16 = vmul.f32 -50.0, %v3234_v31  ;;  %v4452_v42 = vpack.i.bf16 %v4680_v30, %v4676_v28 }
 0x466   : > { %v3235_v56 = vsub.f32 %v6037_v9, %v3191_v12  ;;  %v3303_v61 = vadd.f32 1.0, %v4682_v58  ;;  %4691 = vrcp.f32 %v3302_v60 }
 0x467   : > { %v3278_v2 = vmul.f32 1.442695, %v3252_v16  ;;  %4453 = vrot.lane.b32.xlu0 %v4452_v42, %s4787_s10 }
 0x468   : > { %v3253_v45 = vmul.f32 -50.0, %v3235_v56  ;;  %4693 = vrcp.f32 %v3303_v61  ;;  %v4684_v20 = vpop.eup %4683 }
 0x469   : > { %4695 = vpow2.f32 %v3278_v2 }
 0x46a   : > { %v3280_v51 = vmul.f32 1.442695, %v3253_v45  ;;  %v3193_v63 = vpop.permute.xlu0 %3192 }
 0x46b   : > { %v4686_v1 = vpop.eup %4685  ;;  %v3236_v11 = vsub.f32 %v6042_v53, %v3193_v63 }
 0x46c   : > { %4697 = vpow2.f32 %v3280_v51  ;;  %v4688_v6 = vpop.eup %4687  ;;  %v3304_v15 = vadd.f32 1.0, %v4686_v1 }
 0x46d   : > { %v3195_v41 = vpop.permute.xlu1 %3194  ;;  %v4690_v14 = vpop.eup %4689  ;;  %v3254_v3 = vmul.f32 -50.0, %v3236_v11  ;;  %v4457_v5 = vpack.i.bf16 %v4688_v6, %v4684_v20 }
 0x46e   : > { %v3237_v57 = vsub.f32 %v6046_v27, %v3195_v41  ;;  %v3305_v49 = vadd.f32 1.0, %v4690_v14  ;;  %4699 = vrcp.f32 %v3304_v15 }
 0x46f   : > { %v3282_v8 = vmul.f32 1.442695, %v3254_v3  ;;  %4458 = vrot.lane.b32.xlu1 %v4457_v5, %s4787_s10 }
 0x470   : > { %v3255_v21 = vmul.f32 -50.0, %v3237_v57  ;;  %4701 = vrcp.f32 %v3305_v49  ;;  %v4692_v44 = vpop.eup %4691 }
 0x471   : > { %4703 = vpow2.f32 %v3282_v8 }
 0x472   : > { %v3284_v48 = vmul.f32 1.442695, %v3255_v21  ;;  %v4694_v4 = vpop.eup %4693 }
 0x473   : > { %v3197_v10 = vpop.permute.xlu0 %3196  ;;  %v4696_v55 = vpop.eup %4695  ;;  %v4462_v35 = vpack.i.bf16 %v4694_v4, %v4692_v44 }
 0x474   : > { %4705 = vpow2.f32 %v3284_v48  ;;  %v3238_v39 = vsub.f32 %v6050_v32, %v3197_v10  ;;  %v3306_v47 = vadd.f32 1.0, %v4696_v55 }
 0x475   : > { %v3199_v59 = vpop.permute.xlu1 %3198  ;;  %4463 = vrot.lane.b32.xlu0 %v4462_v35, %s4787_s10 }
 0x476   : > { %v4698_v54 = vpop.eup %4697  ;;  %v3256_v50 = vmul.f32 -50.0, %v3238_v39  ;;  %v3239_v43 = vsub.f32 %v6054_v36, %v3199_v59  ;;  %4707 = vrcp.f32 %v3306_v47 }
 0x477   : > { %v3307_v52 = vadd.f32 1.0, %v4698_v54 }
 0x478   : > { %v3286_v33 = vmul.f32 1.442695, %v3256_v50  ;;  %v3257_v40 = vmul.f32 -50.0, %v3239_v43  ;;  %v4700_v23 = vpop.eup %4699 }
 0x479   : > { %4709 = vrcp.f32 %v3307_v52 }
 0x47a   : > { %4711 = vpow2.f32 %v3286_v33  ;;  %v3288_v38 = vmul.f32 1.442695, %v3257_v40  ;;  %v4702_v28 = vpop.eup %4701 }
 0x47b   : > { %v3201_v7 = vpop.permute.xlu0 %3200  ;;  %v4704_v18 = vpop.eup %4703  ;;  %v4467_v30 = vpack.i.bf16 %v4702_v28, %v4700_v23 }
 0x47c   : > { %4713 = vpow2.f32 %v3288_v38  ;;  %v3240_v31 = vsub.f32 %v6058_v46, %v3201_v7  ;;  %v3308_v60 = vadd.f32 1.0, %v4704_v18 }
 0x47d   : > { %v3203_v12 = vpop.permute.xlu1 %3202  ;;  %4468 = vrot.lane.b32.xlu1 %v4467_v30, %s4787_s10 }
 0x47e   : > { %v4706_v58 = vpop.eup %4705  ;;  %v3258_v16 = vmul.f32 -50.0, %v3240_v31  ;;  %v3241_v56 = vsub.f32 %v6062_v26, %v3203_v12  ;;  %4715 = vrcp.f32 %v3308_v60 }
 0x47f   : > { %v3309_v42 = vadd.f32 1.0, %v4706_v58 }
 0x480   : > { %v3290_v61 = vmul.f32 1.442695, %v3258_v16  ;;  %v3259_v2 = vmul.f32 -50.0, %v3241_v56  ;;  %v4708_v45 = vpop.eup %4707 }
 0x481   : > { %4717 = vrcp.f32 %v3309_v42 }
 0x482   : > { %4719 = vpow2.f32 %v3290_v61  ;;  %v3292_v51 = vmul.f32 1.442695, %v3259_v2 }
 0x483   : > { %v4710_v20 = vpop.eup %4709  ;;  %v3205_v63 = vpop.permute.xlu0 %3204 }
 0x484   : > { %v4712_v1 = vpop.eup %4711  ;;  %4721 = vpow2.f32 %v3292_v51  ;;  %v3242_v11 = vsub.f32 %v6066_v29, %v3205_v63  ;;  %v4472_v6 = vpack.i.bf16 %v4710_v20, %v4708_v45 }
 0x485   : > { %v3310_v15 = vadd.f32 1.0, %v4712_v1  ;;  %v3207_v41 = vpop.permute.xlu1 %3206 }
 0x486   : > { %v4714_v14 = vpop.eup %4713  ;;  %v3260_v3 = vmul.f32 -50.0, %v3242_v11  ;;  %v3243_v57 = vsub.f32 %v6070_v25, %v3207_v41  ;;  %4473 = vrot.lane.b32.xlu0 %v4472_v6, %s4787_s10 }
 0x487   : > { %v3311_v5 = vadd.f32 1.0, %v4714_v14  ;;  %4723 = vrcp.f32 %v3310_v15 }
 0x488   : > { %v3294_v49 = vmul.f32 1.442695, %v3260_v3  ;;  %v3261_v8 = vmul.f32 -50.0, %v3243_v57  ;;  %v4716_v21 = vpop.eup %4715 }
 0x489   : > { %4725 = vrcp.f32 %v3311_v5 }
 0x48a   : > { %4727 = vpow2.f32 %v3294_v49  ;;  %v3296_v44 = vmul.f32 1.442695, %v3261_v8 }
 0x48b   : > { %v4718_v48 = vpop.eup %4717 }
 0x48c   : > { %v4720_v4 = vpop.eup %4719  ;;  %4729 = vpow2.f32 %v3296_v44  ;;  %v4477_v10 = vpack.i.bf16 %v4718_v48, %v4716_v21 }
 0x48d   : > { %v3312_v55 = vadd.f32 1.0, %v4720_v4 }
 0x48e   : > { %v4722_v39 = vpop.eup %4721  ;;  %4478 = vrot.lane.b32.xlu1 %v4477_v10, %s4787_s10 }
 0x48f   : > { %v3313_v35 = vadd.f32 1.0, %v4722_v39  ;;  %4731 = vrcp.f32 %v3312_v55 }
 0x491   : > { %4733 = vrcp.f32 %v3313_v35  ;;  %v4724_v47 = vpop.eup %4723 }
 0x493   : > { %v4726_v59 = vpop.eup %4725 }
 0x494   : > { %v4728_v54 = vpop.eup %4727  ;;  %v4482_v50 = vpack.i.bf16 %v4726_v59, %v4724_v47 }
 0x495   : > { %v3314_v43 = vadd.f32 1.0, %v4728_v54 }
 0x496   : > { %v4730_v52 = vpop.eup %4729  ;;  %4483 = vrot.lane.b32.xlu0 %v4482_v50, %s4787_s10 }
 0x497   : > { %v3315_v33 = vadd.f32 1.0, %v4730_v52  ;;  %4735 = vrcp.f32 %v3314_v43 }
 0x499   : > { %4737 = vrcp.f32 %v3315_v33  ;;  %v4732_v40 = vpop.eup %4731 }
 0x49b   : > { %v4734_v23 = vpop.eup %4733 }
 0x49c   : > { %v4487_v38 = vpack.i.bf16 %v4734_v23, %v4732_v40 }
 0x49e   : > { %4488 = vrot.lane.b32.xlu1 %v4487_v38, %s4787_s10 }
 0x4a1   : > { %v4736_v28 = vpop.eup %4735 }
 0x4a3   : > { %v4738_v7 = vpop.eup %4737 }
 0x4a4   : > { %v4492_v18 = vpack.i.bf16 %v4738_v7, %v4736_v28 }
 0x4a6   : > { %4493 = vrot.lane.b32.xlu0 %v4492_v18, %s4787_s10 }
 0x4d9   : > { %v4454_v31 = vpop.permute.xlu0 %4453 }
 0x4da   : > { %v4456_v30 = vunpack.i.h.bf16 %v4454_v31  ;;  %v4455_v60 = vunpack.i.l.bf16 %v4454_v31 }
 0x4dc   : > { %v3426_v12 = vsel %vm3424_vm9, %v5998_v34, %v4456_v30  ;;  %v3425_v58 = vsel %vm3424_vm9, %v5992_v37, %v4455_v60 }
 0x4dd   : > { %v3814_v16 = vpack.c.bf16 %v3426_v12, %v3426_v12  ;;  %v3813_v56 = vpack.c.bf16 %v3425_v58, %v3425_v58 }
 0x4df   : > { %3517 = vst.msk [vmem:[%s6106_s18 + $0x4] sm:$0xf] %vm3515_vm10, %v3814_v16  ;;  %3516 = vst.msk [vmem:[%s6106_s18] sm:$0xf] %vm3515_vm10, %v3813_v56 }
 0x4e1   : > { %v4459_v42 = vpop.permute.xlu1 %4458 }
 0x4e2   : > { %v4461_v61 = vunpack.i.h.bf16 %v4459_v42  ;;  %v4460_v2 = vunpack.i.l.bf16 %v4459_v42 }
 0x4e4   : > { %v3428_v45 = vsel %vm3424_vm9, %v6008_v0, %v4461_v61  ;;  %v3427_v34 = vsel %vm3424_vm9, %v6002_v62, %v4460_v2 }
 0x4e5   : > { %v3816_v51 = vpack.c.bf16 %v3428_v45, %v3428_v45  ;;  %v3815_v20 = vpack.c.bf16 %v3427_v34, %v3427_v34 }
 0x4e7   : > { %3519 = vst.msk [vmem:[%s6106_s18 + $0xc] sm:$0xf] %vm3515_vm10, %v3816_v51  ;;  %3518 = vst.msk [vmem:[%s6106_s18 + $0x8] sm:$0xf] %vm3515_vm10, %v3815_v20  ;;  %v4464_v37 = vpop.permute.xlu0 %4463 }
 0x4e8   : > { %v4466_v63 = vunpack.i.h.bf16 %v4464_v37  ;;  %v4465_v1 = vunpack.i.l.bf16 %v4464_v37 }
 0x4ea   : > { %v3430_v11 = vsel %vm3424_vm9, %v6017_v13, %v4466_v63  ;;  %v3429_v0 = vsel %vm3424_vm9, %v6012_v22, %v4465_v1 }
 0x4eb   : > { %v3818_v6 = vpack.c.bf16 %v3430_v11, %v3430_v11  ;;  %v3817_v15 = vpack.c.bf16 %v3429_v0, %v3429_v0 }
 0x4ed   : > { %3521 = vst.msk [vmem:[%s6106_s18 + $0x14] sm:$0xf] %vm3515_vm10, %v3818_v6  ;;  %3520 = vst.msk [vmem:[%s6106_s18 + $0x10] sm:$0xf] %vm3515_vm10, %v3817_v15 }
 0x4ef   : > { %v4469_v62 = vpop.permute.xlu1 %4468 }
 0x4f0   : > { %v4471_v41 = vunpack.i.h.bf16 %v4469_v62  ;;  %v4470_v14 = vunpack.i.l.bf16 %v4469_v62 }
 0x4f2   : > { %v3432_v3 = vsel %vm3424_vm9, %v6027_v19, %v4471_v41  ;;  %v3431_v13 = vsel %vm3424_vm9, %v6022_v24, %v4470_v14 }
 0x4f3   : > { %v3820_v57 = vpack.c.bf16 %v3432_v3, %v3432_v3  ;;  %v3819_v5 = vpack.c.bf16 %v3431_v13, %v3431_v13 }
 0x4f5   : > { %3523 = vst.msk [vmem:[%s6106_s18 + $0x1c] sm:$0xf] %vm3515_vm10, %v3820_v57  ;;  %3522 = vst.msk [vmem:[%s6106_s18 + $0x18] sm:$0xf] %vm3515_vm10, %v3819_v5 }
 0x4f8   : > { %v4474_v22 = vpop.permute.xlu0 %4473 }
 0x4f9   : > { %v4476_v49 = vunpack.i.h.bf16 %v4474_v22  ;;  %v4475_v8 = vunpack.i.l.bf16 %v4474_v22 }
 0x4fb   : > { %v3434_v21 = vsel %vm3424_vm9, %v6037_v9, %v4476_v49  ;;  %v3433_v19 = vsel %vm3424_vm9, %v6032_v17, %v4475_v8 }
 0x4fc   : > { %v3822_v44 = vpack.c.bf16 %v3434_v21, %v3434_v21  ;;  %v3821_v48 = vpack.c.bf16 %v3433_v19, %v3433_v19 }
 0x4fe   : > { %3525 = vst.msk [vmem:[%s6106_s18 + $0x24] sm:$0xf] %vm3515_vm10, %v3822_v44  ;;  %3524 = vst.msk [vmem:[%s6106_s18 + $0x20] sm:$0xf] %vm3515_vm10, %v3821_v48 }
 0x500   : > { %v4479_v24 = vpop.permute.xlu1 %4478 }
 0x501   : > { %v4481_v4 = vunpack.i.h.bf16 %v4479_v24  ;;  %v4480_v10 = vunpack.i.l.bf16 %v4479_v24 }
 0x503   : > { %v3436_v55 = vsel %vm3424_vm9, %v6046_v27, %v4481_v4  ;;  %v3435_v9 = vsel %vm3424_vm9, %v6042_v53, %v4480_v10 }
 0x504   : > { %v3824_v39 = vpack.c.bf16 %v3436_v55, %v3436_v55  ;;  %v3823_v35 = vpack.c.bf16 %v3435_v9, %v3435_v9 }
 0x506   : > { %3527 = vst.msk [vmem:[%s6106_s18 + $0x2c] sm:$0xf] %vm3515_vm10, %v3824_v39  ;;  %3526 = vst.msk [vmem:[%s6106_s18 + $0x28] sm:$0xf] %vm3515_vm10, %v3823_v35 }
 0x508   : > { %v4484_v17 = vpop.permute.xlu0 %4483 }
 0x509   : > { %v4486_v47 = vunpack.i.h.bf16 %v4484_v17  ;;  %v4485_v59 = vunpack.i.l.bf16 %v4484_v17 }
 0x50b   : > { %v3438_v54 = vsel %vm3424_vm9, %v6054_v36, %v4486_v47  ;;  %v3437_v27 = vsel %vm3424_vm9, %v6050_v32, %v4485_v59 }
 0x50c   : > { %v3826_v50 = vpack.c.bf16 %v3438_v54, %v3438_v54  ;;  %v3825_v43 = vpack.c.bf16 %v3437_v27, %v3437_v27 }
 0x50e   : > { %3529 = vst.msk [vmem:[%s6106_s18 + $0x34] sm:$0xf] %vm3515_vm10, %v3826_v50  ;;  %3528 = vst.msk [vmem:[%s6106_s18 + $0x30] sm:$0xf] %vm3515_vm10, %v3825_v43 }
 0x510   : > { %v4489_v53 = vpop.permute.xlu1 %4488 }
 0x511   : > { %v4491_v52 = vunpack.i.h.bf16 %v4489_v53  ;;  %v4490_v33 = vunpack.i.l.bf16 %v4489_v53 }
 0x513   : > { %v3440_v40 = vsel %vm3424_vm9, %v6062_v26, %v4491_v52  ;;  %v3439_v36 = vsel %vm3424_vm9, %v6058_v46, %v4490_v33 }
 0x514   : > { %v3828_v23 = vpack.c.bf16 %v3440_v40, %v3440_v40  ;;  %v3827_v38 = vpack.c.bf16 %v3439_v36, %v3439_v36 }
 0x516   : > { %3531 = vst.msk [vmem:[%s6106_s18 + $0x3c] sm:$0xf] %vm3515_vm10, %v3828_v23  ;;  %3530 = vst.msk [vmem:[%s6106_s18 + $0x38] sm:$0xf] %vm3515_vm10, %v3827_v38 }
 0x518   : > { %v4494_v32 = vpop.permute.xlu0 %4493 }
 0x519   : > { %v4496_v28 = vunpack.i.h.bf16 %v4494_v32  ;;  %v4495_v7 = vunpack.i.l.bf16 %v4494_v32 }
 0x51b   : > { %v3442_v18 = vsel %vm3424_vm9, %v6070_v25, %v4496_v28  ;;  %v3441_v31 = vsel %vm3424_vm9, %v6066_v29, %v4495_v7 }
 0x51c   : > { %v3830_v30 = vpack.c.bf16 %v3442_v18, %v3442_v18  ;;  %v3829_v26 = vpack.c.bf16 %v3441_v31, %v3441_v31 }
 0x51e   : > { %3533 = vst.msk [vmem:[%s6106_s18 + $0x44] sm:$0xf] %vm3515_vm10, %v3830_v30  ;;  %3532 = vst.msk [vmem:[%s6106_s18 + $0x40] sm:$0xf] %vm3515_vm10, %v3829_v26 }
 0x51f PF: > { %s17_s28 = sadd.s32 1, %s4781_s28   ;;  %s6203_s24 = smov %s4773_s26 }
 0x520   : > { %p14_p7 = scmp.ge.s32.totalorder %s17_s28, 6   ;;  %s6204_s25 = smov %s4777_s27 }
 0x521   : > { %s6205_s26 = smov %s6208_s29  ;;  %s6206_s27 = smov %s6212_s30 }
 0x522   :  { %16 = sbr.rel (!%p14_p7) target bundleno = 3 (0x3), region = 79 }

</bundles_post_ra>
